<compile_context>
chip_gen: v5e
topology: v5e:2x2
jax: 0.10.0
libtpu: 0.0.40
codegen_flags: <defaults>
</compile_context>

<pallas_src>
import math

import jax
import jax.numpy as jnp
from jax.experimental import pallas as pl
from jax.experimental.pallas import tpu as pltpu


# ------------------------------ Pallas kernel --------------------------------

def _block_kernel(xp_ref, x_ref, wv_ref, bv_ref, taps_ref, bdw_ref,
                  wp_ref, bp_ref, w1_ref, b1_ref, w2_ref, b2_ref,
                  out_ref, v5_ref):
    """Fused TransformerBlock (use_attn=False, DWConv) for the whole batch."""
    B, Hp, _ = xp_ref.shape
    BH, L = x_ref.shape                      # L = W*C = 128
    H = BH // B
    KW = 5

    # --- V = Conv1x1(x) on the reflect-padded image, with the 5 horizontal
    # --- DW-conv offsets folded into the weight:
    # ---   v5[b, hp, kw*L + w*C + d] = Vpad[b, hp, (w+kw)*C + d]
    wv = wv_ref[...]                         # (Wp*C, 5*L)
    bv = bv_ref[...]                         # (1, 5*L)
    for b in range(B):                       # B=2, static unroll
        v5_ref[b] = jnp.dot(xp_ref[b], wv,
                            preferred_element_type=jnp.float32) + bv

    # --- depthwise 5x5 conv: 25 relayout-free FMAs per image -----------------
    taps = taps_ref[...]                     # (5, 5, L), taps pre-tiled over W
    d_imgs = []
    for b in range(B):
        acc = jnp.zeros((H, L), jnp.float32)
        for kh in range(KW):
            rows = v5_ref[b, kh:kh + H, :]            # (H, 5*L) static row slice
            for kw in range(KW):
                blk = rows[:, kw * L:(kw + 1) * L]    # 128-aligned lane slice
                tap = taps[kh, kw:kw + 1, :]          # (1, L)
                acc = acc + tap * blk
        d_imgs.append(acc)
    d = jnp.concatenate(d_imgs, axis=0) + bdw_ref[...]        # (B*H, L)

    # --- proj 1x1, residual, MLP (1x1 -> ReLU -> 1x1), residual --------------
    x = x_ref[...]                                             # (B*H, L)
    a = jnp.dot(d, wp_ref[...],
                preferred_element_type=jnp.float32) + bp_ref[...]
    x1 = x + a
    h = jnp.maximum(
        jnp.dot(x1, w1_ref[...],
                preferred_element_type=jnp.float32) + b1_ref[...], 0.0)
    m = jnp.dot(h, w2_ref[...],
                preferred_element_type=jnp.float32) + b2_ref[...]

    # single dense (B*H, 128) unmasked store
    out_ref[...] = (x1 + m).astype(out_ref.dtype)


# --------------------------- wrapper / weight repack --------------------------

def _blockdiag(w, reps):
    """(Cin, Cout) -> (reps*Cin, reps*Cout) block-diagonal (per-pixel 1x1 conv
    in the channels-interleaved lane layout)."""
    cin, cout = w.shape
    eye = jnp.eye(reps, dtype=w.dtype)
    return jnp.einsum("ij,cd->icjd", eye, w).reshape(reps * cin, reps * cout)


def _v_shift_weight(wv, W, KW):
    """Fold the KW horizontal DW-conv offsets into the V 1x1-conv weight.

    Returns (Wp*C, KW*W*C) with
      big[wp*C + c, kw*W*C + w*C + d] = wv[c, d]  if wp == w + kw  else 0.
    """
    C = wv.shape[0]
    Wp = W + KW - 1
    wp_ids = jnp.arange(Wp)[:, None, None]                    # (Wp, 1, 1)
    kw_ids = jnp.arange(KW)[None, :, None]                    # (1, KW, 1)
    w_ids = jnp.arange(W)[None, None, :]                      # (1, 1, W)
    sel = (wp_ids == w_ids + kw_ids).astype(wv.dtype)          # (Wp, KW, W)
    big = jnp.einsum("pkw,cd->pckwd", sel, wv)                 # (Wp, C, KW, W, C)
    return big.reshape(Wp * C, KW * W * C)


def transformer_block(x_nchw, p):
    """One TransformerBlock forward (use_attn=False, conv_type='DWConv').

    x_nchw: (B, C, H, W) float32, PyTorch layout.
    """
    B, C, H, W = x_nchw.shape
    KW, PAD = 5, 2
    Hp, Wp = H + 2 * PAD, W + 2 * PAD
    Ch = p["w1"].shape[1]
    L = W * C                       # 128 lanes
    Lh = W * Ch                     # 512 lanes (MLP hidden)

    # --- layout plumbing (outside the kernel): NCHW -> channels-interleaved ---
    x_nhwc = jnp.transpose(x_nchw, (0, 2, 3, 1))                       # (B,H,W,C)
    xp = jnp.pad(x_nhwc, ((0, 0), (PAD, PAD), (PAD, PAD), (0, 0)),
                 mode="reflect").reshape(B, Hp, Wp * C)                # (B,Hp,Wp*C)
    x2 = x_nhwc.reshape(B * H, L)                                      # (B*H, W*C)

    # --- one-time weight repacking (lane-dense, MXU-aligned K/N) --------------
    wv_big = _v_shift_weight(p["wv"], W, KW)                 # (Wp*C, 5*W*C)
    bv_big = jnp.tile(p["bv"], (KW * W,))[None, :]           # (1, 5*W*C)
    taps = jnp.tile(p["wdw"][:, :, None, :],
                    (1, 1, W, 1)).reshape(KW, KW, L)         # (5, 5, W*C)
    bdw_t = jnp.tile(p["bdw"], (W,))[None, :]                # (1, L)
    wp_bd = _blockdiag(p["wp"], W)                           # (L, L)
    bp_t = jnp.tile(p["bp"], (W,))[None, :]                  # (1, L)
    w1_bd = _blockdiag(p["w1"], W)                           # (L, Lh)
    b1_t = jnp.tile(p["b1"], (W,))[None, :]                  # (1, Lh)
    w2_bd = _blockdiag(p["w2"], W)                           # (Lh, L)
    b2_t = jnp.tile(p["b2"], (W,))[None, :]                  # (1, L)

    def full(shape):
        return pl.BlockSpec(shape, lambda i: (0,) * len(shape))

    out2 = pl.pallas_call(
        _block_kernel,
        out_shape=jax.ShapeDtypeStruct((B * H, L), x_nchw.dtype),
        grid=(1,),                                   # whole batch in one step
        in_specs=[
            full((B, Hp, Wp * C)), full((B * H, L)),
            full(wv_big.shape), full(bv_big.shape),
            full(taps.shape), full(bdw_t.shape),
            full(wp_bd.shape), full(bp_t.shape),
            full(w1_bd.shape), full(b1_t.shape),
            full(w2_bd.shape), full(b2_t.shape),
        ],
        out_specs=full((B * H, L)),
        scratch_shapes=[pltpu.VMEM((B, Hp, KW * L), jnp.float32)],   # shifted V
        compiler_params=pltpu.CompilerParams(
            dimension_semantics=("arbitrary",)),
    )(xp, x2, wv_big, bv_big, taps, bdw_t, wp_bd, bp_t,
      w1_bd, b1_t, w2_bd, b2_t)

    return jnp.transpose(out2.reshape(B, H, W, C), (0, 3, 1, 2))     # -> NCHW


# ---------------------------- parameter construction --------------------------

def _trunc_normal(key, shape, std):
    return std * jax.random.truncated_normal(key, -2.0, 2.0, shape, jnp.float32)


def init_block_params(key, network_depth, dim, mlp_ratio):
    """Deterministic init mirroring Attention/Mlp._init_weights (trunc normal,
    gain=(8*network_depth)^(-1/4), zero bias).  Pointwise conv weights stored
    as (C_in, C_out); depthwise conv as (kh, kw, C)."""
    hidden = int(dim * mlp_ratio)
    gain = (8.0 * network_depth) ** (-0.25)
    ks = jax.random.split(key, 5)

    def std(fan_in, fan_out):
        return gain * math.sqrt(2.0 / float(fan_in + fan_out))

    return {
        # Conv2d(dim, dim, 1): fan_in = fan_out = dim
        "wv": _trunc_normal(ks[0], (dim, dim), std(dim, dim)),
        "bv": jnp.zeros((dim,), jnp.float32),
        # Conv2d(dim, dim, 5, groups=dim), weight (dim,1,5,5):
        # torch fan_in = 1*25, fan_out = dim*25
        "wdw": _trunc_normal(ks[1], (5, 5, dim), std(25, 25 * dim)),
        "bdw": jnp.zeros((dim,), jnp.float32),
        "wp": _trunc_normal(ks[2], (dim, dim), std(dim, dim)),
        "bp": jnp.zeros((dim,), jnp.float32),
        "w1": _trunc_normal(ks[3], (dim, hidden), std(dim, hidden)),
        "b1": jnp.zeros((hidden,), jnp.float32),
        "w2": _trunc_normal(ks[4], (hidden, dim), std(hidden, dim)),
        "b2": jnp.zeros((dim,), jnp.float32),
    }


# ------------------------------ pure-JAX reference ----------------------------

def transformer_block_ref(x_nchw, p):
    """Straightforward reference matching the PyTorch op order."""
    x = jnp.transpose(x_nchw, (0, 2, 3, 1))
    B, H, W, C = x.shape
    v = jnp.einsum("bhwc,cd->bhwd", x, p["wv"]) + p["bv"]
    vp = jnp.pad(v, ((0, 0), (2, 2), (2, 2), (0, 0)), mode="reflect")
    acc = jnp.zeros_like(v)
    for kh in range(5):
        for kw in range(5):
            acc = acc + vp[:, kh:kh + H, kw:kw + W, :] * p["wdw"][kh, kw]
    acc = acc + p["bdw"]
    a = jnp.einsum("bhwc,cd->bhwd", acc, p["wp"]) + p["bp"]
    x1 = x + a
    h = jax.nn.relu(jnp.einsum("bhwc,cd->bhwd", x1, p["w1"]) + p["b1"])
    m = jnp.einsum("bhwc,cd->bhwd", h, p["w2"]) + p["b2"]
    return jnp.transpose(x1 + m, (0, 3, 1, 2))


# ------------------------------------ main ------------------------------------

if __name__ == "__main__":
    # TransformerBlock config: network_depth=8, dim=8, num_heads=2,
    # mlp_ratio=4.0, window_size=8, use_attn=False, conv_type='DWConv'
    network_depth, dim, mlp_ratio = 8, 8, 4.0
    B, H, W = 2, 16, 16            # dim*W = 128 -> exactly one lane tile

    key = jax.random.PRNGKey(0)
    kx, kp = jax.random.split(key)
    x = jax.random.normal(kx, (B, dim, H, W), jnp.float32)   # NCHW like PyTorch
    params = init_block_params(kp, network_depth, dim, mlp_ratio)

    fwd = jax.jit(transformer_block)
    out = jax.block_until_ready(fwd(x, params))
    ref = jax.block_until_ready(transformer_block_ref(x, params))

    assert out.shape == (B, dim, H, W)
    assert jnp.allclose(out, ref, atol=1e-4, rtol=1e-4), (
        float(jnp.max(jnp.abs(out - ref))))
    print("KERNEL_OK")
</pallas_src>

<mosaic_0001>
module attributes {stable_mosaic.version = 11 : i64} {
  func.func @_block_kernel(%arg0: i32, %arg1: memref<2x20x160xf32, #tpu.memory_space<vmem>>, %arg2: memref<32x128xf32, #tpu.memory_space<vmem>>, %arg3: memref<160x640xf32, #tpu.memory_space<vmem>>, %arg4: memref<1x640xf32, #tpu.memory_space<vmem>>, %arg5: memref<5x5x128xf32, #tpu.memory_space<vmem>>, %arg6: memref<1x128xf32, #tpu.memory_space<vmem>>, %arg7: memref<128x128xf32, #tpu.memory_space<vmem>>, %arg8: memref<1x128xf32, #tpu.memory_space<vmem>>, %arg9: memref<128x512xf32, #tpu.memory_space<vmem>>, %arg10: memref<1x512xf32, #tpu.memory_space<vmem>>, %arg11: memref<512x128xf32, #tpu.memory_space<vmem>>, %arg12: memref<1x128xf32, #tpu.memory_space<vmem>>, %arg13: memref<32x128xf32, #tpu.memory_space<vmem>>, %arg14: memref<2x20x640xf32, #tpu.memory_space<vmem>>) attributes {dimension_semantics = [#tpu.dimension_semantics<arbitrary>], iteration_bounds = array<i64: 1>, scalar_prefetch = 0 : i64, scratch_operands = 1 : i64, tpu.core_type = #tpu.core_type<tc>, window_params = [{pipeline_mode = #tpu.pipeline_mode<synchronous>, transform_indices = @transform_0, window_bounds = array<i64: 2, 20, 160>}, {pipeline_mode = #tpu.pipeline_mode<synchronous>, transform_indices = @transform_1, window_bounds = array<i64: 32, 128>}, {pipeline_mode = #tpu.pipeline_mode<synchronous>, transform_indices = @transform_2, window_bounds = array<i64: 160, 640>}, {pipeline_mode = #tpu.pipeline_mode<synchronous>, transform_indices = @transform_3, window_bounds = array<i64: 1, 640>}, {pipeline_mode = #tpu.pipeline_mode<synchronous>, transform_indices = @transform_4, window_bounds = array<i64: 5, 5, 128>}, {pipeline_mode = #tpu.pipeline_mode<synchronous>, transform_indices = @transform_5, window_bounds = array<i64: 1, 128>}, {pipeline_mode = #tpu.pipeline_mode<synchronous>, transform_indices = @transform_6, window_bounds = array<i64: 128, 128>}, {pipeline_mode = #tpu.pipeline_mode<synchronous>, transform_indices = @transform_7, window_bounds = array<i64: 1, 128>}, {pipeline_mode = #tpu.pipeline_mode<synchronous>, transform_indices = @transform_8, window_bounds = array<i64: 128, 512>}, {pipeline_mode = #tpu.pipeline_mode<synchronous>, transform_indices = @transform_9, window_bounds = array<i64: 1, 512>}, {pipeline_mode = #tpu.pipeline_mode<synchronous>, transform_indices = @transform_10, window_bounds = array<i64: 512, 128>}, {pipeline_mode = #tpu.pipeline_mode<synchronous>, transform_indices = @transform_11, window_bounds = array<i64: 1, 128>}, {pipeline_mode = #tpu.pipeline_mode<synchronous>, transform_indices = @transform_12, window_bounds = array<i64: 32, 128>}]} {
    %c0 = arith.constant 0 : index
    %c0_0 = arith.constant 0 : index
    %0 = vector.load %arg3[%c0, %c0_0] : memref<160x640xf32, #tpu.memory_space<vmem>>, vector<160x640xf32>
    %c0_1 = arith.constant 0 : index
    %c0_2 = arith.constant 0 : index
    %1 = vector.load %arg4[%c0_1, %c0_2] : memref<1x640xf32, #tpu.memory_space<vmem>>, vector<1x640xf32>
    %c0_3 = arith.constant 0 : index
    %c0_4 = arith.constant 0 : index
    %c0_5 = arith.constant 0 : index
    %2 = vector.load %arg1[%c0_3, %c0_4, %c0_5] : memref<2x20x160xf32, #tpu.memory_space<vmem>>, vector<1x20x160xf32>
    %3 = vector.shape_cast %2 : vector<1x20x160xf32> to vector<20x160xf32>
    %cst = arith.constant dense<0.000000e+00> : vector<20x640xf32>
    %4 = tpu.matmul %3, %0, %cst {dimension_numbers = #tpu.dot_dimension_numbers<[1], [0], [0], [1], [0, 0, 1, 1], [], []>} : vector<20x160xf32>, vector<160x640xf32>, vector<20x640xf32> -> vector<20x640xf32>
    %5 = vector.broadcast %1 : vector<1x640xf32> to vector<20x640xf32>
    %6 = arith.addf %4, %5 : vector<20x640xf32>
    %c0_6 = arith.constant 0 : index
    %c0_7 = arith.constant 0 : index
    %c0_8 = arith.constant 0 : index
    %7 = vector.load %arg14[%c0_6, %c0_7, %c0_8] : memref<2x20x640xf32, #tpu.memory_space<vmem>>, vector<1x20x640xf32>
    %8 = vector.shape_cast %7 : vector<1x20x640xf32> to vector<20x640xf32>
    %9 = vector.shape_cast %6 : vector<20x640xf32> to vector<1x20x640xf32>
    tpu.vector_store %arg14[%c0_6, %c0_7, %c0_8], %9 {strides = array<i32>} : memref<2x20x640xf32, #tpu.memory_space<vmem>>, vector<1x20x640xf32>,
    %c1 = arith.constant 1 : index
    %c0_9 = arith.constant 0 : index
    %c0_10 = arith.constant 0 : index
    %10 = vector.load %arg1[%c1, %c0_9, %c0_10] : memref<2x20x160xf32, #tpu.memory_space<vmem>>, vector<1x20x160xf32>
    %11 = vector.shape_cast %10 : vector<1x20x160xf32> to vector<20x160xf32>
    %cst_11 = arith.constant dense<0.000000e+00> : vector<20x640xf32>
    %12 = tpu.matmul %11, %0, %cst_11 {dimension_numbers = #tpu.dot_dimension_numbers<[1], [0], [0], [1], [0, 0, 1, 1], [], []>} : vector<20x160xf32>, vector<160x640xf32>, vector<20x640xf32> -> vector<20x640xf32>
    %13 = vector.broadcast %1 : vector<1x640xf32> to vector<20x640xf32>
    %14 = arith.addf %12, %13 : vector<20x640xf32>
    %c1_12 = arith.constant 1 : index
    %c0_13 = arith.constant 0 : index
    %c0_14 = arith.constant 0 : index
    %15 = vector.load %arg14[%c1_12, %c0_13, %c0_14] : memref<2x20x640xf32, #tpu.memory_space<vmem>>, vector<1x20x640xf32>
    %16 = vector.shape_cast %15 : vector<1x20x640xf32> to vector<20x640xf32>
    %17 = vector.shape_cast %14 : vector<20x640xf32> to vector<1x20x640xf32>
    tpu.vector_store %arg14[%c1_12, %c0_13, %c0_14], %17 {strides = array<i32>} : memref<2x20x640xf32, #tpu.memory_space<vmem>>, vector<1x20x640xf32>,
    %c0_15 = arith.constant 0 : index
    %c0_16 = arith.constant 0 : index
    %c0_17 = arith.constant 0 : index
    %18 = vector.load %arg5[%c0_15, %c0_16, %c0_17] : memref<5x5x128xf32, #tpu.memory_space<vmem>>, vector<5x5x128xf32>
    %cst_18 = arith.constant 0.000000e+00 : f32
    %19 = vector.broadcast %cst_18 : f32 to vector<16x128xf32>
    %c0_19 = arith.constant 0 : index
    %c0_20 = arith.constant 0 : index
    %c0_21 = arith.constant 0 : index
    %20 = vector.load %arg14[%c0_19, %c0_20, %c0_21] : memref<2x20x640xf32, #tpu.memory_space<vmem>>, vector<1x16x640xf32>
    %21 = vector.shape_cast %20 : vector<1x16x640xf32> to vector<16x640xf32>
    %22 = vector.extract_strided_slice %21 {offsets = [0, 0], sizes = [16, 128], strides = [1, 1]} : vector<16x640xf32> to vector<16x128xf32>
    %23 = vector.extract_strided_slice %18 {offsets = [0, 0, 0], sizes = [1, 1, 128], strides = [1, 1, 1]} : vector<5x5x128xf32> to vector<1x1x128xf32>
    %24 = vector.shape_cast %23 : vector<1x1x128xf32> to vector<1x128xf32>
    %25 = vector.broadcast %24 : vector<1x128xf32> to vector<16x128xf32>
    %26 = arith.mulf %25, %22 : vector<16x128xf32>
    %27 = arith.addf %19, %26 : vector<16x128xf32>
    %28 = vector.extract_strided_slice %21 {offsets = [0, 128], sizes = [16, 128], strides = [1, 1]} : vector<16x640xf32> to vector<16x128xf32>
    %29 = vector.extract_strided_slice %18 {offsets = [0, 1, 0], sizes = [1, 1, 128], strides = [1, 1, 1]} : vector<5x5x128xf32> to vector<1x1x128xf32>
    %30 = vector.shape_cast %29 : vector<1x1x128xf32> to vector<1x128xf32>
    %31 = vector.broadcast %30 : vector<1x128xf32> to vector<16x128xf32>
    %32 = arith.mulf %31, %28 : vector<16x128xf32>
    %33 = arith.addf %27, %32 : vector<16x128xf32>
    %34 = vector.extract_strided_slice %21 {offsets = [0, 256], sizes = [16, 128], strides = [1, 1]} : vector<16x640xf32> to vector<16x128xf32>
    %35 = vector.extract_strided_slice %18 {offsets = [0, 2, 0], sizes = [1, 1, 128], strides = [1, 1, 1]} : vector<5x5x128xf32> to vector<1x1x128xf32>
    %36 = vector.shape_cast %35 : vector<1x1x128xf32> to vector<1x128xf32>
    %37 = vector.broadcast %36 : vector<1x128xf32> to vector<16x128xf32>
    %38 = arith.mulf %37, %34 : vector<16x128xf32>
    %39 = arith.addf %33, %38 : vector<16x128xf32>
    %40 = vector.extract_strided_slice %21 {offsets = [0, 384], sizes = [16, 128], strides = [1, 1]} : vector<16x640xf32> to vector<16x128xf32>
    %41 = vector.extract_strided_slice %18 {offsets = [0, 3, 0], sizes = [1, 1, 128], strides = [1, 1, 1]} : vector<5x5x128xf32> to vector<1x1x128xf32>
    %42 = vector.shape_cast %41 : vector<1x1x128xf32> to vector<1x128xf32>
    %43 = vector.broadcast %42 : vector<1x128xf32> to vector<16x128xf32>
    %44 = arith.mulf %43, %40 : vector<16x128xf32>
    %45 = arith.addf %39, %44 : vector<16x128xf32>
    %46 = vector.extract_strided_slice %21 {offsets = [0, 512], sizes = [16, 128], strides = [1, 1]} : vector<16x640xf32> to vector<16x128xf32>
    %47 = vector.extract_strided_slice %18 {offsets = [0, 4, 0], sizes = [1, 1, 128], strides = [1, 1, 1]} : vector<5x5x128xf32> to vector<1x1x128xf32>
    %48 = vector.shape_cast %47 : vector<1x1x128xf32> to vector<1x128xf32>
    %49 = vector.broadcast %48 : vector<1x128xf32> to vector<16x128xf32>
    %50 = arith.mulf %49, %46 : vector<16x128xf32>
    %51 = arith.addf %45, %50 : vector<16x128xf32>
    %c0_22 = arith.constant 0 : index
    %c1_23 = arith.constant 1 : index
    %c0_24 = arith.constant 0 : index
    %52 = vector.load %arg14[%c0_22, %c1_23, %c0_24] : memref<2x20x640xf32, #tpu.memory_space<vmem>>, vector<1x16x640xf32>
    %53 = vector.shape_cast %52 : vector<1x16x640xf32> to vector<16x640xf32>
    %54 = vector.extract_strided_slice %53 {offsets = [0, 0], sizes = [16, 128], strides = [1, 1]} : vector<16x640xf32> to vector<16x128xf32>
    %55 = vector.extract_strided_slice %18 {offsets = [1, 0, 0], sizes = [1, 1, 128], strides = [1, 1, 1]} : vector<5x5x128xf32> to vector<1x1x128xf32>
    %56 = vector.shape_cast %55 : vector<1x1x128xf32> to vector<1x128xf32>
    %57 = vector.broadcast %56 : vector<1x128xf32> to vector<16x128xf32>
    %58 = arith.mulf %57, %54 : vector<16x128xf32>
    %59 = arith.addf %51, %58 : vector<16x128xf32>
    %60 = vector.extract_strided_slice %53 {offsets = [0, 128], sizes = [16, 128], strides = [1, 1]} : vector<16x640xf32> to vector<16x128xf32>
    %61 = vector.extract_strided_slice %18 {offsets = [1, 1, 0], sizes = [1, 1, 128], strides = [1, 1, 1]} : vector<5x5x128xf32> to vector<1x1x128xf32>
    %62 = vector.shape_cast %61 : vector<1x1x128xf32> to vector<1x128xf32>
    %63 = vector.broadcast %62 : vector<1x128xf32> to vector<16x128xf32>
    %64 = arith.mulf %63, %60 : vector<16x128xf32>
    %65 = arith.addf %59, %64 : vector<16x128xf32>
    %66 = vector.extract_strided_slice %53 {offsets = [0, 256], sizes = [16, 128], strides = [1, 1]} : vector<16x640xf32> to vector<16x128xf32>
    %67 = vector.extract_strided_slice %18 {offsets = [1, 2, 0], sizes = [1, 1, 128], strides = [1, 1, 1]} : vector<5x5x128xf32> to vector<1x1x128xf32>
    %68 = vector.shape_cast %67 : vector<1x1x128xf32> to vector<1x128xf32>
    %69 = vector.broadcast %68 : vector<1x128xf32> to vector<16x128xf32>
    %70 = arith.mulf %69, %66 : vector<16x128xf32>
    %71 = arith.addf %65, %70 : vector<16x128xf32>
    %72 = vector.extract_strided_slice %53 {offsets = [0, 384], sizes = [16, 128], strides = [1, 1]} : vector<16x640xf32> to vector<16x128xf32>
    %73 = vector.extract_strided_slice %18 {offsets = [1, 3, 0], sizes = [1, 1, 128], strides = [1, 1, 1]} : vector<5x5x128xf32> to vector<1x1x128xf32>
    %74 = vector.shape_cast %73 : vector<1x1x128xf32> to vector<1x128xf32>
    %75 = vector.broadcast %74 : vector<1x128xf32> to vector<16x128xf32>
    %76 = arith.mulf %75, %72 : vector<16x128xf32>
    %77 = arith.addf %71, %76 : vector<16x128xf32>
    %78 = vector.extract_strided_slice %53 {offsets = [0, 512], sizes = [16, 128], strides = [1, 1]} : vector<16x640xf32> to vector<16x128xf32>
    %79 = vector.extract_strided_slice %18 {offsets = [1, 4, 0], sizes = [1, 1, 128], strides = [1, 1, 1]} : vector<5x5x128xf32> to vector<1x1x128xf32>
    %80 = vector.shape_cast %79 : vector<1x1x128xf32> to vector<1x128xf32>
    %81 = vector.broadcast %80 : vector<1x128xf32> to vector<16x128xf32>
    %82 = arith.mulf %81, %78 : vector<16x128xf32>
    %83 = arith.addf %77, %82 : vector<16x128xf32>
    %c0_25 = arith.constant 0 : index
    %c2 = arith.constant 2 : index
    %c0_26 = arith.constant 0 : index
    %84 = vector.load %arg14[%c0_25, %c2, %c0_26] : memref<2x20x640xf32, #tpu.memory_space<vmem>>, vector<1x16x640xf32>
    %85 = vector.shape_cast %84 : vector<1x16x640xf32> to vector<16x640xf32>
    %86 = vector.extract_strided_slice %85 {offsets = [0, 0], sizes = [16, 128], strides = [1, 1]} : vector<16x640xf32> to vector<16x128xf32>
    %87 = vector.extract_strided_slice %18 {offsets = [2, 0, 0], sizes = [1, 1, 128], strides = [1, 1, 1]} : vector<5x5x128xf32> to vector<1x1x128xf32>
    %88 = vector.shape_cast %87 : vector<1x1x128xf32> to vector<1x128xf32>
    %89 = vector.broadcast %88 : vector<1x128xf32> to vector<16x128xf32>
    %90 = arith.mulf %89, %86 : vector<16x128xf32>
    %91 = arith.addf %83, %90 : vector<16x128xf32>
    %92 = vector.extract_strided_slice %85 {offsets = [0, 128], sizes = [16, 128], strides = [1, 1]} : vector<16x640xf32> to vector<16x128xf32>
    %93 = vector.extract_strided_slice %18 {offsets = [2, 1, 0], sizes = [1, 1, 128], strides = [1, 1, 1]} : vector<5x5x128xf32> to vector<1x1x128xf32>
    %94 = vector.shape_cast %93 : vector<1x1x128xf32> to vector<1x128xf32>
    %95 = vector.broadcast %94 : vector<1x128xf32> to vector<16x128xf32>
    %96 = arith.mulf %95, %92 : vector<16x128xf32>
    %97 = arith.addf %91, %96 : vector<16x128xf32>
    %98 = vector.extract_strided_slice %85 {offsets = [0, 256], sizes = [16, 128], strides = [1, 1]} : vector<16x640xf32> to vector<16x128xf32>
    %99 = vector.extract_strided_slice %18 {offsets = [2, 2, 0], sizes = [1, 1, 128], strides = [1, 1, 1]} : vector<5x5x128xf32> to vector<1x1x128xf32>
    %100 = vector.shape_cast %99 : vector<1x1x128xf32> to vector<1x128xf32>
    %101 = vector.broadcast %100 : vector<1x128xf32> to vector<16x128xf32>
    %102 = arith.mulf %101, %98 : vector<16x128xf32>
    %103 = arith.addf %97, %102 : vector<16x128xf32>
    %104 = vector.extract_strided_slice %85 {offsets = [0, 384], sizes = [16, 128], strides = [1, 1]} : vector<16x640xf32> to vector<16x128xf32>
    %105 = vector.extract_strided_slice %18 {offsets = [2, 3, 0], sizes = [1, 1, 128], strides = [1, 1, 1]} : vector<5x5x128xf32> to vector<1x1x128xf32>
    %106 = vector.shape_cast %105 : vector<1x1x128xf32> to vector<1x128xf32>
    %107 = vector.broadcast %106 : vector<1x128xf32> to vector<16x128xf32>
    %108 = arith.mulf %107, %104 : vector<16x128xf32>
    %109 = arith.addf %103, %108 : vector<16x128xf32>
    %110 = vector.extract_strided_slice %85 {offsets = [0, 512], sizes = [16, 128], strides = [1, 1]} : vector<16x640xf32> to vector<16x128xf32>
    %111 = vector.extract_strided_slice %18 {offsets = [2, 4, 0], sizes = [1, 1, 128], strides = [1, 1, 1]} : vector<5x5x128xf32> to vector<1x1x128xf32>
    %112 = vector.shape_cast %111 : vector<1x1x128xf32> to vector<1x128xf32>
    %113 = vector.broadcast %112 : vector<1x128xf32> to vector<16x128xf32>
    %114 = arith.mulf %113, %110 : vector<16x128xf32>
    %115 = arith.addf %109, %114 : vector<16x128xf32>
    %c0_27 = arith.constant 0 : index
    %c3 = arith.constant 3 : index
    %c0_28 = arith.constant 0 : index
    %116 = vector.load %arg14[%c0_27, %c3, %c0_28] : memref<2x20x640xf32, #tpu.memory_space<vmem>>, vector<1x16x640xf32>
    %117 = vector.shape_cast %116 : vector<1x16x640xf32> to vector<16x640xf32>
    %118 = vector.extract_strided_slice %117 {offsets = [0, 0], sizes = [16, 128], strides = [1, 1]} : vector<16x640xf32> to vector<16x128xf32>
    %119 = vector.extract_strided_slice %18 {offsets = [3, 0, 0], sizes = [1, 1, 128], strides = [1, 1, 1]} : vector<5x5x128xf32> to vector<1x1x128xf32>
    %120 = vector.shape_cast %119 : vector<1x1x128xf32> to vector<1x128xf32>
    %121 = vector.broadcast %120 : vector<1x128xf32> to vector<16x128xf32>
    %122 = arith.mulf %121, %118 : vector<16x128xf32>
    %123 = arith.addf %115, %122 : vector<16x128xf32>
    %124 = vector.extract_strided_slice %117 {offsets = [0, 128], sizes = [16, 128], strides = [1, 1]} : vector<16x640xf32> to vector<16x128xf32>
    %125 = vector.extract_strided_slice %18 {offsets = [3, 1, 0], sizes = [1, 1, 128], strides = [1, 1, 1]} : vector<5x5x128xf32> to vector<1x1x128xf32>
    %126 = vector.shape_cast %125 : vector<1x1x128xf32> to vector<1x128xf32>
    %127 = vector.broadcast %126 : vector<1x128xf32> to vector<16x128xf32>
    %128 = arith.mulf %127, %124 : vector<16x128xf32>
    %129 = arith.addf %123, %128 : vector<16x128xf32>
    %130 = vector.extract_strided_slice %117 {offsets = [0, 256], sizes = [16, 128], strides = [1, 1]} : vector<16x640xf32> to vector<16x128xf32>
    %131 = vector.extract_strided_slice %18 {offsets = [3, 2, 0], sizes = [1, 1, 128], strides = [1, 1, 1]} : vector<5x5x128xf32> to vector<1x1x128xf32>
    %132 = vector.shape_cast %131 : vector<1x1x128xf32> to vector<1x128xf32>
    %133 = vector.broadcast %132 : vector<1x128xf32> to vector<16x128xf32>
    %134 = arith.mulf %133, %130 : vector<16x128xf32>
    %135 = arith.addf %129, %134 : vector<16x128xf32>
    %136 = vector.extract_strided_slice %117 {offsets = [0, 384], sizes = [16, 128], strides = [1, 1]} : vector<16x640xf32> to vector<16x128xf32>
    %137 = vector.extract_strided_slice %18 {offsets = [3, 3, 0], sizes = [1, 1, 128], strides = [1, 1, 1]} : vector<5x5x128xf32> to vector<1x1x128xf32>
    %138 = vector.shape_cast %137 : vector<1x1x128xf32> to vector<1x128xf32>
    %139 = vector.broadcast %138 : vector<1x128xf32> to vector<16x128xf32>
    %140 = arith.mulf %139, %136 : vector<16x128xf32>
    %141 = arith.addf %135, %140 : vector<16x128xf32>
    %142 = vector.extract_strided_slice %117 {offsets = [0, 512], sizes = [16, 128], strides = [1, 1]} : vector<16x640xf32> to vector<16x128xf32>
    %143 = vector.extract_strided_slice %18 {offsets = [3, 4, 0], sizes = [1, 1, 128], strides = [1, 1, 1]} : vector<5x5x128xf32> to vector<1x1x128xf32>
    %144 = vector.shape_cast %143 : vector<1x1x128xf32> to vector<1x128xf32>
    %145 = vector.broadcast %144 : vector<1x128xf32> to vector<16x128xf32>
    %146 = arith.mulf %145, %142 : vector<16x128xf32>
    %147 = arith.addf %141, %146 : vector<16x128xf32>
    %c0_29 = arith.constant 0 : index
    %c4 = arith.constant 4 : index
    %c0_30 = arith.constant 0 : index
    %148 = vector.load %arg14[%c0_29, %c4, %c0_30] : memref<2x20x640xf32, #tpu.memory_space<vmem>>, vector<1x16x640xf32>
    %149 = vector.shape_cast %148 : vector<1x16x640xf32> to vector<16x640xf32>
    %150 = vector.extract_strided_slice %149 {offsets = [0, 0], sizes = [16, 128], strides = [1, 1]} : vector<16x640xf32> to vector<16x128xf32>
    %151 = vector.extract_strided_slice %18 {offsets = [4, 0, 0], sizes = [1, 1, 128], strides = [1, 1, 1]} : vector<5x5x128xf32> to vector<1x1x128xf32>
    %152 = vector.shape_cast %151 : vector<1x1x128xf32> to vector<1x128xf32>
    %153 = vector.broadcast %152 : vector<1x128xf32> to vector<16x128xf32>
    %154 = arith.mulf %153, %150 : vector<16x128xf32>
    %155 = arith.addf %147, %154 : vector<16x128xf32>
    %156 = vector.extract_strided_slice %149 {offsets = [0, 128], sizes = [16, 128], strides = [1, 1]} : vector<16x640xf32> to vector<16x128xf32>
    %157 = vector.extract_strided_slice %18 {offsets = [4, 1, 0], sizes = [1, 1, 128], strides = [1, 1, 1]} : vector<5x5x128xf32> to vector<1x1x128xf32>
    %158 = vector.shape_cast %157 : vector<1x1x128xf32> to vector<1x128xf32>
    %159 = vector.broadcast %158 : vector<1x128xf32> to vector<16x128xf32>
    %160 = arith.mulf %159, %156 : vector<16x128xf32>
    %161 = arith.addf %155, %160 : vector<16x128xf32>
    %162 = vector.extract_strided_slice %149 {offsets = [0, 256], sizes = [16, 128], strides = [1, 1]} : vector<16x640xf32> to vector<16x128xf32>
    %163 = vector.extract_strided_slice %18 {offsets = [4, 2, 0], sizes = [1, 1, 128], strides = [1, 1, 1]} : vector<5x5x128xf32> to vector<1x1x128xf32>
    %164 = vector.shape_cast %163 : vector<1x1x128xf32> to vector<1x128xf32>
    %165 = vector.broadcast %164 : vector<1x128xf32> to vector<16x128xf32>
    %166 = arith.mulf %165, %162 : vector<16x128xf32>
    %167 = arith.addf %161, %166 : vector<16x128xf32>
    %168 = vector.extract_strided_slice %149 {offsets = [0, 384], sizes = [16, 128], strides = [1, 1]} : vector<16x640xf32> to vector<16x128xf32>
    %169 = vector.extract_strided_slice %18 {offsets = [4, 3, 0], sizes = [1, 1, 128], strides = [1, 1, 1]} : vector<5x5x128xf32> to vector<1x1x128xf32>
    %170 = vector.shape_cast %169 : vector<1x1x128xf32> to vector<1x128xf32>
    %171 = vector.broadcast %170 : vector<1x128xf32> to vector<16x128xf32>
    %172 = arith.mulf %171, %168 : vector<16x128xf32>
    %173 = arith.addf %167, %172 : vector<16x128xf32>
    %174 = vector.extract_strided_slice %149 {offsets = [0, 512], sizes = [16, 128], strides = [1, 1]} : vector<16x640xf32> to vector<16x128xf32>
    %175 = vector.extract_strided_slice %18 {offsets = [4, 4, 0], sizes = [1, 1, 128], strides = [1, 1, 1]} : vector<5x5x128xf32> to vector<1x1x128xf32>
    %176 = vector.shape_cast %175 : vector<1x1x128xf32> to vector<1x128xf32>
    %177 = vector.broadcast %176 : vector<1x128xf32> to vector<16x128xf32>
    %178 = arith.mulf %177, %174 : vector<16x128xf32>
    %179 = arith.addf %173, %178 : vector<16x128xf32>
    %cst_31 = arith.constant 0.000000e+00 : f32
    %180 = vector.broadcast %cst_31 : f32 to vector<16x128xf32>
    %c1_32 = arith.constant 1 : index
    %c0_33 = arith.constant 0 : index
    %c0_34 = arith.constant 0 : index
    %181 = vector.load %arg14[%c1_32, %c0_33, %c0_34] : memref<2x20x640xf32, #tpu.memory_space<vmem>>, vector<1x16x640xf32>
    %182 = vector.shape_cast %181 : vector<1x16x640xf32> to vector<16x640xf32>
    %183 = vector.extract_strided_slice %182 {offsets = [0, 0], sizes = [16, 128], strides = [1, 1]} : vector<16x640xf32> to vector<16x128xf32>
    %184 = vector.extract_strided_slice %18 {offsets = [0, 0, 0], sizes = [1, 1, 128], strides = [1, 1, 1]} : vector<5x5x128xf32> to vector<1x1x128xf32>
    %185 = vector.shape_cast %184 : vector<1x1x128xf32> to vector<1x128xf32>
    %186 = vector.broadcast %185 : vector<1x128xf32> to vector<16x128xf32>
    %187 = arith.mulf %186, %183 : vector<16x128xf32>
    %188 = arith.addf %180, %187 : vector<16x128xf32>
    %189 = vector.extract_strided_slice %182 {offsets = [0, 128], sizes = [16, 128], strides = [1, 1]} : vector<16x640xf32> to vector<16x128xf32>
    %190 = vector.extract_strided_slice %18 {offsets = [0, 1, 0], sizes = [1, 1, 128], strides = [1, 1, 1]} : vector<5x5x128xf32> to vector<1x1x128xf32>
    %191 = vector.shape_cast %190 : vector<1x1x128xf32> to vector<1x128xf32>
    %192 = vector.broadcast %191 : vector<1x128xf32> to vector<16x128xf32>
    %193 = arith.mulf %192, %189 : vector<16x128xf32>
    %194 = arith.addf %188, %193 : vector<16x128xf32>
    %195 = vector.extract_strided_slice %182 {offsets = [0, 256], sizes = [16, 128], strides = [1, 1]} : vector<16x640xf32> to vector<16x128xf32>
    %196 = vector.extract_strided_slice %18 {offsets = [0, 2, 0], sizes = [1, 1, 128], strides = [1, 1, 1]} : vector<5x5x128xf32> to vector<1x1x128xf32>
    %197 = vector.shape_cast %196 : vector<1x1x128xf32> to vector<1x128xf32>
    %198 = vector.broadcast %197 : vector<1x128xf32> to vector<16x128xf32>
    %199 = arith.mulf %198, %195 : vector<16x128xf32>
    %200 = arith.addf %194, %199 : vector<16x128xf32>
    %201 = vector.extract_strided_slice %182 {offsets = [0, 384], sizes = [16, 128], strides = [1, 1]} : vector<16x640xf32> to vector<16x128xf32>
    %202 = vector.extract_strided_slice %18 {offsets = [0, 3, 0], sizes = [1, 1, 128], strides = [1, 1, 1]} : vector<5x5x128xf32> to vector<1x1x128xf32>
    %203 = vector.shape_cast %202 : vector<1x1x128xf32> to vector<1x128xf32>
    %204 = vector.broadcast %203 : vector<1x128xf32> to vector<16x128xf32>
    %205 = arith.mulf %204, %201 : vector<16x128xf32>
    %206 = arith.addf %200, %205 : vector<16x128xf32>
    %207 = vector.extract_strided_slice %182 {offsets = [0, 512], sizes = [16, 128], strides = [1, 1]} : vector<16x640xf32> to vector<16x128xf32>
    %208 = vector.extract_strided_slice %18 {offsets = [0, 4, 0], sizes = [1, 1, 128], strides = [1, 1, 1]} : vector<5x5x128xf32> to vector<1x1x128xf32>
    %209 = vector.shape_cast %208 : vector<1x1x128xf32> to vector<1x128xf32>
    %210 = vector.broadcast %209 : vector<1x128xf32> to vector<16x128xf32>
    %211 = arith.mulf %210, %207 : vector<16x128xf32>
    %212 = arith.addf %206, %211 : vector<16x128xf32>
    %c1_35 = arith.constant 1 : index
    %c1_36 = arith.constant 1 : index
    %c0_37 = arith.constant 0 : index
    %213 = vector.load %arg14[%c1_35, %c1_36, %c0_37] : memref<2x20x640xf32, #tpu.memory_space<vmem>>, vector<1x16x640xf32>
    %214 = vector.shape_cast %213 : vector<1x16x640xf32> to vector<16x640xf32>
    %215 = vector.extract_strided_slice %214 {offsets = [0, 0], sizes = [16, 128], strides = [1, 1]} : vector<16x640xf32> to vector<16x128xf32>
    %216 = vector.extract_strided_slice %18 {offsets = [1, 0, 0], sizes = [1, 1, 128], strides = [1, 1, 1]} : vector<5x5x128xf32> to vector<1x1x128xf32>
    %217 = vector.shape_cast %216 : vector<1x1x128xf32> to vector<1x128xf32>
    %218 = vector.broadcast %217 : vector<1x128xf32> to vector<16x128xf32>
    %219 = arith.mulf %218, %215 : vector<16x128xf32>
    %220 = arith.addf %212, %219 : vector<16x128xf32>
    %221 = vector.extract_strided_slice %214 {offsets = [0, 128], sizes = [16, 128], strides = [1, 1]} : vector<16x640xf32> to vector<16x128xf32>
    %222 = vector.extract_strided_slice %18 {offsets = [1, 1, 0], sizes = [1, 1, 128], strides = [1, 1, 1]} : vector<5x5x128xf32> to vector<1x1x128xf32>
    %223 = vector.shape_cast %222 : vector<1x1x128xf32> to vector<1x128xf32>
    %224 = vector.broadcast %223 : vector<1x128xf32> to vector<16x128xf32>
    %225 = arith.mulf %224, %221 : vector<16x128xf32>
    %226 = arith.addf %220, %225 : vector<16x128xf32>
    %227 = vector.extract_strided_slice %214 {offsets = [0, 256], sizes = [16, 128], strides = [1, 1]} : vector<16x640xf32> to vector<16x128xf32>
    %228 = vector.extract_strided_slice %18 {offsets = [1, 2, 0], sizes = [1, 1, 128], strides = [1, 1, 1]} : vector<5x5x128xf32> to vector<1x1x128xf32>
    %229 = vector.shape_cast %228 : vector<1x1x128xf32> to vector<1x128xf32>
    %230 = vector.broadcast %229 : vector<1x128xf32> to vector<16x128xf32>
    %231 = arith.mulf %230, %227 : vector<16x128xf32>
    %232 = arith.addf %226, %231 : vector<16x128xf32>
    %233 = vector.extract_strided_slice %214 {offsets = [0, 384], sizes = [16, 128], strides = [1, 1]} : vector<16x640xf32> to vector<16x128xf32>
    %234 = vector.extract_strided_slice %18 {offsets = [1, 3, 0], sizes = [1, 1, 128], strides = [1, 1, 1]} : vector<5x5x128xf32> to vector<1x1x128xf32>
    %235 = vector.shape_cast %234 : vector<1x1x128xf32> to vector<1x128xf32>
    %236 = vector.broadcast %235 : vector<1x128xf32> to vector<16x128xf32>
    %237 = arith.mulf %236, %233 : vector<16x128xf32>
    %238 = arith.addf %232, %237 : vector<16x128xf32>
    %239 = vector.extract_strided_slice %214 {offsets = [0, 512], sizes = [16, 128], strides = [1, 1]} : vector<16x640xf32> to vector<16x128xf32>
    %240 = vector.extract_strided_slice %18 {offsets = [1, 4, 0], sizes = [1, 1, 128], strides = [1, 1, 1]} : vector<5x5x128xf32> to vector<1x1x128xf32>
    %241 = vector.shape_cast %240 : vector<1x1x128xf32> to vector<1x128xf32>
    %242 = vector.broadcast %241 : vector<1x128xf32> to vector<16x128xf32>
    %243 = arith.mulf %242, %239 : vector<16x128xf32>
    %244 = arith.addf %238, %243 : vector<16x128xf32>
    %c1_38 = arith.constant 1 : index
    %c2_39 = arith.constant 2 : index
    %c0_40 = arith.constant 0 : index
    %245 = vector.load %arg14[%c1_38, %c2_39, %c0_40] : memref<2x20x640xf32, #tpu.memory_space<vmem>>, vector<1x16x640xf32>
    %246 = vector.shape_cast %245 : vector<1x16x640xf32> to vector<16x640xf32>
    %247 = vector.extract_strided_slice %246 {offsets = [0, 0], sizes = [16, 128], strides = [1, 1]} : vector<16x640xf32> to vector<16x128xf32>
    %248 = vector.extract_strided_slice %18 {offsets = [2, 0, 0], sizes = [1, 1, 128], strides = [1, 1, 1]} : vector<5x5x128xf32> to vector<1x1x128xf32>
    %249 = vector.shape_cast %248 : vector<1x1x128xf32> to vector<1x128xf32>
    %250 = vector.broadcast %249 : vector<1x128xf32> to vector<16x128xf32>
    %251 = arith.mulf %250, %247 : vector<16x128xf32>
    %252 = arith.addf %244, %251 : vector<16x128xf32>
    %253 = vector.extract_strided_slice %246 {offsets = [0, 128], sizes = [16, 128], strides = [1, 1]} : vector<16x640xf32> to vector<16x128xf32>
    %254 = vector.extract_strided_slice %18 {offsets = [2, 1, 0], sizes = [1, 1, 128], strides = [1, 1, 1]} : vector<5x5x128xf32> to vector<1x1x128xf32>
    %255 = vector.shape_cast %254 : vector<1x1x128xf32> to vector<1x128xf32>
    %256 = vector.broadcast %255 : vector<1x128xf32> to vector<16x128xf32>
    %257 = arith.mulf %256, %253 : vector<16x128xf32>
    %258 = arith.addf %252, %257 : vector<16x128xf32>
    %259 = vector.extract_strided_slice %246 {offsets = [0, 256], sizes = [16, 128], strides = [1, 1]} : vector<16x640xf32> to vector<16x128xf32>
    %260 = vector.extract_strided_slice %18 {offsets = [2, 2, 0], sizes = [1, 1, 128], strides = [1, 1, 1]} : vector<5x5x128xf32> to vector<1x1x128xf32>
    %261 = vector.shape_cast %260 : vector<1x1x128xf32> to vector<1x128xf32>
    %262 = vector.broadcast %261 : vector<1x128xf32> to vector<16x128xf32>
    %263 = arith.mulf %262, %259 : vector<16x128xf32>
    %264 = arith.addf %258, %263 : vector<16x128xf32>
    %265 = vector.extract_strided_slice %246 {offsets = [0, 384], sizes = [16, 128], strides = [1, 1]} : vector<16x640xf32> to vector<16x128xf32>
    %266 = vector.extract_strided_slice %18 {offsets = [2, 3, 0], sizes = [1, 1, 128], strides = [1, 1, 1]} : vector<5x5x128xf32> to vector<1x1x128xf32>
    %267 = vector.shape_cast %266 : vector<1x1x128xf32> to vector<1x128xf32>
    %268 = vector.broadcast %267 : vector<1x128xf32> to vector<16x128xf32>
    %269 = arith.mulf %268, %265 : vector<16x128xf32>
    %270 = arith.addf %264, %269 : vector<16x128xf32>
    %271 = vector.extract_strided_slice %246 {offsets = [0, 512], sizes = [16, 128], strides = [1, 1]} : vector<16x640xf32> to vector<16x128xf32>
    %272 = vector.extract_strided_slice %18 {offsets = [2, 4, 0], sizes = [1, 1, 128], strides = [1, 1, 1]} : vector<5x5x128xf32> to vector<1x1x128xf32>
    %273 = vector.shape_cast %272 : vector<1x1x128xf32> to vector<1x128xf32>
    %274 = vector.broadcast %273 : vector<1x128xf32> to vector<16x128xf32>
    %275 = arith.mulf %274, %271 : vector<16x128xf32>
    %276 = arith.addf %270, %275 : vector<16x128xf32>
    %c1_41 = arith.constant 1 : index
    %c3_42 = arith.constant 3 : index
    %c0_43 = arith.constant 0 : index
    %277 = vector.load %arg14[%c1_41, %c3_42, %c0_43] : memref<2x20x640xf32, #tpu.memory_space<vmem>>, vector<1x16x640xf32>
    %278 = vector.shape_cast %277 : vector<1x16x640xf32> to vector<16x640xf32>
    %279 = vector.extract_strided_slice %278 {offsets = [0, 0], sizes = [16, 128], strides = [1, 1]} : vector<16x640xf32> to vector<16x128xf32>
    %280 = vector.extract_strided_slice %18 {offsets = [3, 0, 0], sizes = [1, 1, 128], strides = [1, 1, 1]} : vector<5x5x128xf32> to vector<1x1x128xf32>
    %281 = vector.shape_cast %280 : vector<1x1x128xf32> to vector<1x128xf32>
    %282 = vector.broadcast %281 : vector<1x128xf32> to vector<16x128xf32>
    %283 = arith.mulf %282, %279 : vector<16x128xf32>
    %284 = arith.addf %276, %283 : vector<16x128xf32>
    %285 = vector.extract_strided_slice %278 {offsets = [0, 128], sizes = [16, 128], strides = [1, 1]} : vector<16x640xf32> to vector<16x128xf32>
    %286 = vector.extract_strided_slice %18 {offsets = [3, 1, 0], sizes = [1, 1, 128], strides = [1, 1, 1]} : vector<5x5x128xf32> to vector<1x1x128xf32>
    %287 = vector.shape_cast %286 : vector<1x1x128xf32> to vector<1x128xf32>
    %288 = vector.broadcast %287 : vector<1x128xf32> to vector<16x128xf32>
    %289 = arith.mulf %288, %285 : vector<16x128xf32>
    %290 = arith.addf %284, %289 : vector<16x128xf32>
    %291 = vector.extract_strided_slice %278 {offsets = [0, 256], sizes = [16, 128], strides = [1, 1]} : vector<16x640xf32> to vector<16x128xf32>
    %292 = vector.extract_strided_slice %18 {offsets = [3, 2, 0], sizes = [1, 1, 128], strides = [1, 1, 1]} : vector<5x5x128xf32> to vector<1x1x128xf32>
    %293 = vector.shape_cast %292 : vector<1x1x128xf32> to vector<1x128xf32>
    %294 = vector.broadcast %293 : vector<1x128xf32> to vector<16x128xf32>
    %295 = arith.mulf %294, %291 : vector<16x128xf32>
    %296 = arith.addf %290, %295 : vector<16x128xf32>
    %297 = vector.extract_strided_slice %278 {offsets = [0, 384], sizes = [16, 128], strides = [1, 1]} : vector<16x640xf32> to vector<16x128xf32>
    %298 = vector.extract_strided_slice %18 {offsets = [3, 3, 0], sizes = [1, 1, 128], strides = [1, 1, 1]} : vector<5x5x128xf32> to vector<1x1x128xf32>
    %299 = vector.shape_cast %298 : vector<1x1x128xf32> to vector<1x128xf32>
    %300 = vector.broadcast %299 : vector<1x128xf32> to vector<16x128xf32>
    %301 = arith.mulf %300, %297 : vector<16x128xf32>
    %302 = arith.addf %296, %301 : vector<16x128xf32>
    %303 = vector.extract_strided_slice %278 {offsets = [0, 512], sizes = [16, 128], strides = [1, 1]} : vector<16x640xf32> to vector<16x128xf32>
    %304 = vector.extract_strided_slice %18 {offsets = [3, 4, 0], sizes = [1, 1, 128], strides = [1, 1, 1]} : vector<5x5x128xf32> to vector<1x1x128xf32>
    %305 = vector.shape_cast %304 : vector<1x1x128xf32> to vector<1x128xf32>
    %306 = vector.broadcast %305 : vector<1x128xf32> to vector<16x128xf32>
    %307 = arith.mulf %306, %303 : vector<16x128xf32>
    %308 = arith.addf %302, %307 : vector<16x128xf32>
    %c1_44 = arith.constant 1 : index
    %c4_45 = arith.constant 4 : index
    %c0_46 = arith.constant 0 : index
    %309 = vector.load %arg14[%c1_44, %c4_45, %c0_46] : memref<2x20x640xf32, #tpu.memory_space<vmem>>, vector<1x16x640xf32>
    %310 = vector.shape_cast %309 : vector<1x16x640xf32> to vector<16x640xf32>
    %311 = vector.extract_strided_slice %310 {offsets = [0, 0], sizes = [16, 128], strides = [1, 1]} : vector<16x640xf32> to vector<16x128xf32>
    %312 = vector.extract_strided_slice %18 {offsets = [4, 0, 0], sizes = [1, 1, 128], strides = [1, 1, 1]} : vector<5x5x128xf32> to vector<1x1x128xf32>
    %313 = vector.shape_cast %312 : vector<1x1x128xf32> to vector<1x128xf32>
    %314 = vector.broadcast %313 : vector<1x128xf32> to vector<16x128xf32>
    %315 = arith.mulf %314, %311 : vector<16x128xf32>
    %316 = arith.addf %308, %315 : vector<16x128xf32>
    %317 = vector.extract_strided_slice %310 {offsets = [0, 128], sizes = [16, 128], strides = [1, 1]} : vector<16x640xf32> to vector<16x128xf32>
    %318 = vector.extract_strided_slice %18 {offsets = [4, 1, 0], sizes = [1, 1, 128], strides = [1, 1, 1]} : vector<5x5x128xf32> to vector<1x1x128xf32>
    %319 = vector.shape_cast %318 : vector<1x1x128xf32> to vector<1x128xf32>
    %320 = vector.broadcast %319 : vector<1x128xf32> to vector<16x128xf32>
    %321 = arith.mulf %320, %317 : vector<16x128xf32>
    %322 = arith.addf %316, %321 : vector<16x128xf32>
    %323 = vector.extract_strided_slice %310 {offsets = [0, 256], sizes = [16, 128], strides = [1, 1]} : vector<16x640xf32> to vector<16x128xf32>
    %324 = vector.extract_strided_slice %18 {offsets = [4, 2, 0], sizes = [1, 1, 128], strides = [1, 1, 1]} : vector<5x5x128xf32> to vector<1x1x128xf32>
    %325 = vector.shape_cast %324 : vector<1x1x128xf32> to vector<1x128xf32>
    %326 = vector.broadcast %325 : vector<1x128xf32> to vector<16x128xf32>
    %327 = arith.mulf %326, %323 : vector<16x128xf32>
    %328 = arith.addf %322, %327 : vector<16x128xf32>
    %329 = vector.extract_strided_slice %310 {offsets = [0, 384], sizes = [16, 128], strides = [1, 1]} : vector<16x640xf32> to vector<16x128xf32>
    %330 = vector.extract_strided_slice %18 {offsets = [4, 3, 0], sizes = [1, 1, 128], strides = [1, 1, 1]} : vector<5x5x128xf32> to vector<1x1x128xf32>
    %331 = vector.shape_cast %330 : vector<1x1x128xf32> to vector<1x128xf32>
    %332 = vector.broadcast %331 : vector<1x128xf32> to vector<16x128xf32>
    %333 = arith.mulf %332, %329 : vector<16x128xf32>
    %334 = arith.addf %328, %333 : vector<16x128xf32>
    %335 = vector.extract_strided_slice %310 {offsets = [0, 512], sizes = [16, 128], strides = [1, 1]} : vector<16x640xf32> to vector<16x128xf32>
    %336 = vector.extract_strided_slice %18 {offsets = [4, 4, 0], sizes = [1, 1, 128], strides = [1, 1, 1]} : vector<5x5x128xf32> to vector<1x1x128xf32>
    %337 = vector.shape_cast %336 : vector<1x1x128xf32> to vector<1x128xf32>
    %338 = vector.broadcast %337 : vector<1x128xf32> to vector<16x128xf32>
    %339 = arith.mulf %338, %335 : vector<16x128xf32>
    %340 = arith.addf %334, %339 : vector<16x128xf32>
    %341 = tpu.concatenate %179, %340 in 0 : vector<16x128xf32>, vector<16x128xf32> -> vector<32x128xf32>
    %c0_47 = arith.constant 0 : index
    %c0_48 = arith.constant 0 : index
    %342 = vector.load %arg6[%c0_47, %c0_48] : memref<1x128xf32, #tpu.memory_space<vmem>>, vector<1x128xf32>
    %343 = vector.broadcast %342 : vector<1x128xf32> to vector<32x128xf32>
    %344 = arith.addf %341, %343 : vector<32x128xf32>
    %c0_49 = arith.constant 0 : index
    %c0_50 = arith.constant 0 : index
    %345 = vector.load %arg2[%c0_49, %c0_50] : memref<32x128xf32, #tpu.memory_space<vmem>>, vector<32x128xf32>
    %c0_51 = arith.constant 0 : index
    %c0_52 = arith.constant 0 : index
    %346 = vector.load %arg7[%c0_51, %c0_52] : memref<128x128xf32, #tpu.memory_space<vmem>>, vector<128x128xf32>
    %cst_53 = arith.constant dense<0.000000e+00> : vector<32x128xf32>
    %347 = tpu.matmul %344, %346, %cst_53 {dimension_numbers = #tpu.dot_dimension_numbers<[1], [0], [0], [1], [0, 0, 1, 1], [], []>} : vector<32x128xf32>, vector<128x128xf32>, vector<32x128xf32> -> vector<32x128xf32>
    %c0_54 = arith.constant 0 : index
    %c0_55 = arith.constant 0 : index
    %348 = vector.load %arg8[%c0_54, %c0_55] : memref<1x128xf32, #tpu.memory_space<vmem>>, vector<1x128xf32>
    %349 = vector.broadcast %348 : vector<1x128xf32> to vector<32x128xf32>
    %350 = arith.addf %347, %349 : vector<32x128xf32>
    %351 = arith.addf %345, %350 : vector<32x128xf32>
    %c0_56 = arith.constant 0 : index
    %c0_57 = arith.constant 0 : index
    %352 = vector.load %arg9[%c0_56, %c0_57] : memref<128x512xf32, #tpu.memory_space<vmem>>, vector<128x512xf32>
    %cst_58 = arith.constant dense<0.000000e+00> : vector<32x512xf32>
    %353 = tpu.matmul %351, %352, %cst_58 {dimension_numbers = #tpu.dot_dimension_numbers<[1], [0], [0], [1], [0, 0, 1, 1], [], []>} : vector<32x128xf32>, vector<128x512xf32>, vector<32x512xf32> -> vector<32x512xf32>
    %c0_59 = arith.constant 0 : index
    %c0_60 = arith.constant 0 : index
    %354 = vector.load %arg10[%c0_59, %c0_60] : memref<1x512xf32, #tpu.memory_space<vmem>>, vector<1x512xf32>
    %355 = vector.broadcast %354 : vector<1x512xf32> to vector<32x512xf32>
    %356 = arith.addf %353, %355 : vector<32x512xf32>
    %cst_61 = arith.constant 0.000000e+00 : f32
    %357 = vector.broadcast %cst_61 : f32 to vector<32x512xf32>
    %358 = arith.maximumf %356, %357 : vector<32x512xf32>
    %c0_62 = arith.constant 0 : index
    %c0_63 = arith.constant 0 : index
    %359 = vector.load %arg11[%c0_62, %c0_63] : memref<512x128xf32, #tpu.memory_space<vmem>>, vector<512x128xf32>
    %cst_64 = arith.constant dense<0.000000e+00> : vector<32x128xf32>
    %360 = tpu.matmul %358, %359, %cst_64 {dimension_numbers = #tpu.dot_dimension_numbers<[1], [0], [0], [1], [0, 0, 1, 1], [], []>} : vector<32x512xf32>, vector<512x128xf32>, vector<32x128xf32> -> vector<32x128xf32>
    %c0_65 = arith.constant 0 : index
    %c0_66 = arith.constant 0 : index
    %361 = vector.load %arg12[%c0_65, %c0_66] : memref<1x128xf32, #tpu.memory_space<vmem>>, vector<1x128xf32>
    %362 = vector.broadcast %361 : vector<1x128xf32> to vector<32x128xf32>
    %363 = arith.addf %360, %362 : vector<32x128xf32>
    %364 = arith.addf %351, %363 : vector<32x128xf32>
    %c0_67 = arith.constant 0 : index
    %c0_68 = arith.constant 0 : index
    %365 = vector.load %arg13[%c0_67, %c0_68] : memref<32x128xf32, #tpu.memory_space<vmem>>, vector<32x128xf32>
    tpu.vector_store %arg13[%c0_67, %c0_68], %364 {strides = array<i32>} : memref<32x128xf32, #tpu.memory_space<vmem>>, vector<32x128xf32>,
    return
  }
  func.func @transform_0(%arg0: i32) -> (i32, i32, i32) {
    %c0_i32 = arith.constant 0 : i32
    %c0_i32_0 = arith.constant 0 : i32
    %c0_i32_1 = arith.constant 0 : i32
    %c0_i32_2 = arith.constant 0 : i32
    return %c0_i32, %c0_i32_0, %c0_i32_1 : i32, i32, i32
  }
  func.func @transform_1(%arg0: i32) -> (i32, i32) {
    %c0_i32 = arith.constant 0 : i32
    %c0_i32_0 = arith.constant 0 : i32
    %c0_i32_1 = arith.constant 0 : i32
    return %c0_i32, %c0_i32_0 : i32, i32
  }
  func.func @transform_2(%arg0: i32) -> (i32, i32) {
    %c0_i32 = arith.constant 0 : i32
    %c0_i32_0 = arith.constant 0 : i32
    %c0_i32_1 = arith.constant 0 : i32
    return %c0_i32, %c0_i32_0 : i32, i32
  }
  func.func @transform_3(%arg0: i32) -> (i32, i32) {
    %c0_i32 = arith.constant 0 : i32
    %c0_i32_0 = arith.constant 0 : i32
    %c0_i32_1 = arith.constant 0 : i32
    return %c0_i32, %c0_i32_0 : i32, i32
  }
  func.func @transform_4(%arg0: i32) -> (i32, i32, i32) {
    %c0_i32 = arith.constant 0 : i32
    %c0_i32_0 = arith.constant 0 : i32
    %c0_i32_1 = arith.constant 0 : i32
    %c0_i32_2 = arith.constant 0 : i32
    return %c0_i32, %c0_i32_0, %c0_i32_1 : i32, i32, i32
  }
  func.func @transform_5(%arg0: i32) -> (i32, i32) {
    %c0_i32 = arith.constant 0 : i32
    %c0_i32_0 = arith.constant 0 : i32
    %c0_i32_1 = arith.constant 0 : i32
    return %c0_i32, %c0_i32_0 : i32, i32
  }
  func.func @transform_6(%arg0: i32) -> (i32, i32) {
    %c0_i32 = arith.constant 0 : i32
    %c0_i32_0 = arith.constant 0 : i32
    %c0_i32_1 = arith.constant 0 : i32
    return %c0_i32, %c0_i32_0 : i32, i32
  }
  func.func @transform_7(%arg0: i32) -> (i32, i32) {
    %c0_i32 = arith.constant 0 : i32
    %c0_i32_0 = arith.constant 0 : i32
    %c0_i32_1 = arith.constant 0 : i32
    return %c0_i32, %c0_i32_0 : i32, i32
  }
  func.func @transform_8(%arg0: i32) -> (i32, i32) {
    %c0_i32 = arith.constant 0 : i32
    %c0_i32_0 = arith.constant 0 : i32
    %c0_i32_1 = arith.constant 0 : i32
    return %c0_i32, %c0_i32_0 : i32, i32
  }
  func.func @transform_9(%arg0: i32) -> (i32, i32) {
    %c0_i32 = arith.constant 0 : i32
    %c0_i32_0 = arith.constant 0 : i32
    %c0_i32_1 = arith.constant 0 : i32
    return %c0_i32, %c0_i32_0 : i32, i32
  }
  func.func @transform_10(%arg0: i32) -> (i32, i32) {
    %c0_i32 = arith.constant 0 : i32
    %c0_i32_0 = arith.constant 0 : i32
    %c0_i32_1 = arith.constant 0 : i32
    return %c0_i32, %c0_i32_0 : i32, i32
  }
  func.func @transform_11(%arg0: i32) -> (i32, i32) {
    %c0_i32 = arith.constant 0 : i32
    %c0_i32_0 = arith.constant 0 : i32
    %c0_i32_1 = arith.constant 0 : i32
    return %c0_i32, %c0_i32_0 : i32, i32
  }
  func.func @transform_12(%arg0: i32) -> (i32, i32) {
    %c0_i32 = arith.constant 0 : i32
    %c0_i32_0 = arith.constant 0 : i32
    %c0_i32_1 = arith.constant 0 : i32
    return %c0_i32, %c0_i32_0 : i32, i32
  }
}

</mosaic_0001>

<bundles_post_ra>
// kernel: tile.32
= control target key start
LH: loop header
LB: loop body
LE: loop exit
PB: predicated region body
PF: predicated region fallthrough
CT: control target
= control target key end

     0   :  { %s76_s0 = inlined_call_operand.vmem [shape: f32[8], index: 0, kind: input, shape index: {}]   ;;  %s77_s1 = inlined_call_operand.vmem [shape: f32[80,8], index: 1, kind: output, shape index: {}]  }
   0x1   :  { %v4_v0 = vld [vmem:[%s76_s0] ss:$0 sm:$0xff] }
   0x2   :  { %5 = vst [vmem:[%s77_s1] sm:$0xff] %v4_v0 }
   0x3   :  { %24 = vst [vmem:[%s77_s1 + $0x8] sm:$0xff] %v4_v0 }
   0x4   :  { %25 = vst [vmem:[%s77_s1 + $0x10] sm:$0xff] %v4_v0 }
   0x5   :  { %26 = vst [vmem:[%s77_s1 + $0x18] sm:$0xff] %v4_v0 }
   0x6   :  { %27 = vst [vmem:[%s77_s1 + $0x20] sm:$0xff] %v4_v0 }
   0x7   :  { %28 = vst [vmem:[%s77_s1 + $0x28] sm:$0xff] %v4_v0 }
   0x8   :  { %29 = vst [vmem:[%s77_s1 + $0x30] sm:$0xff] %v4_v0 }
   0x9   :  { %30 = vst [vmem:[%s77_s1 + $0x38] sm:$0xff] %v4_v0 }
   0xa   :  { %31 = vst [vmem:[%s77_s1 + $0x40] sm:$0xff] %v4_v0 }
   0xb   :  { %32 = vst [vmem:[%s77_s1 + $0x48] sm:$0xff] %v4_v0 }

// kernel: tile.33
= control target key start
LH: loop header
LB: loop body
LE: loop exit
PB: predicated region body
PF: predicated region fallthrough
CT: control target
= control target key end

     0   :  { %vm6_vm0 = vcmask 1043458   ;;  %vm10_vm1 = vcmask 1044484   ;;  %s17_s6 = smov 3  ;;  %s20_s7 = smov 12  ;;  %vm12_vm2 = vcmask 64512   ;;  %vm30_vm3 = vcmask 1048512   ;;  %s597_s0 = inlined_call_operand.vmem [shape: f32[80,8], index: 0, kind: input, shape index: {}]   ;;  %s598_s1 = inlined_call_operand.vmem [shape: f32[1,640], index: 1, kind: output, shape index: {}]  }
   0x1   :  { %v319_v0 = vld [vmem:[%s597_s0 + $0x4b] sm:$0x10]   ;;  %s53_s14 = smov 3  ;;  %s56_s17 = smov 12  ;;  %v325_v5 = vld [vmem:[%s597_s0 + $0x49] sm:$0x10]  }
   0x2   :  { %v317_v1 = vld [vmem:[%s597_s0 + $0xf] ss:$16 sm:%s17_s6]   ;;  %v323_v4 = vld [vmem:[%s597_s0 + $0xd] ss:$16 sm:%s53_s14]   ;;  %s35_s22 = smov 3  ;;  %s38_s23 = smov 12 }
   0x3   :  { %v318_v2 = vld [vmem:[%s597_s0 + $0xf] ss:$16 sm:%s20_s7]   ;;  %v324_v7 = vld [vmem:[%s597_s0 + $0xd] ss:$16 sm:%s56_s17]   ;;  %s381_s24 = smov 120   ;;  %s71_s27 = smov 3 }
   0x4   :  { %v23_v3 = vsel %vm6_vm0, %v318_v2, %v317_v1  ;;  %v59_v8 = vsel %vm6_vm0, %v324_v7, %v323_v4  ;;  %v320_v9 = vld [vmem:[%s597_s0 + $0xe] ss:$16 sm:%s35_s22]   ;;  %v326_v12 = vld [vmem:[%s597_s0 + $0xc] ss:$16 sm:%s71_s27]   ;;  %s74_s3 = smov 12  ;;  %s382_s4 = smov 104  }
   0x5   :  { %v27_v6 = vsel %vm10_vm1, %v319_v0, %v23_v3  ;;  %v63_v10 = vsel %vm10_vm1, %v325_v5, %v59_v8  ;;  %v321_v11 = vld [vmem:[%s597_s0 + $0xe] ss:$16 sm:%s38_s23]   ;;  %v327_v15 = vld [vmem:[%s597_s0 + $0xc] ss:$16 sm:%s74_s3]   ;;  %s125_s9 = smov 3  ;;  %s128_s12 = smov 12 }
   0x6   :  { %28 = vrot.lane.b32.xlu0 %v27_v6, %s381_s24  ;;  %64 = vrot.lane.b32.xlu1 %v63_v10, %s382_s4  ;;  %v41_v13 = vsel %vm6_vm0, %v321_v11, %v320_v9  ;;  %v322_v14 = vld [vmem:[%s597_s0 + $0x4a] sm:$0x10]   ;;  %v77_v16 = vsel %vm6_vm0, %v327_v15, %v326_v12  ;;  %v328_v17 = vld [vmem:[%s597_s0 + $0x48] sm:$0x10]   ;;  %s143_s13 = smov 3  ;;  %s146_s14 = smov 12 }
   0x7   :  { %v45_v18 = vsel %vm10_vm1, %v322_v14, %v41_v13  ;;  %v335_v19 = vld [vmem:[%s597_s0 + $0x9] ss:$16 sm:%s125_s9]   ;;  %v81_v20 = vsel %vm10_vm1, %v328_v17, %v77_v16  ;;  %v338_v22 = vld [vmem:[%s597_s0 + $0x8] ss:$16 sm:%s143_s13]   ;;  %s383_s21 = smov 112   ;;  %s89_s24 = smov 3 }
   0x8   :  { %v336_v21 = vld [vmem:[%s597_s0 + $0x9] ss:$16 sm:%s128_s12]   ;;  %v339_v23 = vld [vmem:[%s597_s0 + $0x8] ss:$16 sm:%s146_s14]   ;;  %s92_s25 = smov 12  ;;  %s384_s3 = smov 96  }
   0x9   :  { %v331_v24 = vld [vmem:[%s597_s0 + $0x47] sm:$0x10]   ;;  %v131_v27 = vsel %vm6_vm0, %v336_v21, %v335_v19  ;;  %v337_v28 = vld [vmem:[%s597_s0 + $0x45] sm:$0x10]   ;;  %s179_s6 = smov 3  ;;  %v149_v31 = vsel %vm6_vm0, %v339_v23, %v338_v22  ;;  %s182_s9 = smov 12 }
   0xa   :  { %v329_v25 = vld [vmem:[%s597_s0 + $0xb] ss:$16 sm:%s89_s24]   ;;  %v340_v32 = vld [vmem:[%s597_s0 + $0x44] sm:$0x10]   ;;  %s385_s10 = smov 88   ;;  %s107_s11 = smov 3  ;;  %v135_v33 = vsel %vm10_vm1, %v337_v28, %v131_v27 }
   0xb   :  { %v330_v26 = vld [vmem:[%s597_s0 + $0xb] ss:$16 sm:%s92_s25]   ;;  %v332_v34 = vld [vmem:[%s597_s0 + $0xa] ss:$16 sm:%s107_s11]   ;;  %s110_s14 = smov 12  ;;  %s197_s15 = smov 3  ;;  %v153_v37 = vsel %vm10_vm1, %v340_v32, %v149_v31 }
   0xc   :  { %v95_v29 = vsel %vm6_vm0, %v330_v26, %v329_v25  ;;  %s200_s16 = smov 12  ;;  %v333_v35 = vld [vmem:[%s597_s0 + $0xa] ss:$16 sm:%s110_s14]   ;;  %v344_v38 = vld [vmem:[%s597_s0 + $0x6] ss:$16 sm:%s179_s6]   ;;  %s386_s25 = smov 72  }
   0xd   :  { %v99_v30 = vsel %vm10_vm1, %v331_v24, %v95_v29  ;;  %v334_v36 = vld [vmem:[%s597_s0 + $0x46] sm:$0x10]   ;;  %v345_v39 = vld [vmem:[%s597_s0 + $0x6] ss:$16 sm:%s182_s9]   ;;  %v113_v40 = vsel %vm6_vm0, %v333_v35, %v332_v34  ;;  %s161_s26 = smov 3  ;;  %s164_s27 = smov 12 }
   0xe   :  { %46 = vrot.lane.b32.xlu0 %v45_v18, %s383_s21  ;;  %82 = vrot.lane.b32.xlu1 %v81_v20, %s384_s3  ;;  %v347_v41 = vld [vmem:[%s597_s0 + $0x5] ss:$16 sm:%s197_s15]   ;;  %v117_v43 = vsel %vm10_vm1, %v334_v36, %v113_v40  ;;  %s387_s3 = smov 64   ;;  %v185_v44 = vsel %vm6_vm0, %v345_v39, %v344_v38  ;;  %s233_s12 = smov 3  ;;  %vm48_vm4 = vcmask 982912   ;;  %vm66_vm5 = vcmask 917312  }
   0xf   :  { %100 = vrot.lane.b32.xlu2 %v99_v30, %s385_s10  ;;  %v348_v42 = vld [vmem:[%s597_s0 + $0x5] ss:$16 sm:%s200_s16]   ;;  %v346_v45 = vld [vmem:[%s597_s0 + $0x42] sm:$0x10]   ;;  %s236_s13 = smov 12  ;;  %s388_s14 = smov 80  }
  0x10   :  { %v341_v46 = vld [vmem:[%s597_s0 + $0x7] ss:$16 sm:%s161_s26]   ;;  %v203_v48 = vsel %vm6_vm0, %v348_v42, %v347_v41  ;;  %v349_v49 = vld [vmem:[%s597_s0 + $0x41] sm:$0x10]   ;;  %v189_v50 = vsel %vm10_vm1, %v346_v45, %v185_v44  ;;  %s251_s15 = smov 3  ;;  %s254_s16 = smov 12 }
  0x11   :  { %v342_v47 = vld [vmem:[%s597_s0 + $0x7] ss:$16 sm:%s164_s27]   ;;  %v207_v53 = vsel %vm10_vm1, %v349_v49, %v203_v48  ;;  %v353_v54 = vld [vmem:[%s597_s0 + $0x3] ss:$16 sm:%s233_s12]   ;;  %s389_s23 = smov 48   ;;  %s215_s24 = smov 3 }
  0x12   :  { %v167_v51 = vsel %vm6_vm0, %v342_v47, %v341_v46  ;;  %v343_v52 = vld [vmem:[%s597_s0 + $0x43] sm:$0x10]   ;;  %v354_v55 = vld [vmem:[%s597_s0 + $0x3] ss:$16 sm:%s236_s13]   ;;  %s390_s30 = smov 40   ;;  %s391_s10 = smov 56  }
  0x13   :  { %v356_v56 = vld [vmem:[%s597_s0 + $0x2] ss:$16 sm:%s251_s15]   ;;  %v171_v58 = vsel %vm10_vm1, %v343_v52, %v167_v51  ;;  %v239_v59 = vsel %vm6_vm0, %v354_v55, %v353_v54  ;;  %v355_v60 = vld [vmem:[%s597_s0 + $0x3f] sm:$0x10]   ;;  %v352_v3 = vld [vmem:[%s597_s0 + $0x40] sm:$0x10]  }
  0x14   :  { %v357_v57 = vld [vmem:[%s597_s0 + $0x2] ss:$16 sm:%s254_s16]   ;;  %v350_v61 = vld [vmem:[%s597_s0 + $0x4] ss:$16 sm:%s215_s24]   ;;  %v243_v1 = vsel %vm10_vm1, %v355_v60, %v239_v59  ;;  %s392_s13 = smov 24   ;;  %s272_s15 = smov 12 }
  0x15   :  { %v257_v63 = vsel %vm6_vm0, %v357_v57, %v356_v56  ;;  %v358_v0 = vld [vmem:[%s597_s0 + $0x3e] sm:$0x10]   ;;  %s393_s16 = smov 16   ;;  %v360_v7 = vld [vmem:[%s597_s0 + $0x1] ss:$16 sm:%s272_s15]   ;;  %s394_s21 = smov 32  }
  0x16   :  { %136 = vrot.lane.b32.xlu0 %v135_v33, %s386_s25  ;;  %154 = vrot.lane.b32.xlu1 %v153_v37, %s387_s3  ;;  %s218_s25 = smov 12  ;;  %v261_v4 = vsel %vm10_vm1, %v358_v0, %v257_v63  ;;  %v361_v9 = vld [vmem:[%s597_s0 + $0x3d] sm:$0x10]   ;;  %s395_s24 = smov 8   ;;  %v316_v11 = vld [vmem:[%s597_s0 + $0x3c] sm:$0x10]  }
  0x17   :  { %118 = vrot.lane.b32.xlu2 %v117_v43, %s388_s14  ;;  %v351_v62 = vld [vmem:[%s597_s0 + $0x4] ss:$16 sm:%s218_s25]   ;;  %s269_s14 = smov 3  ;;  %s2_s25 = smov 3  ;;  %vm84_vm6 = vcmask 851712   ;;  %vm102_vm7 = vcmask 786112  }
  0x18   :  { %v221_v2 = vsel %vm6_vm0, %v351_v62, %v350_v61  ;;  %v359_v6 = vld [vmem:[%s597_s0 + $0x1] ss:$16 sm:%s269_s14]   ;;  %s4_s26 = smov 12  ;;  %v3_v12 = vld [vmem:[%s597_s0] ss:$16 sm:%s2_s25]   ;;  %vm120_vm8 = vcmask 720512  }
  0x19   :  { %v225_v5 = vsel %vm10_vm1, %v352_v3, %v221_v2  ;;  %v275_v8 = vsel %vm6_vm0, %v360_v7, %v359_v6  ;;  %v5_v13 = vld [vmem:[%s597_s0] ss:$16 sm:%s4_s26]   ;;  %vm138_vm9 = vcmask 654912   ;;  %vm156_vm10 = vcmask 589312  }
  0x1a   :  { %v279_v10 = vsel %vm10_vm1, %v361_v9, %v275_v8  ;;  %v7_v14 = vsel %vm6_vm0, %v5_v13, %v3_v12  ;;  %vm174_vm11 = vcmask 523712   ;;  %vm192_vm12 = vcmask 458112  }
  0x1b   :  { %v11_v15 = vsel %vm10_vm1, %v316_v11, %v7_v14  ;;  %vm210_vm13 = vcmask 392512   ;;  %vm228_vm14 = vcmask 326912   ;;  %vm246_vm15 = vcmask 261312  }
  0x1c   :  { %13 = vst.msk [vmem:[#allocation0] ss:$8 sm:$0xf] %vm12_vm2, %v11_v15   ;;  %vm264_vm0 = vcmask 195712   ;;  %vm282_vm1 = vcmask 130112  }
  0x1d   :  { %15 = vst.msk [vmem:[#allocation0 + $0x1c] sm:$0x10] %vm12_vm2, %v11_v15  }
  0x1e   :  { %190 = vrot.lane.b32.xlu0 %v189_v50, %s389_s23  ;;  %208 = vrot.lane.b32.xlu1 %v207_v53, %s390_s30 }
  0x1f   :  { %172 = vrot.lane.b32.xlu2 %v171_v58, %s391_s10 }
  0x26   :  { %244 = vrot.lane.b32.xlu0 %v243_v1, %s392_s13  ;;  %262 = vrot.lane.b32.xlu1 %v261_v4, %s393_s16 }
  0x27   :  { %226 = vrot.lane.b32.xlu2 %v225_v5, %s394_s21 }
  0x2f   :  { %280 = vrot.lane.b32.xlu2 %v279_v10, %s395_s24 }
  0x69   :  { %v101_v16 = vpop.permute.xlu2 %100  }
  0x71   :  { %v119_v17 = vpop.permute.xlu2 %118  }
  0x78   :  { %v29_v18 = vpop.permute.xlu0 %28   ;;  %v65_v19 = vpop.permute.xlu1 %64  }
  0x79   :  { %31 = vst.msk [vmem:[#allocation0] ss:$8 sm:$0xf] %vm30_vm3, %v29_v18   ;;  %v173_v20 = vpop.permute.xlu2 %172  }
  0x7a   :  { %33 = vst.msk [vmem:[#allocation0 + $0x1c] sm:$0x10] %vm30_vm3, %v29_v18  }
  0x80   :  { %v47_v21 = vpop.permute.xlu0 %46   ;;  %v83_v22 = vpop.permute.xlu1 %82  }
  0x81   :  { %49 = vst.msk [vmem:[#allocation0] ss:$8 sm:$0xf] %vm48_vm4, %v47_v21   ;;  %v227_v23 = vpop.permute.xlu2 %226  }
  0x82   :  { %51 = vst.msk [vmem:[#allocation0 + $0x1c] sm:$0x10] %vm48_vm4, %v47_v21  }
  0x83   :  { %67 = vst.msk [vmem:[#allocation0] ss:$8 sm:$0xf] %vm66_vm5, %v65_v19  }
  0x84   :  { %69 = vst.msk [vmem:[#allocation0 + $0x1c] sm:$0x10] %vm66_vm5, %v65_v19  }
  0x85   :  { %85 = vst.msk [vmem:[#allocation0] ss:$8 sm:$0xf] %vm84_vm6, %v83_v22  }
  0x86   :  { %87 = vst.msk [vmem:[#allocation0 + $0x1c] sm:$0x10] %vm84_vm6, %v83_v22  }
  0x87   :  { %103 = vst.msk [vmem:[#allocation0] ss:$8 sm:$0xf] %vm102_vm7, %v101_v16  }
  0x88   :  { %105 = vst.msk [vmem:[#allocation0 + $0x1c] sm:$0x10] %vm102_vm7, %v101_v16   ;;  %v137_v24 = vpop.permute.xlu0 %136   ;;  %v155_v25 = vpop.permute.xlu1 %154  }
  0x89   :  { %121 = vst.msk [vmem:[#allocation0] ss:$8 sm:$0xf] %vm120_vm8, %v119_v17   ;;  %v281_v26 = vpop.permute.xlu2 %280  }
  0x8a   :  { %123 = vst.msk [vmem:[#allocation0 + $0x1c] sm:$0x10] %vm120_vm8, %v119_v17  }
  0x8b   :  { %139 = vst.msk [vmem:[#allocation0] ss:$8 sm:$0xf] %vm138_vm9, %v137_v24  }
  0x8c   :  { %141 = vst.msk [vmem:[#allocation0 + $0x1c] sm:$0x10] %vm138_vm9, %v137_v24  }
  0x8d   :  { %157 = vst.msk [vmem:[#allocation0] ss:$8 sm:$0xf] %vm156_vm10, %v155_v25  }
  0x8e   :  { %159 = vst.msk [vmem:[#allocation0 + $0x1c] sm:$0x10] %vm156_vm10, %v155_v25  }
  0x8f   :  { %175 = vst.msk [vmem:[#allocation0] ss:$8 sm:$0xf] %vm174_vm11, %v173_v20  }
  0x90   :  { %177 = vst.msk [vmem:[#allocation0 + $0x1c] sm:$0x10] %vm174_vm11, %v173_v20   ;;  %v191_v27 = vpop.permute.xlu0 %190   ;;  %v209_v28 = vpop.permute.xlu1 %208  }
  0x91   :  { %193 = vst.msk [vmem:[#allocation0] ss:$8 sm:$0xf] %vm192_vm12, %v191_v27  }
  0x92   :  { %195 = vst.msk [vmem:[#allocation0 + $0x1c] sm:$0x10] %vm192_vm12, %v191_v27  }
  0x93   :  { %211 = vst.msk [vmem:[#allocation0] ss:$8 sm:$0xf] %vm210_vm13, %v209_v28  }
  0x94   :  { %213 = vst.msk [vmem:[#allocation0 + $0x1c] sm:$0x10] %vm210_vm13, %v209_v28  }
  0x95   :  { %229 = vst.msk [vmem:[#allocation0] ss:$8 sm:$0xf] %vm228_vm14, %v227_v23  }
  0x96   :  { %231 = vst.msk [vmem:[#allocation0 + $0x1c] sm:$0x10] %vm228_vm14, %v227_v23  }
  0x98   :  { %v245_v29 = vpop.permute.xlu0 %244   ;;  %v263_v30 = vpop.permute.xlu1 %262  }
  0x99   :  { %247 = vst.msk [vmem:[#allocation0] ss:$8 sm:$0xf] %vm246_vm15, %v245_v29  }
  0x9a   :  { %249 = vst.msk [vmem:[#allocation0 + $0x1c] sm:$0x10] %vm246_vm15, %v245_v29  }
  0x9b   :  { %265 = vst.msk [vmem:[#allocation0] ss:$8 sm:$0xf] %vm264_vm0, %v263_v30  }
  0x9c   :  { %267 = vst.msk [vmem:[#allocation0 + $0x1c] sm:$0x10] %vm264_vm0, %v263_v30  }
  0x9d   :  { %283 = vst.msk [vmem:[#allocation0] ss:$8 sm:$0xf] %vm282_vm1, %v281_v26  }
  0x9e   :  { %285 = vst.msk [vmem:[#allocation0 + $0x1c] sm:$0x10] %vm282_vm1, %v281_v26  }
  0xa4   :  { %v288_v31 = vld [vmem:[#allocation0] sm:$0x1]  ;;  %v293_v32 = vld [vmem:[#allocation0 + $0x8] sm:$0x1]  ;;  %v299_v33 = vld [vmem:[#allocation0 + $0x10] sm:$0x1] }
  0xa5   :  { %291 = vst [vmem:[%s598_s1] sm:$0x1] %v288_v31  ;;  %v305_v34 = vld [vmem:[#allocation0 + $0x18] sm:$0x1]  ;;  %v311_v35 = vld [vmem:[#allocation0 + $0x20] sm:$0x1] }
  0xa6   :  { %362 = vst [vmem:[%s598_s1 + $0x1] sm:$0x1] %v293_v32 }
  0xa7   :  { %363 = vst [vmem:[%s598_s1 + $0x2] sm:$0x1] %v299_v33 }
  0xa8   :  { %364 = vst [vmem:[%s598_s1 + $0x3] sm:$0x1] %v305_v34 }
  0xa9   :  { %365 = vst [vmem:[%s598_s1 + $0x4] sm:$0x1] %v311_v35 }

// kernel: tile.41
= control target key start
LH: loop header
LB: loop body
LE: loop exit
PB: predicated region body
PF: predicated region fallthrough
CT: control target
= control target key end

     0   :  { %s28_s0 = inlined_call_operand.vmem [shape: f32[8], index: 0, kind: input, shape index: {}]   ;;  %s29_s1 = inlined_call_operand.vmem [shape: f32[16,8], index: 1, kind: output, shape index: {}]  }
   0x1   :  { %v4_v0 = vld [vmem:[%s28_s0] ss:$0 sm:$0xff] }
   0x2   :  { %5 = vst [vmem:[%s29_s1] sm:$0xff] %v4_v0 }
   0x3   :  { %8 = vst [vmem:[%s29_s1 + $0x8] sm:$0xff] %v4_v0 }

// kernel: tile.42
= control target key start
LH: loop header
LB: loop body
LE: loop exit
PB: predicated region body
PF: predicated region fallthrough
CT: control target
= control target key end

     0   :  { %s131_s10 = smov 120   ;;  %s132_s11 = smov 104   ;;  %vm3_vm0 = vcmask 64512   ;;  %vm9_vm1 = vcmask 1048512   ;;  %vm15_vm2 = vcmask 982912   ;;  %vm21_vm3 = vcmask 917312   ;;  %s207_s0 = inlined_call_operand.vmem [shape: f32[16,8], index: 0, kind: input, shape index: {}]   ;;  %s208_s1 = inlined_call_operand.vmem [shape: f32[1,128], index: 1, kind: output, shape index: {}]  }
   0x1   :  { %v101_v0 = vld [vmem:[%s207_s0 + $0xf] sm:$0x1]   ;;  %v103_v1 = vld [vmem:[%s207_s0 + $0xd] sm:$0x1]   ;;  %v105_v2 = vld [vmem:[%s207_s0 + $0xb] sm:$0x1]  }
   0x2   :  { %7 = vrot.lane.b32.xlu0 %v101_v0, %s131_s10  ;;  %19 = vrot.lane.b32.xlu1 %v103_v1, %s132_s11  ;;  %s133_s14 = smov 88   ;;  %v102_v3 = vld [vmem:[%s207_s0 + $0xe] sm:$0x1]   ;;  %v104_v4 = vld [vmem:[%s207_s0 + $0xc] sm:$0x1]   ;;  %s134_s19 = smov 112  }
   0x3   :  { %31 = vrot.lane.b32.xlu2 %v105_v2, %s133_s14  ;;  %s135_s20 = smov 96   ;;  %v106_v5 = vld [vmem:[%s207_s0 + $0xa] sm:$0x1]   ;;  %s136_s23 = smov 80   ;;  %v107_v6 = vld [vmem:[%s207_s0 + $0x9] sm:$0x1]  }
   0x4   :  { %v108_v7 = vld [vmem:[%s207_s0 + $0x8] sm:$0x1]   ;;  %s137_s28 = smov 72   ;;  %s138_s29 = smov 64   ;;  %v109_v8 = vld [vmem:[%s207_s0 + $0x7] sm:$0x1]  }
   0x5   :  { %s139_s3 = smov 56   ;;  %v110_v9 = vld [vmem:[%s207_s0 + $0x6] sm:$0x1]   ;;  %v111_v10 = vld [vmem:[%s207_s0 + $0x5] sm:$0x1]   ;;  %s140_s8 = smov 48  }
   0x6   :  { %s141_s9 = smov 40   ;;  %v112_v11 = vld [vmem:[%s207_s0 + $0x4] sm:$0x1]   ;;  %s142_s12 = smov 32   ;;  %v113_v12 = vld [vmem:[%s207_s0 + $0x3] sm:$0x1]  }
   0x7   :  { %v114_v13 = vld [vmem:[%s207_s0 + $0x2] sm:$0x1]   ;;  %s143_s17 = smov 24   ;;  %s144_s18 = smov 16   ;;  %v115_v14 = vld [vmem:[%s207_s0 + $0x1] sm:$0x1]  }
   0x8   :  { %s145_s21 = smov 8   ;;  %v2_v15 = vld [vmem:[%s207_s0] sm:$0x1]   ;;  %vm27_vm4 = vcmask 851712   ;;  %vm33_vm5 = vcmask 786112   ;;  %vm39_vm6 = vcmask 720512  }
   0x9   :  { %4 = vst.msk [vmem:[#allocation0] sm:$0x1] %vm3_vm0, %v2_v15   ;;  %vm45_vm7 = vcmask 654912   ;;  %vm51_vm8 = vcmask 589312   ;;  %vm57_vm9 = vcmask 523712   ;;  %vm63_vm10 = vcmask 458112  }
   0xa   :  { %13 = vrot.lane.b32.xlu0 %v102_v3, %s134_s19  ;;  %25 = vrot.lane.b32.xlu1 %v104_v4, %s135_s20  ;;  %vm69_vm11 = vcmask 392512   ;;  %vm75_vm12 = vcmask 326912   ;;  %vm81_vm13 = vcmask 261312   ;;  %vm87_vm14 = vcmask 195712  }
   0xb   :  { %37 = vrot.lane.b32.xlu2 %v106_v5, %s136_s23  ;;  %vm93_vm15 = vcmask 130112  }
  0x12   :  { %43 = vrot.lane.b32.xlu0 %v107_v6, %s137_s28  ;;  %49 = vrot.lane.b32.xlu1 %v108_v7, %s138_s29 }
  0x13   :  { %55 = vrot.lane.b32.xlu2 %v109_v8, %s139_s3 }
  0x1a   :  { %61 = vrot.lane.b32.xlu0 %v110_v9, %s140_s8  ;;  %67 = vrot.lane.b32.xlu1 %v111_v10, %s141_s9 }
  0x1b   :  { %73 = vrot.lane.b32.xlu2 %v112_v11, %s142_s12 }
  0x22   :  { %79 = vrot.lane.b32.xlu0 %v113_v12, %s143_s17  ;;  %85 = vrot.lane.b32.xlu1 %v114_v13, %s144_s18 }
  0x23   :  { %91 = vrot.lane.b32.xlu2 %v115_v14, %s145_s21 }
  0x5d   :  { %v32_v16 = vpop.permute.xlu2 %31  }
  0x65   :  { %v38_v17 = vpop.permute.xlu2 %37  }
  0x6d   :  { %v56_v18 = vpop.permute.xlu2 %55  }
  0x74   :  { %v8_v19 = vpop.permute.xlu0 %7   ;;  %v20_v20 = vpop.permute.xlu1 %19  }
  0x75   :  { %10 = vst.msk [vmem:[#allocation0] sm:$0x1] %vm9_vm1, %v8_v19   ;;  %v74_v21 = vpop.permute.xlu2 %73  }
  0x7c   :  { %v14_v22 = vpop.permute.xlu0 %13   ;;  %v26_v23 = vpop.permute.xlu1 %25  }
  0x7d   :  { %16 = vst.msk [vmem:[#allocation0] sm:$0x1] %vm15_vm2, %v14_v22   ;;  %v92_v24 = vpop.permute.xlu2 %91  }
  0x7e   :  { %22 = vst.msk [vmem:[#allocation0] sm:$0x1] %vm21_vm3, %v20_v20  }
  0x7f   :  { %28 = vst.msk [vmem:[#allocation0] sm:$0x1] %vm27_vm4, %v26_v23  }
  0x80   :  { %34 = vst.msk [vmem:[#allocation0] sm:$0x1] %vm33_vm5, %v32_v16  }
  0x81   :  { %40 = vst.msk [vmem:[#allocation0] sm:$0x1] %vm39_vm6, %v38_v17  }
  0x84   :  { %v44_v25 = vpop.permute.xlu0 %43   ;;  %v50_v26 = vpop.permute.xlu1 %49  }
  0x85   :  { %46 = vst.msk [vmem:[#allocation0] sm:$0x1] %vm45_vm7, %v44_v25  }
  0x86   :  { %52 = vst.msk [vmem:[#allocation0] sm:$0x1] %vm51_vm8, %v50_v26  }
  0x87   :  { %58 = vst.msk [vmem:[#allocation0] sm:$0x1] %vm57_vm9, %v56_v18  }
  0x8c   :  { %v62_v27 = vpop.permute.xlu0 %61   ;;  %v68_v28 = vpop.permute.xlu1 %67  }
  0x8d   :  { %64 = vst.msk [vmem:[#allocation0] sm:$0x1] %vm63_vm10, %v62_v27  }
  0x8e   :  { %70 = vst.msk [vmem:[#allocation0] sm:$0x1] %vm69_vm11, %v68_v28  }
  0x8f   :  { %76 = vst.msk [vmem:[#allocation0] sm:$0x1] %vm75_vm12, %v74_v21  }
  0x94   :  { %v80_v29 = vpop.permute.xlu0 %79   ;;  %v86_v30 = vpop.permute.xlu1 %85  }
  0x95   :  { %82 = vst.msk [vmem:[#allocation0] sm:$0x1] %vm81_vm13, %v80_v29  }
  0x96   :  { %88 = vst.msk [vmem:[#allocation0] sm:$0x1] %vm87_vm14, %v86_v30  }
  0x97   :  { %94 = vst.msk [vmem:[#allocation0] sm:$0x1] %vm93_vm15, %v92_v24  }
  0x9e   :  { %v97_v31 = vld [vmem:[#allocation0] sm:$0x1] }
  0x9f   :  { %100 = vst [vmem:[%s208_s1] sm:$0x1] %v97_v31 }

// kernel: tile.37
= control target key start
LH: loop header
LB: loop body
LE: loop exit
PB: predicated region body
PF: predicated region fallthrough
CT: control target
= control target key end

     0   :  { %vm6_vm0 = vcmask 1043458   ;;  %vm10_vm1 = vcmask 1045508   ;;  %s128_s6 = smov 3  ;;  %vm14_vm2 = vcmask 1047558   ;;  %s131_s9 = smov 12  ;;  %vm107_vm3 = vcmask 1044484   ;;  %s3155_s0 = inlined_call_operand.vmem [shape: f32[5,5,16,1,1,8], index: 0, kind: input, shape index: {}]   ;;  %s3156_s1 = inlined_call_operand.vmem [shape: f32[5,5,128], index: 1, kind: output, shape index: {}]  }
   0x1   :  { %v1392_v0 = vld [vmem:[%s3155_s0 + $0xbf] ss:$16 sm:%s128_s6]   ;;  %s136_s10 = smov 48  ;;  %s141_s15 = smov 192  ;;  %vm112_vm4 = vcmask 1046533   ;;  %vm116_vm5 = vcmask 1047559  }
   0x2   :  { %v1393_v1 = vld [vmem:[%s3155_s0 + $0xbf] ss:$16 sm:%s131_s9]   ;;  %s74_s16 = smov 3  ;;  %s77_s21 = smov 12  ;;  %v1407_v38 = vld [vmem:[%s3155_s0 + $0x18a] sm:$0x10]  }
   0x3   :  { %v1394_v2 = vld [vmem:[%s3155_s0 + $0xbf] ss:$16 sm:%s136_s10]   ;;  %v134_v3 = vsel %vm6_vm0, %v1393_v1, %v1392_v0  ;;  %s82_s22 = smov 48  ;;  %s87_s27 = smov 192  ;;  %v1419_v39 = vld [vmem:[%s3155_s0 + $0x13e] sm:$0x1]  }
   0x4   :  { %v1395_v4 = vld [vmem:[%s3155_s0 + $0xbf] ss:$16 sm:%s141_s15]   ;;  %v139_v6 = vsel %vm10_vm1, %v1394_v2, %v134_v3  ;;  %s98_s28 = smov 3  ;;  %s101_s4 = smov 12  ;;  %v1409_v47 = vld [vmem:[%s3155_s0 + $0xa7] sm:$0x80]  }
   0x5   :  { %v1379_v5 = vld [vmem:[%s3155_s0 + $0xf] ss:$16 sm:%s74_s16]   ;;  %v144_v9 = vsel %vm14_vm2, %v1395_v4, %v139_v6  ;;  %s110_s5 = smov 96  ;;  %s1709_s6 = smov 120   ;;  %v1428_v49 = vld [vmem:[%s3155_s0 + $0x189] sm:$0x10]  }
   0x6   :  { %v1380_v7 = vld [vmem:[%s3155_s0 + $0xf] ss:$16 sm:%s77_s21]   ;;  %145 = vrot.lane.b32.xlu1 %v144_v9, %s1709_s6  ;;  %s214_s13 = smov 3  ;;  %s217_s18 = smov 12  ;;  %v1430_v62 = vld [vmem:[%s3155_s0 + $0xa6] sm:$0x80]  }
   0x7   :  { %v1381_v8 = vld [vmem:[%s3155_s0 + $0xf] ss:$16 sm:%s82_s22]   ;;  %v80_v10 = vsel %vm6_vm0, %v1380_v7, %v1379_v5  ;;  %s160_s19 = smov 3  ;;  %v1413_v23 = vld [vmem:[%s3155_s0 + $0xbe] ss:$16 sm:%s214_s13]   ;;  %s163_s24 = smov 12 }
   0x8   :  { %v1382_v11 = vld [vmem:[%s3155_s0 + $0xf] ss:$16 sm:%s87_s27]   ;;  %v85_v13 = vsel %vm10_vm1, %v1381_v8, %v80_v10  ;;  %v1400_v24 = vld [vmem:[%s3155_s0 + $0xe] ss:$16 sm:%s160_s19]   ;;  %s168_s25 = smov 48  ;;  %s173_s30 = smov 192 }
   0x9   :  { %v1384_v12 = vld [vmem:[%s3155_s0 + $0x14f] ss:$16 sm:%s98_s28]   ;;  %v90_v16 = vsel %vm14_vm2, %v1382_v11, %v85_v13  ;;  %v1401_v25 = vld [vmem:[%s3155_s0 + $0xe] ss:$16 sm:%s163_s24]   ;;  %s300_s9 = smov 3  ;;  %s303_s10 = smov 12 }
   0xa   :  { %v1385_v14 = vld [vmem:[%s3155_s0 + $0x14f] ss:$16 sm:%s101_s4]   ;;  %91 = vrot.lane.b32.xlu0 %v90_v16, %s1709_s6  ;;  %s222_s4 = smov 48  ;;  %v166_v28 = vsel %vm6_vm0, %v1401_v25, %v1400_v24  ;;  %s270_s11 = smov 3  ;;  %v1449_v63 = vld [vmem:[%s3155_s0 + $0x188] sm:$0x10]  }
   0xb   :  { %v1386_v15 = vld [vmem:[%s3155_s0 + $0x18b] sm:$0x10]   ;;  %v104_v17 = vsel %vm6_vm0, %v1385_v14, %v1384_v12  ;;  %v1398_v20 = vld [vmem:[%s3155_s0 + $0x13f] sm:$0x1]   ;;  %v1402_v26 = vld [vmem:[%s3155_s0 + $0xe] ss:$16 sm:%s168_s25]  }
   0xc   :  { %v1387_v18 = vld [vmem:[%s3155_s0 + $0x3f] ss:$16 sm:%s110_s5]   ;;  %v108_v19 = vsel %vm107_vm3, %v1386_v15, %v104_v17  ;;  %v1414_v27 = vld [vmem:[%s3155_s0 + $0xbe] ss:$16 sm:%s217_s18]   ;;  %s227_s5 = smov 192  ;;  %v171_v31 = vsel %vm10_vm1, %v1402_v26, %v166_v28  ;;  %s273_s12 = smov 12 }
   0xd   :  { %v1388_v21 = vld [vmem:[%s3155_s0 + $0xa8] sm:$0x80]   ;;  %v113_v22 = vsel %vm112_vm4, %v1387_v18, %v108_v19  ;;  %v1403_v29 = vld [vmem:[%s3155_s0 + $0xe] ss:$16 sm:%s173_s30]   ;;  %v220_v33 = vsel %vm6_vm0, %v1414_v27, %v1413_v23  ;;  %s1710_s15 = smov 112   ;;  %s184_s16 = smov 3 }
   0xe   :  { %v117_v30 = vsel %vm116_vm5, %v1388_v21, %v113_v22  ;;  %154 = vrot.lane.b32.xlu1 %v1398_v20, %s1709_s6  ;;  %v176_v32 = vsel %vm14_vm2, %v1403_v29, %v171_v31  ;;  %v1415_v34 = vld [vmem:[%s3155_s0 + $0xbe] ss:$16 sm:%s222_s4]   ;;  %s187_s22 = smov 12  ;;  %s196_s25 = smov 96  ;;  %v1451_v18 = vld [vmem:[%s3155_s0 + $0xa5] sm:$0x80]  }
   0xf   :  { %177 = vrot.lane.b32.xlu2 %v176_v32, %s1710_s15  ;;  %v1416_v35 = vld [vmem:[%s3155_s0 + $0xbe] ss:$16 sm:%s227_s5]   ;;  %v225_v42 = vsel %vm10_vm1, %v1415_v34, %v220_v33  ;;  %s308_s3 = smov 48  ;;  %s282_s4 = smov 96  ;;  %v1440_v26 = vld [vmem:[%s3155_s0 + $0x13d] sm:$0x1]  }
  0x10   :  { %v1434_v36 = vld [vmem:[%s3155_s0 + $0xbd] ss:$16 sm:%s300_s9]   ;;  %v1405_v43 = vld [vmem:[%s3155_s0 + $0x14e] ss:$16 sm:%s184_s16]   ;;  %s356_s14 = smov 3  ;;  %s359_s17 = smov 12  ;;  %v230_v51 = vsel %vm14_vm2, %v1416_v35, %v225_v42 }
  0x11   :  { %v1435_v37 = vld [vmem:[%s3155_s0 + $0xbd] ss:$16 sm:%s303_s10]   ;;  %v1406_v44 = vld [vmem:[%s3155_s0 + $0x14e] ss:$16 sm:%s187_s22]   ;;  %s313_s20 = smov 192  ;;  %s249_s26 = smov 12 }
  0x12   :  { %118 = vrot.lane.b32.xlu0 %v117_v30, %s1709_s6  ;;  %v1426_v40 = vld [vmem:[%s3155_s0 + $0x14d] ss:$16 sm:%s270_s11]   ;;  %v190_v45 = vsel %vm6_vm0, %v1406_v44, %v1405_v43  ;;  %v306_v52 = vsel %vm6_vm0, %v1435_v37, %v1434_v36  ;;  %s254_s29 = smov 48  ;;  %s259_s30 = smov 192  ;;  %v1461_v44 = vld [vmem:[%s3155_s0 + $0x13c] sm:$0x1]  }
  0x13   :  { %v1427_v41 = vld [vmem:[%s3155_s0 + $0x14d] ss:$16 sm:%s273_s12]   ;;  %v1408_v46 = vld [vmem:[%s3155_s0 + $0x3e] ss:$16 sm:%s196_s25]   ;;  %v194_v50 = vsel %vm107_vm3, %v1407_v38, %v190_v45  ;;  %s246_s25 = smov 3  ;;  %s332_s8 = smov 3 }
  0x14   :  { %v276_v48 = vsel %vm6_vm0, %v1427_v41, %v1426_v40  ;;  %v1436_v53 = vld [vmem:[%s3155_s0 + $0xbd] ss:$16 sm:%s308_s3]   ;;  %v199_v55 = vsel %vm112_vm4, %v1408_v46, %v194_v50  ;;  %v1447_v57 = vld [vmem:[%s3155_s0 + $0x14c] ss:$16 sm:%s356_s14]   ;;  %s335_s9 = smov 12  ;;  %s368_s14 = smov 96 }
  0x15   :  { %v1429_v54 = vld [vmem:[%s3155_s0 + $0x3d] ss:$16 sm:%s282_s4]   ;;  %v203_v56 = vsel %vm116_vm5, %v1409_v47, %v199_v55  ;;  %v280_v58 = vsel %vm107_vm3, %v1428_v49, %v276_v48  ;;  %v1448_v59 = vld [vmem:[%s3155_s0 + $0x14c] ss:$16 sm:%s359_s17]   ;;  %v311_v60 = vsel %vm10_vm1, %v1436_v53, %v306_v52  ;;  %s340_s23 = smov 48  ;;  %s345_s27 = smov 192 }
  0x16   :  { %240 = vrot.lane.b32.xlu1 %v1419_v39, %s1710_s15  ;;  %v1437_v61 = vld [vmem:[%s3155_s0 + $0xbd] ss:$16 sm:%s313_s20]   ;;  %v285_v2 = vsel %vm112_vm4, %v1429_v54, %v280_v58  ;;  %v362_v3 = vsel %vm6_vm0, %v1448_v59, %v1447_v57  ;;  %s386_s4 = smov 3  ;;  %s389_s5 = smov 12  ;;  %v1470_v40 = vld [vmem:[%s3155_s0 + $0x187] sm:$0x10]  }
  0x17   :  { %204 = vrot.lane.b32.xlu2 %v203_v56, %s1710_s15  ;;  %v1421_v0 = vld [vmem:[%s3155_s0 + $0xd] ss:$16 sm:%s246_s25]   ;;  %v316_v7 = vsel %vm14_vm2, %v1437_v61, %v311_v60  ;;  %v289_v12 = vsel %vm116_vm5, %v1430_v62, %v285_v2  ;;  %v366_v13 = vsel %vm107_vm3, %v1449_v63, %v362_v3  ;;  %s426_s13 = smov 48  ;;  %s394_s19 = smov 48  ;;  %v1472_v54 = vld [vmem:[%s3155_s0 + $0xa4] sm:$0x80]  }
  0x18   :  { %v1422_v1 = vld [vmem:[%s3155_s0 + $0xd] ss:$16 sm:%s249_s26]   ;;  %v1442_v9 = vld [vmem:[%s3155_s0 + $0xc] ss:$16 sm:%s332_s8]   ;;  %s1711_s26 = smov 104   ;;  %s442_s22 = smov 3 }
  0x19   :  { %v252_v4 = vsel %vm6_vm0, %v1422_v1, %v1421_v0  ;;  %v1423_v5 = vld [vmem:[%s3155_s0 + $0xd] ss:$16 sm:%s254_s29]   ;;  %v1443_v10 = vld [vmem:[%s3155_s0 + $0xc] ss:$16 sm:%s335_s9]   ;;  %s445_s25 = smov 12  ;;  %s399_s2 = smov 192 }
  0x1a   :  { %231 = vrot.lane.b32.xlu0 %v230_v51, %s1710_s15  ;;  %v1424_v6 = vld [vmem:[%s3155_s0 + $0xd] ss:$16 sm:%s259_s30]   ;;  %v257_v8 = vsel %vm10_vm1, %v1423_v5, %v252_v4  ;;  %v338_v15 = vsel %vm6_vm0, %v1443_v10, %v1442_v9  ;;  %s418_s30 = smov 3  ;;  %s421_s15 = smov 12  ;;  %v1482_v51 = vld [vmem:[%s3155_s0 + $0x13b] sm:$0x1]  }
  0x1b   :  { %v262_v11 = vsel %vm14_vm2, %v1424_v6, %v257_v8  ;;  %v1450_v14 = vld [vmem:[%s3155_s0 + $0x3c] ss:$16 sm:%s368_s14]   ;;  %v1463_v21 = vld [vmem:[%s3155_s0 + $0xb] ss:$16 sm:%s418_s30]   ;;  %s431_s14 = smov 192  ;;  %s472_s7 = smov 3 }
  0x1c   :  { %v1444_v16 = vld [vmem:[%s3155_s0 + $0xc] ss:$16 sm:%s340_s23]   ;;  %v371_v17 = vsel %vm112_vm4, %v1450_v14, %v366_v13  ;;  %v1464_v22 = vld [vmem:[%s3155_s0 + $0xb] ss:$16 sm:%s421_s15]   ;;  %s475_s8 = smov 12  ;;  %s480_s18 = smov 48 }
  0x1d   :  { %v1445_v19 = vld [vmem:[%s3155_s0 + $0xc] ss:$16 sm:%s345_s27]   ;;  %v343_v20 = vsel %vm10_vm1, %v1444_v16, %v338_v15  ;;  %v375_v23 = vsel %vm116_vm5, %v1451_v18, %v371_v17  ;;  %v424_v28 = vsel %vm6_vm0, %v1464_v22, %v1463_v21  ;;  %v1465_v29 = vld [vmem:[%s3155_s0 + $0xb] ss:$16 sm:%s426_s13]   ;;  %s1712_s27 = smov 96   ;;  %s454_s13 = smov 96 }
  0x1e   :  { %317 = vrot.lane.b32.xlu1 %v316_v7, %s1711_s26  ;;  %v1455_v24 = vld [vmem:[%s3155_s0 + $0xbc] ss:$16 sm:%s386_s4]   ;;  %v348_v27 = vsel %vm14_vm2, %v1445_v19, %v343_v20  ;;  %v429_v34 = vsel %vm10_vm1, %v1465_v29, %v424_v28  ;;  %s485_s21 = smov 192  ;;  %s1713_s23 = smov 88   ;;  %v1491_v62 = vld [vmem:[%s3155_s0 + $0x186] sm:$0x10]  }
  0x1f   :  { %263 = vrot.lane.b32.xlu2 %v262_v11, %s1711_s26  ;;  %v1456_v25 = vld [vmem:[%s3155_s0 + $0xbc] ss:$16 sm:%s389_s5]   ;;  %s531_s24 = smov 12  ;;  %s558_s15 = smov 3  ;;  %v1493_v13 = vld [vmem:[%s3155_s0 + $0xa3] sm:$0x80]  }
  0x20   :  { %v1466_v30 = vld [vmem:[%s3155_s0 + $0xb] ss:$16 sm:%s431_s14]   ;;  %v392_v31 = vsel %vm6_vm0, %v1456_v25, %v1455_v24  ;;  %v1457_v32 = vld [vmem:[%s3155_s0 + $0xbc] ss:$16 sm:%s394_s19]   ;;  %s504_s5 = smov 3  ;;  %s566_s10 = smov 48 }
  0x21   :  { %v1468_v33 = vld [vmem:[%s3155_s0 + $0x14b] ss:$16 sm:%s442_s22]   ;;  %v397_v36 = vsel %vm10_vm1, %v1457_v32, %v392_v31  ;;  %v1458_v37 = vld [vmem:[%s3155_s0 + $0xbc] ss:$16 sm:%s399_s2]   ;;  %v434_v38 = vsel %vm14_vm2, %v1466_v30, %v429_v34  ;;  %s528_s22 = smov 3  ;;  %s561_s2 = smov 12 }
  0x22   :  { %290 = vrot.lane.b32.xlu0 %v289_v12, %s1711_s26  ;;  %v1469_v35 = vld [vmem:[%s3155_s0 + $0x14b] ss:$16 sm:%s445_s25]   ;;  %v402_v43 = vsel %vm14_vm2, %v1458_v37, %v397_v36  ;;  %s540_s19 = smov 96  ;;  %s614_s20 = smov 3  ;;  %v1512_v15 = vld [vmem:[%s3155_s0 + $0x185] sm:$0x10]  }
  0x23   :  { %v448_v39 = vsel %vm6_vm0, %v1469_v35, %v1468_v33  ;;  %v1476_v41 = vld [vmem:[%s3155_s0 + $0xbb] ss:$16 sm:%s472_s7]   ;;  %v1489_v50 = vld [vmem:[%s3155_s0 + $0x14a] ss:$16 sm:%s528_s22]   ;;  %s507_s7 = smov 12  ;;  %s512_s28 = smov 48 }
  0x24   :  { %v1477_v42 = vld [vmem:[%s3155_s0 + $0xbb] ss:$16 sm:%s475_s8]   ;;  %v452_v45 = vsel %vm107_vm3, %v1470_v40, %v448_v39  ;;  %v1490_v52 = vld [vmem:[%s3155_s0 + $0x14a] ss:$16 sm:%s531_s24]   ;;  %s590_s14 = smov 3  ;;  %s593_s16 = smov 12 }
  0x25   :  { %v1471_v46 = vld [vmem:[%s3155_s0 + $0x3b] ss:$16 sm:%s454_s13]   ;;  %v478_v47 = vsel %vm6_vm0, %v1477_v42, %v1476_v41  ;;  %v1497_v56 = vld [vmem:[%s3155_s0 + $0xba] ss:$16 sm:%s558_s15]   ;;  %v534_v61 = vsel %vm6_vm0, %v1490_v52, %v1489_v50  ;;  %s626_s22 = smov 96  ;;  %s598_s30 = smov 48 }
  0x26   :  { %376 = vrot.lane.b32.xlu1 %v375_v23, %s1712_s27  ;;  %v1478_v48 = vld [vmem:[%s3155_s0 + $0xbb] ss:$16 sm:%s480_s18]   ;;  %v457_v53 = vsel %vm112_vm4, %v1471_v46, %v452_v45  ;;  %v538_v6 = vsel %vm107_vm3, %v1491_v62, %v534_v61  ;;  %s647_s11 = smov 12  ;;  %s684_s17 = smov 48  ;;  %v1503_v34 = vld [vmem:[%s3155_s0 + $0x13a] sm:$0x1]  }
  0x27   :  { %326 = vrot.lane.b32.xlu2 %v1440_v26, %s1711_s26  ;;  %v1479_v49 = vld [vmem:[%s3155_s0 + $0xbb] ss:$16 sm:%s485_s21]   ;;  %v483_v55 = vsel %vm10_vm1, %v1478_v48, %v478_v47  ;;  %v461_v63 = vsel %vm116_vm5, %v1472_v54, %v457_v53  ;;  %s571_s26 = smov 192  ;;  %v1514_v26 = vld [vmem:[%s3155_s0 + $0xa2] sm:$0x80]   ;;  %s689_s18 = smov 192 }
  0x28   :  { %v1498_v57 = vld [vmem:[%s3155_s0 + $0xba] ss:$16 sm:%s561_s2]   ;;  %v488_v0 = vsel %vm14_vm2, %v1479_v49, %v483_v55  ;;  %v1510_v3 = vld [vmem:[%s3155_s0 + $0x149] ss:$16 sm:%s614_s20]   ;;  %s652_s24 = smov 48  ;;  %s700_s29 = smov 3 }
  0x29   :  { %v1484_v58 = vld [vmem:[%s3155_s0 + $0xa] ss:$16 sm:%s504_s5]   ;;  %v564_v1 = vsel %vm6_vm0, %v1498_v57, %v1497_v56  ;;  %v1505_v17 = vld [vmem:[%s3155_s0 + $0x9] ss:$16 sm:%s590_s14]   ;;  %s676_s5 = smov 3  ;;  %s703_s2 = smov 12 }
  0x2a   :  { %349 = vrot.lane.b32.xlu0 %v348_v27, %s1712_s27  ;;  %v1485_v59 = vld [vmem:[%s3155_s0 + $0xa] ss:$16 sm:%s507_s7]   ;;  %s679_s7 = smov 12  ;;  %s657_s8 = smov 192  ;;  %v1533_v48 = vld [vmem:[%s3155_s0 + $0x184] sm:$0x10]  }
  0x2b   :  { %v1499_v60 = vld [vmem:[%s3155_s0 + $0xba] ss:$16 sm:%s566_s10]   ;;  %v510_v4 = vsel %vm6_vm0, %v1485_v59, %v1484_v58  ;;  %s517_s10 = smov 192  ;;  %v1506_v18 = vld [vmem:[%s3155_s0 + $0x9] ss:$16 sm:%s593_s16]   ;;  %s730_s12 = smov 3 }
  0x2c   :  { %v1492_v2 = vld [vmem:[%s3155_s0 + $0x3a] ss:$16 sm:%s540_s19]   ;;  %v569_v8 = vsel %vm10_vm1, %v1499_v60, %v564_v1  ;;  %v1513_v22 = vld [vmem:[%s3155_s0 + $0x39] ss:$16 sm:%s626_s22]   ;;  %v596_v23 = vsel %vm6_vm0, %v1506_v18, %v1505_v17  ;;  %s738_s22 = smov 48  ;;  %s1716_s15 = smov 64  }
  0x2d   :  { %v1486_v5 = vld [vmem:[%s3155_s0 + $0xa] ss:$16 sm:%s512_s28]   ;;  %v543_v12 = vsel %vm112_vm4, %v1492_v2, %v538_v6  ;;  %v1507_v24 = vld [vmem:[%s3155_s0 + $0x9] ss:$16 sm:%s598_s30]   ;;  %s786_s30 = smov 3  ;;  %s789_s3 = smov 12 }
  0x2e   :  { %435 = vrot.lane.b32.xlu1 %v434_v38, %s1713_s23  ;;  %v1500_v9 = vld [vmem:[%s3155_s0 + $0xba] ss:$16 sm:%s571_s26]   ;;  %v515_v10 = vsel %vm10_vm1, %v1486_v5, %v510_v4  ;;  %v547_v20 = vsel %vm116_vm5, %v1493_v13, %v543_v12  ;;  %s603_s26 = smov 192  ;;  %v601_v28 = vsel %vm10_vm1, %v1507_v24, %v596_v23  ;;  %v1524_v52 = vld [vmem:[%s3155_s0 + $0x139] sm:$0x1]   ;;  %s2165_s9 = smov 192 }
  0x2f   :  { %403 = vrot.lane.b32.xlu2 %v402_v43, %s1712_s27  ;;  %v1487_v11 = vld [vmem:[%s3155_s0 + $0xa] ss:$16 sm:%s517_s10]   ;;  %v574_v16 = vsel %vm14_vm2, %v1500_v9, %v569_v8  ;;  %s644_s10 = smov 3  ;;  %s765_s13 = smov 12  ;;  %v1545_v59 = vld [vmem:[%s3155_s0 + $0x138] sm:$0x1]  }
  0x30   :  { %v520_v19 = vsel %vm14_vm2, %v1487_v11, %v515_v10  ;;  %v1508_v27 = vld [vmem:[%s3155_s0 + $0x9] ss:$16 sm:%s603_s26]   ;;  %v1526_v29 = vld [vmem:[%s3155_s0 + $0x8] ss:$16 sm:%s676_s5]   ;;  %s1715_s26 = smov 72   ;;  %s872_s21 = smov 3 }
  0x31   :  { %v1527_v30 = vld [vmem:[%s3155_s0 + $0x8] ss:$16 sm:%s679_s7]   ;;  %v1518_v32 = vld [vmem:[%s3155_s0 + $0xb9] ss:$16 sm:%s644_s10]   ;;  %v606_v35 = vsel %vm14_vm2, %v1508_v27, %v601_v28  ;;  %s2220_s19 = smov 12  ;;  %s24_s20 = smov 12 }
  0x32   :  { %412 = vrot.lane.b32.xlu0 %v1461_v44, %s1712_s27  ;;  %s617_s27 = smov 12  ;;  %v1519_v33 = vld [vmem:[%s3155_s0 + $0xb9] ss:$16 sm:%s647_s11]   ;;  %v682_v36 = vsel %vm6_vm0, %v1527_v30, %v1526_v29  ;;  %v1535_v62 = vld [vmem:[%s3155_s0 + $0xa1] sm:$0x80]   ;;  %s29_s25 = smov 48 }
  0x33   :  { %v1511_v7 = vld [vmem:[%s3155_s0 + $0x149] ss:$16 sm:%s617_s27]   ;;  %s1714_s27 = smov 80   ;;  %v1528_v37 = vld [vmem:[%s3155_s0 + $0x8] ss:$16 sm:%s684_s17]   ;;  %v650_v39 = vsel %vm6_vm0, %v1519_v33, %v1518_v32  ;;  %s712_s17 = smov 96 }
  0x34   :  { %v620_v14 = vsel %vm6_vm0, %v1511_v7, %v1510_v3  ;;  %v1529_v38 = vld [vmem:[%s3155_s0 + $0x8] ss:$16 sm:%s689_s18]   ;;  %v1520_v40 = vld [vmem:[%s3155_s0 + $0xb9] ss:$16 sm:%s652_s24]   ;;  %v687_v42 = vsel %vm10_vm1, %v1528_v37, %v682_v36  ;;  %s743_s24 = smov 192  ;;  %s798_s18 = smov 96 }
  0x35   :  { %v624_v21 = vsel %vm107_vm3, %v1512_v15, %v620_v14  ;;  %v1531_v41 = vld [vmem:[%s3155_s0 + $0x148] ss:$16 sm:%s700_s29]   ;;  %v655_v44 = vsel %vm10_vm1, %v1520_v40, %v650_v39  ;;  %v1521_v45 = vld [vmem:[%s3155_s0 + $0xb9] ss:$16 sm:%s657_s8]   ;;  %v692_v46 = vsel %vm14_vm2, %v1529_v38, %v687_v42  ;;  %s816_s29 = smov 3  ;;  %s770_s8 = smov 48 }
  0x36   :  { %498 = vrot.lane.b32.xlu1 %v1482_v51, %s1713_s23  ;;  %v629_v25 = vsel %vm112_vm4, %v1513_v22, %v624_v21  ;;  %v1532_v43 = vld [vmem:[%s3155_s0 + $0x148] ss:$16 sm:%s703_s2]   ;;  %v660_v51 = vsel %vm14_vm2, %v1521_v45, %v655_v44  ;;  %s819_s2 = smov 12  ;;  %v1554_v6 = vld [vmem:[%s3155_s0 + $0x183] sm:$0x10]   ;;  %s34_s28 = smov 192 }
  0x37   :  { %462 = vrot.lane.b32.xlu2 %v461_v63, %s1713_s23  ;;  %v633_v31 = vsel %vm116_vm5, %v1514_v26, %v629_v25  ;;  %v706_v47 = vsel %vm6_vm0, %v1532_v43, %v1531_v41  ;;  %v1539_v49 = vld [vmem:[%s3155_s0 + $0xb8] ss:$16 sm:%s730_s12]   ;;  %s775_s12 = smov 192  ;;  %s46_s4 = smov 3  ;;  %v1575_v21 = vld [vmem:[%s3155_s0 + $0x182] sm:$0x10]  }
  0x38   :  { %v710_v53 = vsel %vm107_vm3, %v1533_v48, %v706_v47  ;;  %v1534_v54 = vld [vmem:[%s3155_s0 + $0x38] ss:$16 sm:%s712_s17]   ;;  %v1552_v58 = vld [vmem:[%s3155_s0 + $0x147] ss:$16 sm:%s786_s30]   ;;  %s2191_s30 = smov 96  ;;  %s49_s5 = smov 12 }
  0x39   :  { %v1541_v56 = vld [vmem:[%s3155_s0 + $0xb8] ss:$16 sm:%s738_s22]   ;;  %v1553_v60 = vld [vmem:[%s3155_s0 + $0x147] ss:$16 sm:%s789_s3]   ;;  %v715_v61 = vsel %vm112_vm4, %v1534_v54, %v710_v53  ;;  %s54_s11 = smov 48  ;;  %vm16_vm6 = vcmask 64512  }
  0x3a   :  { %489 = vrot.lane.b32.xlu0 %v488_v0, %s1713_s23  ;;  %s733_s23 = smov 12  ;;  %v1542_v57 = vld [vmem:[%s3155_s0 + $0xb8] ss:$16 sm:%s743_s24]   ;;  %v792_v5 = vsel %vm6_vm0, %v1553_v60, %v1552_v58  ;;  %v719_v7 = vsel %vm116_vm5, %v1535_v62, %v715_v61  ;;  %s861_s14 = smov 192  ;;  %v1577_v48 = vld [vmem:[%s3155_s0 + $0x9f] sm:$0x80]  }
  0x3b   :  { %v1540_v50 = vld [vmem:[%s3155_s0 + $0xb8] ss:$16 sm:%s733_s23]   ;;  %s762_s23 = smov 3  ;;  %v1560_v0 = vld [vmem:[%s3155_s0 + $0xb7] ss:$16 sm:%s816_s29]   ;;  %s875_s29 = smov 12 }
  0x3c   :  { %v736_v55 = vsel %vm6_vm0, %v1540_v50, %v1539_v49  ;;  %v1561_v1 = vld [vmem:[%s3155_s0 + $0xb7] ss:$16 sm:%s819_s2]   ;;  %s2193_s2 = smov 3  ;;  %v1573_v11 = vld [vmem:[%s3155_s0 + $0x146] ss:$16 sm:%s872_s21]   ;;  %s934_s22 = smov 3 }
  0x3d   :  { %v741_v63 = vsel %vm10_vm1, %v1541_v56, %v736_v55  ;;  %v1547_v2 = vld [vmem:[%s3155_s0 + $0x7] ss:$16 sm:%s762_s23]   ;;  %s21_s23 = smov 3  ;;  %v822_v9 = vsel %vm6_vm0, %v1561_v1, %v1560_v0  ;;  %v1574_v12 = vld [vmem:[%s3155_s0 + $0x146] ss:$16 sm:%s875_s29]   ;;  %s4_s29 = smov 12 }
  0x3e   :  { %575 = vrot.lane.b32.xlu1 %v574_v16, %s1714_s27  ;;  %v1548_v3 = vld [vmem:[%s3155_s0 + $0x7] ss:$16 sm:%s765_s13]   ;;  %v746_v8 = vsel %vm14_vm2, %v1542_v57, %v741_v63  ;;  %v796_v16 = vsel %vm107_vm3, %v1554_v6, %v792_v5  ;;  %v878_v28 = vsel %vm6_vm0, %v1574_v12, %v1573_v11  ;;  %s905_s10 = smov 12  ;;  %s942_s16 = smov 48  ;;  %v1377_v5 = vld [vmem:[%s3155_s0 + $0x180] sm:$0x1]  }
  0x3f   :  { %521 = vrot.lane.b32.xlu2 %v520_v19, %s1714_s27  ;;  %v1555_v10 = vld [vmem:[%s3155_s0 + $0x37] ss:$16 sm:%s798_s18]   ;;  %v768_v14 = vsel %vm6_vm0, %v1548_v3, %v1547_v2  ;;  %s2_s18 = smov 3  ;;  %v882_v44 = vsel %vm107_vm3, %v1575_v21, %v878_v28  ;;  %s958_s3 = smov 3  ;;  %1378 = vst.msk [vmem:[%s3156_s1 + $0x24] sm:$0x1] %vm16_vm6, %v1377_v5  }
  0x40   :  { %v1563_v13 = vld [vmem:[%s3155_s0 + $0xb7] ss:$16 sm:%s2165_s9]   ;;  %v1364_v18 = vld [vmem:[%s3155_s0 + $0x80] ss:$16 sm:%s21_s23]   ;;  %v801_v27 = vsel %vm112_vm4, %v1555_v10, %v796_v16  ;;  %s947_s9 = smov 192  ;;  %s915_s7 = smov 192 }
  0x41   :  { %v1549_v15 = vld [vmem:[%s3155_s0 + $0x7] ss:$16 sm:%s770_s8]   ;;  %v1365_v22 = vld [vmem:[%s3155_s0 + $0x80] ss:$16 sm:%s24_s20]   ;;  %s1717_s20 = smov 56   ;;  %s988_s13 = smov 3 }
  0x42   :  { %548 = vrot.lane.b32.xlu0 %v547_v20, %s1714_s27  ;;  %v1550_v17 = vld [vmem:[%s3155_s0 + $0x7] ss:$16 sm:%s775_s12]   ;;  %s59_s12 = smov 192  ;;  %v773_v23 = vsel %vm10_vm1, %v1549_v15, %v768_v14  ;;  %v27_v24 = vsel %vm6_vm0, %v1365_v22, %v1364_v18  ;;  %v1596_v15 = vld [vmem:[%s3155_s0 + $0x181] sm:$0x10]   ;;  %s1074_s8 = smov 3 }
  0x43   :  { %v1556_v20 = vld [vmem:[%s3155_s0 + $0xa0] sm:$0x80]   ;;  %v1366_v25 = vld [vmem:[%s3155_s0 + $0x80] ss:$16 sm:%s29_s25]   ;;  %v778_v40 = vsel %vm14_vm2, %v1550_v17, %v773_v23  ;;  %v1566_v63 = vld [vmem:[%s3155_s0 + $0x137] sm:$0x1]  }
  0x44   :  { %v1367_v26 = vld [vmem:[%s3155_s0 + $0x80] ss:$16 sm:%s34_s28]   ;;  %v1568_v29 = vld [vmem:[%s3155_s0 + $0x6] ss:$16 sm:%s2193_s2]   ;;  %v805_v43 = vsel %vm116_vm5, %v1556_v20, %v801_v27  ;;  %s937_s28 = smov 12  ;;  %s1023_s6 = smov 12 }
  0x45   :  { %v1569_v30 = vld [vmem:[%s3155_s0 + $0x6] ss:$16 sm:%s2220_s19]   ;;  %s856_s19 = smov 48  ;;  %v1371_v32 = vld [vmem:[%s3155_s0 + $0x100] ss:$16 sm:%s46_s4]   ;;  %s1718_s4 = smov 48  }
  0x46   :  { %634 = vrot.lane.b32.xlu1 %v633_v31, %s1715_s26  ;;  %v32_v31 = vsel %vm10_vm1, %v1366_v25, %v27_v24  ;;  %v1372_v33 = vld [vmem:[%s3155_s0 + $0x100] ss:$16 sm:%s49_s5]   ;;  %s1044_s5 = smov 3  ;;  %vm93_vm7 = vcmask 1048512   ;;  %vm179_vm8 = vcmask 982912   ;;  %vm265_vm9 = vcmask 917312  }
  0x47   :  { %584 = vrot.lane.b32.xlu2 %v1503_v34, %s1714_s27  ;;  %s824_s27 = smov 48  ;;  %v37_v36 = vsel %vm14_vm2, %v1367_v26, %v32_v31  ;;  %v52_v37 = vsel %vm6_vm0, %v1372_v33, %v1371_v32  ;;  %v1373_v38 = vld [vmem:[%s3155_s0 + $0x100] ss:$16 sm:%s54_s11]   ;;  %s1077_s11 = smov 12  ;;  %v1608_v26 = vld [vmem:[%s3155_s0 + $0x135] sm:$0x1]  }
  0x48   :  { %v1562_v4 = vld [vmem:[%s3155_s0 + $0xb7] ss:$16 sm:%s824_s27]   ;;  %v1374_v39 = vld [vmem:[%s3155_s0 + $0x100] ss:$16 sm:%s59_s12]   ;;  %v57_v41 = vsel %vm10_vm1, %v1373_v38, %v52_v37  ;;  %s12_s27 = smov 192  ;;  %s1082_s12 = smov 48 }
  0x49   :  { %v827_v19 = vsel %vm10_vm1, %v1562_v4, %v822_v9  ;;  %1369 = vst.msk [vmem:[%s3156_s1 + $0xe] sm:$0x7c] %vm16_vm6, %v37_v36   ;;  %v3_v42 = vld [vmem:[%s3155_s0] ss:$16 sm:%s2_s18]   ;;  %v1617_v38 = vld [vmem:[%s3155_s0 + $0x180] sm:$0x10]  }
  0x4a   :  { %607 = vrot.lane.b32.xlu0 %v606_v35, %s1715_s26  ;;  %v832_v34 = vsel %vm14_vm2, %v1563_v13, %v827_v19  ;;  %v1576_v35 = vld [vmem:[%s3155_s0 + $0x36] ss:$16 sm:%s2191_s30]   ;;  %1370 = vst.msk [vmem:[%s3156_s1 + $0x11] sm:$0x80] %vm16_vm6, %v37_v36   ;;  %s1001_s30 = smov 192  ;;  %s1033_s18 = smov 192 }
  0x4b   :  { %v1570_v45 = vld [vmem:[%s3155_s0 + $0x6] ss:$16 sm:%s856_s19]   ;;  %v5_v47 = vld [vmem:[%s3155_s0] ss:$16 sm:%s4_s29]   ;;  %v887_v54 = vsel %vm112_vm4, %v1576_v35, %v882_v44  ;;  %s910_s19 = smov 48  ;;  %s1056_s29 = smov 96 }
  0x4c   :  { %v7_v49 = vsel %vm6_vm0, %v5_v47, %v3_v42  ;;  %1368 = vst.msk [vmem:[%s3156_s1 + $0xb] sm:$0x3] %vm16_vm6, %v37_v36   ;;  %v13_v53 = vld [vmem:[%s3155_s0] ss:$16 sm:%s12_s27]   ;;  %v891_v60 = vsel %vm116_vm5, %v1577_v48, %v887_v54  ;;  %v1587_v19 = vld [vmem:[%s3155_s0 + $0x136] sm:$0x1]  }
  0x4d   :  { %v1571_v55 = vld [vmem:[%s3155_s0 + $0x6] ss:$16 sm:%s861_s14]   ;;  %v1589_v57 = vld [vmem:[%s3155_s0 + $0x5] ss:$16 sm:%s934_s22]   ;;  %s991_s14 = smov 12  ;;  %s970_s22 = smov 96 }
  0x4e   :  { %693 = vrot.lane.b32.xlu1 %v692_v46, %s1716_s15  ;;  %v62_v46 = vsel %vm14_vm2, %v1374_v39, %v57_v41  ;;  %v1582_v62 = vld [vmem:[%s3155_s0 + $0xb6] ss:$16 sm:%s905_s10]   ;;  %s1119_s2 = smov 192  ;;  %s1192_s25 = smov 3  ;;  %vm351_vm10 = vcmask 851712   ;;  %vm437_vm11 = vcmask 786112  }
  0x4f   :  { %661 = vrot.lane.b32.xlu2 %v660_v51, %s1715_s26  ;;  %1375 = vst.msk [vmem:[%s3156_s1 + $0x19] sm:$0xf] %vm16_vm6, %v62_v46   ;;  %v854_v51 = vsel %vm6_vm0, %v1569_v30, %v1568_v29  ;;  %v1591_v2 = vld [vmem:[%s3155_s0 + $0x5] ss:$16 sm:%s942_s16]   ;;  %s1020_s16 = smov 3  ;;  %s1246_s21 = smov 3 }
  0x50   :  { %1376 = vst.msk [vmem:[%s3156_s1 + $0x1c] sm:$0xf0] %vm16_vm6, %v62_v46   ;;  %v859_v58 = vsel %vm10_vm1, %v1570_v45, %v854_v51  ;;  %v1583_v4 = vld [vmem:[%s3155_s0 + $0xb6] ss:$16 sm:%s910_s19]   ;;  %v1598_v30 = vld [vmem:[%s3155_s0 + $0x9e] sm:$0x80]  }
  0x51   :  { %v864_v0 = vsel %vm14_vm2, %v1571_v55, %v859_v58  ;;  %v1592_v6 = vld [vmem:[%s3155_s0 + $0x5] ss:$16 sm:%s947_s9]   ;;  %v1584_v11 = vld [vmem:[%s3155_s0 + $0xb6] ss:$16 sm:%s915_s7]   ;;  %s1719_s7 = smov 40   ;;  %s1142_s19 = smov 96 }
  0x52   :  { %670 = vrot.lane.b32.xlu0 %v1524_v52, %s1715_s26  ;;  %s902_s26 = smov 3  ;;  %v1602_v16 = vld [vmem:[%s3155_s0 + $0xb5] ss:$16 sm:%s988_s13]   ;;  %s1106_s9 = smov 3  ;;  %v1638_v58 = vld [vmem:[%s3155_s0 + $0x17f] sm:$0x10]  }
  0x53   :  { %v1581_v61 = vld [vmem:[%s3155_s0 + $0xb6] ss:$16 sm:%s902_s26]   ;;  %s961_s26 = smov 12  ;;  %v1603_v17 = vld [vmem:[%s3155_s0 + $0xb5] ss:$16 sm:%s991_s14]   ;;  %s1173_s13 = smov 192 }
  0x54   :  { %v908_v3 = vsel %vm6_vm0, %v1582_v62, %v1581_v61  ;;  %v1595_v12 = vld [vmem:[%s3155_s0 + $0x145] ss:$16 sm:%s961_s26]   ;;  %v994_v22 = vsel %vm6_vm0, %v1603_v17, %v1602_v16  ;;  %v1615_v25 = vld [vmem:[%s3155_s0 + $0x144] ss:$16 sm:%s1044_s5]   ;;  %s1028_s26 = smov 48  ;;  %s1195_s5 = smov 12 }
  0x55   :  { %v913_v10 = vsel %vm10_vm1, %v1583_v4, %v908_v3  ;;  %v1597_v21 = vld [vmem:[%s3155_s0 + $0x35] ss:$16 sm:%s970_s22]   ;;  %v1623_v32 = vld [vmem:[%s3155_s0 + $0xb4] ss:$16 sm:%s1074_s8]   ;;  %s1160_s8 = smov 3  ;;  %s1249_s24 = smov 12 }
  0x56   :  { %756 = vrot.lane.b32.xlu1 %v1545_v59, %s1716_s15  ;;  %v1590_v59 = vld [vmem:[%s3155_s0 + $0x5] ss:$16 sm:%s937_s28]   ;;  %s996_s28 = smov 48  ;;  %v918_v18 = vsel %vm14_vm2, %v1584_v11, %v913_v10  ;;  %v1629_v16 = vld [vmem:[%s3155_s0 + $0x134] sm:$0x1]   ;;  %s1259_s14 = smov 192 }
  0x57   :  { %720 = vrot.lane.b32.xlu2 %v719_v7, %s1716_s15  ;;  %v940_v1 = vsel %vm6_vm0, %v1590_v59, %v1589_v57  ;;  %v1604_v23 = vld [vmem:[%s3155_s0 + $0xb5] ss:$16 sm:%s996_s28]   ;;  %s1109_s28 = smov 12  ;;  %s1335_s17 = smov 12  ;;  %vm523_vm12 = vcmask 720512   ;;  %vm609_vm13 = vcmask 654912  }
  0x58   :  { %v945_v7 = vsel %vm10_vm1, %v1591_v2, %v940_v1  ;;  %v1605_v24 = vld [vmem:[%s3155_s0 + $0xb5] ss:$16 sm:%s1001_s30]   ;;  %v999_v31 = vsel %vm10_vm1, %v1604_v23, %v994_v22  ;;  %v1624_v33 = vld [vmem:[%s3155_s0 + $0xb4] ss:$16 sm:%s1077_s11]   ;;  %s1254_s30 = smov 48  ;;  %s1281_s10 = smov 12 }
  0x59   :  { %v950_v13 = vsel %vm14_vm2, %v1592_v6, %v945_v7  ;;  %v1611_v35 = vld [vmem:[%s3155_s0 + $0x4] ss:$16 sm:%s1023_s6]   ;;  %v1080_v41 = vsel %vm6_vm0, %v1624_v33, %v1623_v32  ;;  %v1632_v61 = vld [vmem:[%s3155_s0 + $0x3] ss:$16 sm:%s1109_s28]   ;;  %vm695_vm14 = vcmask 589312   ;;  %vm781_vm15 = vcmask 523712  }
  0x5a   :  { %747 = vrot.lane.b32.xlu0 %v746_v8, %s1716_s15  ;;  %s8_s15 = smov 48  ;;  %v1594_v8 = vld [vmem:[%s3155_s0 + $0x145] ss:$16 sm:%s958_s3]   ;;  %s1130_s3 = smov 3  ;;  %v1640_v2 = vld [vmem:[%s3155_s0 + $0x9c] sm:$0x80]  }
  0x5b   :  { %v9_v50 = vld [vmem:[%s3155_s0] ss:$16 sm:%s8_s15]   ;;  %v964_v14 = vsel %vm6_vm0, %v1595_v12, %v1594_v8  ;;  %s1047_s15 = smov 12  ;;  %v1625_v36 = vld [vmem:[%s3155_s0 + $0xb4] ss:$16 sm:%s1082_s12]   ;;  %s1133_s12 = smov 12 }
  0x5c   :  { %v11_v52 = vsel %vm10_vm1, %v9_v50, %v7_v49  ;;  %v968_v20 = vsel %vm107_vm3, %v1596_v15, %v964_v14  ;;  %v1616_v27 = vld [vmem:[%s3155_s0 + $0x144] ss:$16 sm:%s1047_s15]   ;;  %v1637_v47 = vld [vmem:[%s3155_s0 + $0x143] ss:$16 sm:%s1133_s12]   ;;  %v1085_v49 = vsel %vm10_vm1, %v1625_v36, %v1080_v41 }
  0x5d   :  { %v15_v56 = vsel %vm14_vm2, %v13_v53, %v11_v52  ;;  %v973_v29 = vsel %vm112_vm4, %v1597_v21, %v968_v20  ;;  %v1050_v37 = vsel %vm6_vm0, %v1616_v27, %v1615_v25  ;;  %v1618_v42 = vld [vmem:[%s3155_s0 + $0x34] ss:$16 sm:%s1056_s29]   ;;  %v1639_v1 = vld [vmem:[%s3155_s0 + $0x33] ss:$16 sm:%s1142_s19]   ;;  %s1720_s19 = smov 32  }
  0x5e   :  { %833 = vrot.lane.b32.xlu1 %v832_v34, %s1717_s20  ;;  %17 = vst.msk [vmem:[%s3156_s1] sm:$0x1f] %vm16_vm6, %v15_v56   ;;  %v1610_v34 = vld [vmem:[%s3155_s0 + $0x4] ss:$16 sm:%s1020_s16]   ;;  %v977_v39 = vsel %vm116_vm5, %v1598_v30, %v973_v29  ;;  %v1054_v46 = vsel %vm107_vm3, %v1617_v38, %v1050_v37  ;;  %s1114_s16 = smov 48 }
  0x5f   :  { %779 = vrot.lane.b32.xlu2 %v778_v40, %s1717_s20  ;;  %1363 = vst.msk [vmem:[%s3156_s1 + $0x3] sm:$0xe0] %vm16_vm6, %v15_v56   ;;  %v1004_v40 = vsel %vm14_vm2, %v1605_v24, %v999_v31  ;;  %v1026_v44 = vsel %vm6_vm0, %v1611_v35, %v1610_v34  ;;  %v1612_v45 = vld [vmem:[%s3155_s0 + $0x4] ss:$16 sm:%s1028_s26]   ;;  %v1059_v55 = vsel %vm112_vm4, %v1618_v42, %v1054_v46  ;;  %s1219_s26 = smov 12 }
  0x60   :  { %v1031_v52 = vsel %vm10_vm1, %v1612_v45, %v1026_v44  ;;  %v1613_v53 = vld [vmem:[%s3155_s0 + $0x4] ss:$16 sm:%s1033_s18]   ;;  %v1633_v4 = vld [vmem:[%s3155_s0 + $0x3] ss:$16 sm:%s1114_s16]   ;;  %s1200_s16 = smov 48  ;;  %s1302_s18 = smov 3 }
  0x61   :  { %v1619_v56 = vld [vmem:[%s3155_s0 + $0x9d] sm:$0x80]   ;;  %v1036_v62 = vsel %vm14_vm2, %v1613_v53, %v1031_v52  ;;  %v1634_v7 = vld [vmem:[%s3155_s0 + $0x3] ss:$16 sm:%s1119_s2]   ;;  %s1205_s2 = smov 192 }
  0x62   :  { %806 = vrot.lane.b32.xlu0 %v805_v43, %s1717_s20  ;;  %v1636_v43 = vld [vmem:[%s3155_s0 + $0x143] ss:$16 sm:%s1130_s3]   ;;  %s1216_s3 = smov 3  ;;  %v1659_v34 = vld [vmem:[%s3155_s0 + $0x17e] sm:$0x10]  }
  0x63   :  { %v1136_v57 = vsel %vm6_vm0, %v1637_v47, %v1636_v43  ;;  %v1652_v8 = vld [vmem:[%s3155_s0 + $0x2] ss:$16 sm:%s1192_s25]   ;;  %v1647_v29 = vld [vmem:[%s3155_s0 + $0xb3] ss:$16 sm:%s1173_s13]   ;;  %s1278_s25 = smov 3 }
  0x64   :  { %v1653_v12 = vld [vmem:[%s3155_s0 + $0x2] ss:$16 sm:%s1195_s5]   ;;  %s1228_s5 = smov 96  ;;  %v1650_v37 = vld [vmem:[%s3155_s0 + $0x133] sm:$0x1]  }
  0x65   :  { %v1655_v20 = vld [vmem:[%s3155_s0 + $0x2] ss:$16 sm:%s1205_s2]   ;;  %s1305_s2 = smov 12  ;;  %v1687_v45 = vld [vmem:[%s3155_s0 + $0xb1] ss:$16 sm:%s1335_s17]  }
  0x66   :  { %892 = vrot.lane.b32.xlu1 %v891_v60, %s1718_s4  ;;  %v1631_v60 = vld [vmem:[%s3155_s0 + $0x3] ss:$16 sm:%s1106_s9]   ;;  %s1168_s9 = smov 48  ;;  %v1671_v52 = vld [vmem:[%s3155_s0 + $0x132] sm:$0x1]  }
  0x67   :  { %842 = vrot.lane.b32.xlu2 %v1566_v63, %s1717_s20  ;;  %v1063_v63 = vsel %vm116_vm5, %v1619_v56, %v1059_v55  ;;  %v1112_v3 = vsel %vm6_vm0, %v1632_v61, %v1631_v60  ;;  %s1163_s20 = smov 12  ;;  %v1646_v22 = vld [vmem:[%s3155_s0 + $0xb3] ss:$16 sm:%s1168_s9]  }
  0x68   :  { %v1117_v11 = vsel %vm10_vm1, %v1633_v4, %v1112_v3  ;;  %v1645_v15 = vld [vmem:[%s3155_s0 + $0xb3] ss:$16 sm:%s1163_s20]   ;;  %s1721_s20 = smov 24   ;;  %v1657_v23 = vld [vmem:[%s3155_s0 + $0x142] ss:$16 sm:%s1216_s3]   ;;  %s1314_s3 = smov 96 }
  0x69   :  { %v2393_v9 = vpop.permute.xlu2 %177   ;;  %v1122_v17 = vsel %vm14_vm2, %v1634_v7, %v1117_v11  ;;  %v1665_v32 = vld [vmem:[%s3155_s0 + $0xb2] ss:$16 sm:%s1246_s21]   ;;  %s1722_s21 = smov 16   ;;  %v1678_v46 = vld [vmem:[%s3155_s0 + $0x141] ss:$16 sm:%s1302_s18]  }
  0x6a   :  { %865 = vrot.lane.b32.xlu0 %v864_v0, %s1718_s4  ;;  %v1140_v0 = vsel %vm107_vm3, %v1638_v58, %v1136_v57  ;;  %v1666_v35 = vld [vmem:[%s3155_s0 + $0xb2] ss:$16 sm:%s1249_s24]   ;;  %s1286_s24 = smov 48  ;;  %v1680_v57 = vld [vmem:[%s3155_s0 + $0x17d] sm:$0x10]  }
  0x6b   :  { %v1145_v6 = vsel %vm112_vm4, %v1639_v1, %v1140_v0  ;;  %v1667_v41 = vld [vmem:[%s3155_s0 + $0xb2] ss:$16 sm:%s1254_s30]   ;;  %v1679_v47 = vld [vmem:[%s3155_s0 + $0x141] ss:$16 sm:%s1305_s2]  }
  0x6c   :  { %v1149_v14 = vsel %vm116_vm5, %v1640_v2, %v1145_v6  ;;  %v1668_v43 = vld [vmem:[%s3155_s0 + $0xb2] ss:$16 sm:%s1259_s14]   ;;  %v1674_v55 = vld [vmem:[%s3155_s0 + $0x1] ss:$16 sm:%s1281_s10]   ;;  %v1308_v56 = vsel %vm6_vm0, %v1679_v47, %v1678_v46 }
  0x6d   :  { %v1312_v0 = vsel %vm107_vm3, %v1680_v57, %v1308_v56  ;;  %v1681_v1 = vld [vmem:[%s3155_s0 + $0x31] ss:$16 sm:%s1314_s3]  }
  0x6e   :  { %951 = vrot.lane.b32.xlu1 %v950_v13, %s1719_s7  ;;  %v1644_v13 = vld [vmem:[%s3155_s0 + $0xb3] ss:$16 sm:%s1160_s8]   ;;  %s1340_s8 = smov 48 }
  0x6f   :  { %919 = vrot.lane.b32.xlu2 %v918_v18, %s1718_s4  ;;  %v1198_v18 = vsel %vm6_vm0, %v1653_v12, %v1652_v8  ;;  %v1166_v21 = vsel %vm6_vm0, %v1645_v15, %v1644_v13  ;;  %v1688_v61 = vld [vmem:[%s3155_s0 + $0xb1] ss:$16 sm:%s1340_s8]   ;;  %s1345_s8 = smov 192 }
  0x70   :  { %v1689_v4 = vld [vmem:[%s3155_s0 + $0xb1] ss:$16 sm:%s1345_s8]  }
  0x71   :  { %v2440_v28 = vpop.permute.xlu2 %204  }
  0x72   :  { %928 = vrot.lane.b32.xlu0 %v1587_v19, %s1718_s4  ;;  %s1087_s4 = smov 192  ;;  %v1654_v19 = vld [vmem:[%s3155_s0 + $0x2] ss:$16 sm:%s1200_s16]   ;;  %s1332_s16 = smov 3 }
  0x73   :  { %v1626_v50 = vld [vmem:[%s3155_s0 + $0xb4] ss:$16 sm:%s1087_s4]   ;;  %v1203_v25 = vsel %vm10_vm1, %v1654_v19, %v1198_v18  ;;  %v1686_v44 = vld [vmem:[%s3155_s0 + $0xb1] ss:$16 sm:%s1332_s16]   ;;  %s1291_s4 = smov 192 }
  0x74   :  { %v1090_v59 = vsel %vm14_vm2, %v1626_v50, %v1085_v49  ;;  %v1208_v31 = vsel %vm14_vm2, %v1655_v20, %v1203_v25  ;;  %v1661_v50 = vld [vmem:[%s3155_s0 + $0x9b] sm:$0x80]   ;;  %v1338_v60 = vsel %vm6_vm0, %v1687_v45, %v1686_v44  ;;  %v1676_v7 = vld [vmem:[%s3155_s0 + $0x1] ss:$16 sm:%s1291_s4]  }
  0x75   :  { %v1343_v3 = vsel %vm10_vm1, %v1688_v61, %v1338_v60 }
  0x76   :  { %1014 = vrot.lane.b32.xlu1 %v1608_v26, %s1719_s7  ;;  %v1658_v26 = vld [vmem:[%s3155_s0 + $0x142] ss:$16 sm:%s1219_s26]   ;;  %v1348_v11 = vsel %vm14_vm2, %v1689_v4, %v1343_v3 }
  0x77   :  { %978 = vrot.lane.b32.xlu2 %v977_v39, %s1719_s7  ;;  %v1222_v33 = vsel %vm6_vm0, %v1658_v26, %v1657_v23  ;;  %v1660_v39 = vld [vmem:[%s3155_s0 + $0x32] ss:$16 sm:%s1228_s5]   ;;  %s1723_s5 = smov 8  }
  0x78   :  { %v146_v48 = vpop.permute.xlu1 %145   ;;  %v1226_v38 = vsel %vm107_vm3, %v1659_v34, %v1222_v33  ;;  %vm1125_vm3 = vcmask 261312  }
  0x79   :  { %1396 = vst.msk [vmem:[%s3156_s1 + $0x11] sm:$0xf] %vm93_vm7, %v146_v48   ;;  %v264_v51 = vpop.permute.xlu2 %263   ;;  %v1231_v49 = vsel %vm112_vm4, %v1660_v39, %v1226_v38 }
  0x7a   :  { %1005 = vrot.lane.b32.xlu0 %v1004_v40, %s1719_s7  ;;  %1397 = vst.msk [vmem:[%s3156_s1 + $0x14] sm:$0xf0] %vm93_vm7, %v146_v48   ;;  %v1252_v40 = vsel %vm6_vm0, %v1666_v35, %v1665_v32  ;;  %v1235_v58 = vsel %vm116_vm5, %v1661_v50, %v1231_v49 }
  0x7b   :  { %v1257_v53 = vsel %vm10_vm1, %v1667_v41, %v1252_v40 }
  0x7c   :  { %v92_v54 = vpop.permute.xlu0 %91  }
  0x7d   :  { %94 = vst.msk [vmem:[%s3156_s1] sm:$0x1f] %vm93_vm7, %v92_v54  }
  0x7e   :  { %1383 = vst.msk [vmem:[%s3156_s1 + $0x3] sm:$0xe0] %vm93_vm7, %v92_v54   ;;  %1091 = vrot.lane.b32.xlu1 %v1090_v59, %s1720_s19  ;;  %v1673_v54 = vld [vmem:[%s3155_s0 + $0x1] ss:$16 sm:%s1278_s25]   ;;  %v1262_v59 = vsel %vm14_vm2, %v1668_v43, %v1257_v53 }
  0x7f   :  { %180 = vst.msk [vmem:[%s3156_s1] sm:$0x1f] %vm179_vm8, %v2393_v9   ;;  %1037 = vrot.lane.b32.xlu2 %v1036_v62, %s1720_s19  ;;  %v1284_v62 = vsel %vm6_vm0, %v1674_v55, %v1673_v54  ;;  %vm867_vm0 = vcmask 458112  }
  0x80   :  { %1404 = vst.msk [vmem:[%s3156_s1 + $0x3] sm:$0xe0] %vm179_vm8, %v2393_v9   ;;  %v155_v5 = vpop.permute.xlu1 %154  }
  0x81   :  { %266 = vst.msk [vmem:[%s3156_s1] sm:$0x1f] %vm265_vm9, %v264_v51   ;;  %v327_v9 = vpop.permute.xlu2 %326  }
  0x82   :  { %1064 = vrot.lane.b32.xlu0 %v1063_v63, %s1720_s19  ;;  %1425 = vst.msk [vmem:[%s3156_s1 + $0x3] sm:$0xe0] %vm265_vm9, %v264_v51   ;;  %v1675_v63 = vld [vmem:[%s3155_s0 + $0x1] ss:$16 sm:%s1286_s24]  }
  0x83   :  { %1399 = vst.msk [vmem:[%s3156_s1 + $0x1c] sm:$0x1] %vm93_vm7, %v155_v5   ;;  %v1289_v6 = vsel %vm10_vm1, %v1675_v63, %v1284_v62 }
  0x84   :  { %v119_v10 = vpop.permute.xlu0 %118   ;;  %v1294_v12 = vsel %vm14_vm2, %v1676_v7, %v1289_v6 }
  0x85   :  { %1389 = vst.msk [vmem:[%s3156_s1 + $0x20] sm:$0x1f] %vm93_vm7, %v119_v10  }
  0x86   :  { %1390 = vst.msk [vmem:[%s3156_s1 + $0x6] sm:$0x60] %vm93_vm7, %v119_v10   ;;  %1150 = vrot.lane.b32.xlu1 %v1149_v14, %s1721_s20 }
  0x87   :  { %1391 = vst.msk [vmem:[%s3156_s1 + $0x9] sm:$0x80] %vm93_vm7, %v119_v10   ;;  %1100 = vrot.lane.b32.xlu2 %v1629_v16, %s1720_s19  ;;  %v1682_v10 = vld [vmem:[%s3155_s0 + $0x9a] sm:$0x80]  }
  0x88   :  { %1410 = vst.msk [vmem:[%s3156_s1 + $0x20] sm:$0x1f] %vm179_vm8, %v2440_v28   ;;  %v241_v24 = vpop.permute.xlu1 %240  }
  0x89   :  { %1411 = vst.msk [vmem:[%s3156_s1 + $0x6] sm:$0x60] %vm179_vm8, %v2440_v28   ;;  %v2637_v27 = vpop.permute.xlu2 %403  }
  0x8a   :  { %1412 = vst.msk [vmem:[%s3156_s1 + $0x9] sm:$0x80] %vm179_vm8, %v2440_v28   ;;  %1123 = vrot.lane.b32.xlu0 %v1122_v17, %s1721_s20  ;;  %v1171_v28 = vsel %vm10_vm1, %v1646_v22, %v1166_v21  ;;  %v1692_v17 = vld [vmem:[%s3155_s0 + $0x131] sm:$0x1]   ;;  %vm953_vm1 = vcmask 392512  }
  0x8b   :  { %1420 = vst.msk [vmem:[%s3156_s1 + $0x1c] sm:$0x1] %vm179_vm8, %v241_v24   ;;  %v1176_v36 = vsel %vm14_vm2, %v1647_v29, %v1171_v28  ;;  %vm1039_vm2 = vcmask 326912  }
  0x8c   :  { %v232_v30 = vpop.permute.xlu0 %231   ;;  %1441 = vst.msk [vmem:[%s3156_s1 + $0x1c] sm:$0x1] %vm265_vm9, %v327_v9   ;;  %v1317_v9 = vsel %vm112_vm4, %v1681_v1, %v1312_v0  ;;  %vm1211_vm4 = vcmask 195712  }
  0x8d   :  { %1417 = vst.msk [vmem:[%s3156_s1 + $0x11] sm:$0xf] %vm179_vm8, %v232_v30   ;;  %v1321_v13 = vsel %vm116_vm5, %v1682_v10, %v1317_v9  ;;  %vm1297_vm5 = vcmask 130112  }
  0x8e   :  { %1418 = vst.msk [vmem:[%s3156_s1 + $0x14] sm:$0xf0] %vm179_vm8, %v232_v30   ;;  %1209 = vrot.lane.b32.xlu1 %v1208_v31, %s1722_s21 }
  0x8f   :  { %1177 = vrot.lane.b32.xlu2 %v1176_v36, %s1721_s20 }
  0x90   :  { %v318_v42 = vpop.permute.xlu1 %317  }
  0x91   :  { %1438 = vst.msk [vmem:[%s3156_s1 + $0x11] sm:$0xf] %vm265_vm9, %v318_v42   ;;  %v463_v48 = vpop.permute.xlu2 %462  }
  0x92   :  { %1186 = vrot.lane.b32.xlu0 %v1650_v37, %s1721_s20  ;;  %1439 = vst.msk [vmem:[%s3156_s1 + $0x14] sm:$0xf0] %vm265_vm9, %v318_v42  }
  0x93   :  { %1459 = vst.msk [vmem:[%s3156_s1 + $0x11] sm:$0xf] %vm351_vm10, %v2637_v27  }
  0x94   :  { %v291_v51 = vpop.permute.xlu0 %290   ;;  %1460 = vst.msk [vmem:[%s3156_s1 + $0x14] sm:$0xf0] %vm351_vm10, %v2637_v27  }
  0x95   :  { %1431 = vst.msk [vmem:[%s3156_s1 + $0x20] sm:$0x1f] %vm265_vm9, %v291_v51  }
  0x96   :  { %1432 = vst.msk [vmem:[%s3156_s1 + $0x6] sm:$0x60] %vm265_vm9, %v291_v51   ;;  %1272 = vrot.lane.b32.xlu1 %v1671_v52, %s1722_s21 }
  0x97   :  { %1433 = vst.msk [vmem:[%s3156_s1 + $0x9] sm:$0x80] %vm265_vm9, %v291_v51   ;;  %1236 = vrot.lane.b32.xlu2 %v1235_v58, %s1722_s21 }
  0x98   :  { %v377_v2 = vpop.permute.xlu1 %376  }
  0x99   :  { %1452 = vst.msk [vmem:[%s3156_s1 + $0x20] sm:$0x1f] %vm351_vm10, %v377_v2   ;;  %v522_v5 = vpop.permute.xlu2 %521  }
  0x9a   :  { %1263 = vrot.lane.b32.xlu0 %v1262_v59, %s1722_s21  ;;  %1453 = vst.msk [vmem:[%s3156_s1 + $0x6] sm:$0x60] %vm351_vm10, %v377_v2  }
  0x9b   :  { %1454 = vst.msk [vmem:[%s3156_s1 + $0x9] sm:$0x80] %vm351_vm10, %v377_v2  }
  0x9c   :  { %v350_v8 = vpop.permute.xlu0 %349   ;;  %1473 = vst.msk [vmem:[%s3156_s1 + $0x20] sm:$0x1f] %vm437_vm11, %v463_v48  }
  0x9d   :  { %352 = vst.msk [vmem:[%s3156_s1] sm:$0x1f] %vm351_vm10, %v350_v8  }
  0x9e   :  { %1446 = vst.msk [vmem:[%s3156_s1 + $0x3] sm:$0xe0] %vm351_vm10, %v350_v8   ;;  %1349 = vrot.lane.b32.xlu1 %v1348_v11, %s1723_s5 }
  0x9f   :  { %1474 = vst.msk [vmem:[%s3156_s1 + $0x6] sm:$0x60] %vm437_vm11, %v463_v48   ;;  %1295 = vrot.lane.b32.xlu2 %v1294_v12, %s1723_s5 }
  0xa0   :  { %1475 = vst.msk [vmem:[%s3156_s1 + $0x9] sm:$0x80] %vm437_vm11, %v463_v48   ;;  %v436_v14 = vpop.permute.xlu1 %435  }
  0xa1   :  { %438 = vst.msk [vmem:[%s3156_s1] sm:$0x1f] %vm437_vm11, %v436_v14   ;;  %v585_v15 = vpop.permute.xlu2 %584  }
  0xa2   :  { %1322 = vrot.lane.b32.xlu0 %v1321_v13, %s1723_s5  ;;  %1467 = vst.msk [vmem:[%s3156_s1 + $0x3] sm:$0xe0] %vm437_vm11, %v436_v14  }
  0xa3   :  { %524 = vst.msk [vmem:[%s3156_s1] sm:$0x1f] %vm523_vm12, %v522_v5  }
  0xa4   :  { %v413_v16 = vpop.permute.xlu0 %412   ;;  %1488 = vst.msk [vmem:[%s3156_s1 + $0x3] sm:$0xe0] %vm523_vm12, %v522_v5  }
  0xa5   :  { %1462 = vst.msk [vmem:[%s3156_s1 + $0x1c] sm:$0x1] %vm351_vm10, %v413_v16  }
  0xa7   :  { %1358 = vrot.lane.b32.xlu2 %v1692_v17, %s1723_s5 }
  0xa8   :  { %v499_v18 = vpop.permute.xlu1 %498  }
  0xa9   :  { %1483 = vst.msk [vmem:[%s3156_s1 + $0x1c] sm:$0x1] %vm437_vm11, %v499_v18   ;;  %v662_v19 = vpop.permute.xlu2 %661  }
  0xaa   :  { %1504 = vst.msk [vmem:[%s3156_s1 + $0x1c] sm:$0x1] %vm523_vm12, %v585_v15  }
  0xac   :  { %v490_v20 = vpop.permute.xlu0 %489  }
  0xad   :  { %1480 = vst.msk [vmem:[%s3156_s1 + $0x11] sm:$0xf] %vm437_vm11, %v490_v20  }
  0xae   :  { %1481 = vst.msk [vmem:[%s3156_s1 + $0x14] sm:$0xf0] %vm437_vm11, %v490_v20  }
  0xb0   :  { %v576_v21 = vpop.permute.xlu1 %575  }
  0xb1   :  { %1501 = vst.msk [vmem:[%s3156_s1 + $0x11] sm:$0xf] %vm523_vm12, %v576_v21   ;;  %v721_v22 = vpop.permute.xlu2 %720  }
  0xb2   :  { %1502 = vst.msk [vmem:[%s3156_s1 + $0x14] sm:$0xf0] %vm523_vm12, %v576_v21  }
  0xb3   :  { %1522 = vst.msk [vmem:[%s3156_s1 + $0x11] sm:$0xf] %vm609_vm13, %v662_v19  }
  0xb4   :  { %v549_v23 = vpop.permute.xlu0 %548   ;;  %1523 = vst.msk [vmem:[%s3156_s1 + $0x14] sm:$0xf0] %vm609_vm13, %v662_v19  }
  0xb5   :  { %1494 = vst.msk [vmem:[%s3156_s1 + $0x20] sm:$0x1f] %vm523_vm12, %v549_v23  }
  0xb6   :  { %1495 = vst.msk [vmem:[%s3156_s1 + $0x6] sm:$0x60] %vm523_vm12, %v549_v23  }
  0xb7   :  { %1496 = vst.msk [vmem:[%s3156_s1 + $0x9] sm:$0x80] %vm523_vm12, %v549_v23  }
  0xb8   :  { %v635_v24 = vpop.permute.xlu1 %634  }
  0xb9   :  { %1515 = vst.msk [vmem:[%s3156_s1 + $0x20] sm:$0x1f] %vm609_vm13, %v635_v24   ;;  %v780_v25 = vpop.permute.xlu2 %779  }
  0xba   :  { %1516 = vst.msk [vmem:[%s3156_s1 + $0x6] sm:$0x60] %vm609_vm13, %v635_v24  }
  0xbb   :  { %1517 = vst.msk [vmem:[%s3156_s1 + $0x9] sm:$0x80] %vm609_vm13, %v635_v24  }
  0xbc   :  { %v608_v26 = vpop.permute.xlu0 %607   ;;  %1536 = vst.msk [vmem:[%s3156_s1 + $0x20] sm:$0x1f] %vm695_vm14, %v721_v22  }
  0xbd   :  { %610 = vst.msk [vmem:[%s3156_s1] sm:$0x1f] %vm609_vm13, %v608_v26  }
  0xbe   :  { %1509 = vst.msk [vmem:[%s3156_s1 + $0x3] sm:$0xe0] %vm609_vm13, %v608_v26  }
  0xbf   :  { %1537 = vst.msk [vmem:[%s3156_s1 + $0x6] sm:$0x60] %vm695_vm14, %v721_v22  }
  0xc0   :  { %1538 = vst.msk [vmem:[%s3156_s1 + $0x9] sm:$0x80] %vm695_vm14, %v721_v22   ;;  %v694_v27 = vpop.permute.xlu1 %693  }
  0xc1   :  { %696 = vst.msk [vmem:[%s3156_s1] sm:$0x1f] %vm695_vm14, %v694_v27   ;;  %v843_v28 = vpop.permute.xlu2 %842  }
  0xc2   :  { %1530 = vst.msk [vmem:[%s3156_s1 + $0x3] sm:$0xe0] %vm695_vm14, %v694_v27  }
  0xc3   :  { %782 = vst.msk [vmem:[%s3156_s1] sm:$0x1f] %vm781_vm15, %v780_v25  }
  0xc4   :  { %v671_v29 = vpop.permute.xlu0 %670   ;;  %1551 = vst.msk [vmem:[%s3156_s1 + $0x3] sm:$0xe0] %vm781_vm15, %v780_v25  }
  0xc5   :  { %1525 = vst.msk [vmem:[%s3156_s1 + $0x1c] sm:$0x1] %vm609_vm13, %v671_v29  }
  0xc8   :  { %v757_v30 = vpop.permute.xlu1 %756  }
  0xc9   :  { %1546 = vst.msk [vmem:[%s3156_s1 + $0x1c] sm:$0x1] %vm695_vm14, %v757_v30   ;;  %v920_v31 = vpop.permute.xlu2 %919  }
  0xca   :  { %1567 = vst.msk [vmem:[%s3156_s1 + $0x1c] sm:$0x1] %vm781_vm15, %v843_v28  }
  0xcc   :  { %v748_v32 = vpop.permute.xlu0 %747  }
  0xcd   :  { %1543 = vst.msk [vmem:[%s3156_s1 + $0x11] sm:$0xf] %vm695_vm14, %v748_v32  }
  0xce   :  { %1544 = vst.msk [vmem:[%s3156_s1 + $0x14] sm:$0xf0] %vm695_vm14, %v748_v32  }
  0xd0   :  { %v834_v33 = vpop.permute.xlu1 %833  }
  0xd1   :  { %1564 = vst.msk [vmem:[%s3156_s1 + $0x11] sm:$0xf] %vm781_vm15, %v834_v33   ;;  %v979_v34 = vpop.permute.xlu2 %978  }
  0xd2   :  { %1565 = vst.msk [vmem:[%s3156_s1 + $0x14] sm:$0xf0] %vm781_vm15, %v834_v33  }
  0xd3   :  { %1585 = vst.msk [vmem:[%s3156_s1 + $0x11] sm:$0xf] %vm867_vm0, %v920_v31  }
  0xd4   :  { %v807_v35 = vpop.permute.xlu0 %806   ;;  %1586 = vst.msk [vmem:[%s3156_s1 + $0x14] sm:$0xf0] %vm867_vm0, %v920_v31  }
  0xd5   :  { %1557 = vst.msk [vmem:[%s3156_s1 + $0x20] sm:$0x1f] %vm781_vm15, %v807_v35  }
  0xd6   :  { %1558 = vst.msk [vmem:[%s3156_s1 + $0x6] sm:$0x60] %vm781_vm15, %v807_v35  }
  0xd7   :  { %1559 = vst.msk [vmem:[%s3156_s1 + $0x9] sm:$0x80] %vm781_vm15, %v807_v35  }
  0xd8   :  { %v893_v36 = vpop.permute.xlu1 %892  }
  0xd9   :  { %1578 = vst.msk [vmem:[%s3156_s1 + $0x20] sm:$0x1f] %vm867_vm0, %v893_v36   ;;  %v1038_v37 = vpop.permute.xlu2 %1037  }
  0xda   :  { %1579 = vst.msk [vmem:[%s3156_s1 + $0x6] sm:$0x60] %vm867_vm0, %v893_v36  }
  0xdb   :  { %1580 = vst.msk [vmem:[%s3156_s1 + $0x9] sm:$0x80] %vm867_vm0, %v893_v36  }
  0xdc   :  { %v866_v38 = vpop.permute.xlu0 %865   ;;  %1599 = vst.msk [vmem:[%s3156_s1 + $0x20] sm:$0x1f] %vm953_vm1, %v979_v34  }
  0xdd   :  { %868 = vst.msk [vmem:[%s3156_s1] sm:$0x1f] %vm867_vm0, %v866_v38  }
  0xde   :  { %1572 = vst.msk [vmem:[%s3156_s1 + $0x3] sm:$0xe0] %vm867_vm0, %v866_v38  }
  0xdf   :  { %1600 = vst.msk [vmem:[%s3156_s1 + $0x6] sm:$0x60] %vm953_vm1, %v979_v34  }
  0xe0   :  { %1601 = vst.msk [vmem:[%s3156_s1 + $0x9] sm:$0x80] %vm953_vm1, %v979_v34   ;;  %v952_v39 = vpop.permute.xlu1 %951  }
  0xe1   :  { %954 = vst.msk [vmem:[%s3156_s1] sm:$0x1f] %vm953_vm1, %v952_v39   ;;  %v1101_v40 = vpop.permute.xlu2 %1100  }
  0xe2   :  { %1593 = vst.msk [vmem:[%s3156_s1 + $0x3] sm:$0xe0] %vm953_vm1, %v952_v39  }
  0xe3   :  { %1040 = vst.msk [vmem:[%s3156_s1] sm:$0x1f] %vm1039_vm2, %v1038_v37  }
  0xe4   :  { %v929_v41 = vpop.permute.xlu0 %928   ;;  %1614 = vst.msk [vmem:[%s3156_s1 + $0x3] sm:$0xe0] %vm1039_vm2, %v1038_v37  }
  0xe5   :  { %1588 = vst.msk [vmem:[%s3156_s1 + $0x1c] sm:$0x1] %vm867_vm0, %v929_v41  }
  0xe8   :  { %v1015_v42 = vpop.permute.xlu1 %1014  }
  0xe9   :  { %1609 = vst.msk [vmem:[%s3156_s1 + $0x1c] sm:$0x1] %vm953_vm1, %v1015_v42   ;;  %v1178_v43 = vpop.permute.xlu2 %1177  }
  0xea   :  { %1630 = vst.msk [vmem:[%s3156_s1 + $0x1c] sm:$0x1] %vm1039_vm2, %v1101_v40  }
  0xec   :  { %v1006_v44 = vpop.permute.xlu0 %1005  }
  0xed   :  { %1606 = vst.msk [vmem:[%s3156_s1 + $0x11] sm:$0xf] %vm953_vm1, %v1006_v44  }
  0xee   :  { %1607 = vst.msk [vmem:[%s3156_s1 + $0x14] sm:$0xf0] %vm953_vm1, %v1006_v44  }
  0xf0   :  { %v1092_v45 = vpop.permute.xlu1 %1091  }
  0xf1   :  { %1627 = vst.msk [vmem:[%s3156_s1 + $0x11] sm:$0xf] %vm1039_vm2, %v1092_v45   ;;  %v1237_v46 = vpop.permute.xlu2 %1236  }
  0xf2   :  { %1628 = vst.msk [vmem:[%s3156_s1 + $0x14] sm:$0xf0] %vm1039_vm2, %v1092_v45  }
  0xf3   :  { %1648 = vst.msk [vmem:[%s3156_s1 + $0x11] sm:$0xf] %vm1125_vm3, %v1178_v43  }
  0xf4   :  { %v1065_v47 = vpop.permute.xlu0 %1064   ;;  %1649 = vst.msk [vmem:[%s3156_s1 + $0x14] sm:$0xf0] %vm1125_vm3, %v1178_v43  }
  0xf5   :  { %1620 = vst.msk [vmem:[%s3156_s1 + $0x20] sm:$0x1f] %vm1039_vm2, %v1065_v47  }
  0xf6   :  { %1621 = vst.msk [vmem:[%s3156_s1 + $0x6] sm:$0x60] %vm1039_vm2, %v1065_v47  }
  0xf7   :  { %1622 = vst.msk [vmem:[%s3156_s1 + $0x9] sm:$0x80] %vm1039_vm2, %v1065_v47  }
  0xf8   :  { %v1151_v48 = vpop.permute.xlu1 %1150  }
  0xf9   :  { %1641 = vst.msk [vmem:[%s3156_s1 + $0x20] sm:$0x1f] %vm1125_vm3, %v1151_v48   ;;  %v1296_v49 = vpop.permute.xlu2 %1295  }
  0xfa   :  { %1642 = vst.msk [vmem:[%s3156_s1 + $0x6] sm:$0x60] %vm1125_vm3, %v1151_v48  }
  0xfb   :  { %1643 = vst.msk [vmem:[%s3156_s1 + $0x9] sm:$0x80] %vm1125_vm3, %v1151_v48  }
  0xfc   :  { %v1124_v50 = vpop.permute.xlu0 %1123   ;;  %1662 = vst.msk [vmem:[%s3156_s1 + $0x20] sm:$0x1f] %vm1211_vm4, %v1237_v46  }
  0xfd   :  { %1126 = vst.msk [vmem:[%s3156_s1] sm:$0x1f] %vm1125_vm3, %v1124_v50  }
  0xfe   :  { %1635 = vst.msk [vmem:[%s3156_s1 + $0x3] sm:$0xe0] %vm1125_vm3, %v1124_v50  }
  0xff   :  { %1663 = vst.msk [vmem:[%s3156_s1 + $0x6] sm:$0x60] %vm1211_vm4, %v1237_v46  }
 0x100   :  { %1664 = vst.msk [vmem:[%s3156_s1 + $0x9] sm:$0x80] %vm1211_vm4, %v1237_v46   ;;  %v1210_v51 = vpop.permute.xlu1 %1209  }
 0x101   :  { %1212 = vst.msk [vmem:[%s3156_s1] sm:$0x1f] %vm1211_vm4, %v1210_v51   ;;  %v1359_v52 = vpop.permute.xlu2 %1358  }
 0x102   :  { %1656 = vst.msk [vmem:[%s3156_s1 + $0x3] sm:$0xe0] %vm1211_vm4, %v1210_v51  }
 0x103   :  { %1298 = vst.msk [vmem:[%s3156_s1] sm:$0x1f] %vm1297_vm5, %v1296_v49  }
 0x104   :  { %v1187_v53 = vpop.permute.xlu0 %1186   ;;  %1677 = vst.msk [vmem:[%s3156_s1 + $0x3] sm:$0xe0] %vm1297_vm5, %v1296_v49  }
 0x105   :  { %1651 = vst.msk [vmem:[%s3156_s1 + $0x1c] sm:$0x1] %vm1125_vm3, %v1187_v53  }
 0x108   :  { %v1273_v54 = vpop.permute.xlu1 %1272  }
 0x109   :  { %1672 = vst.msk [vmem:[%s3156_s1 + $0x1c] sm:$0x1] %vm1211_vm4, %v1273_v54  }
 0x10a   :  { %1693 = vst.msk [vmem:[%s3156_s1 + $0x1c] sm:$0x1] %vm1297_vm5, %v1359_v52  }
 0x10c   :  { %v1264_v55 = vpop.permute.xlu0 %1263  }
 0x10d   :  { %1669 = vst.msk [vmem:[%s3156_s1 + $0x11] sm:$0xf] %vm1211_vm4, %v1264_v55  }
 0x10e   :  { %1670 = vst.msk [vmem:[%s3156_s1 + $0x14] sm:$0xf0] %vm1211_vm4, %v1264_v55  }
 0x110   :  { %v1350_v56 = vpop.permute.xlu1 %1349  }
 0x111   :  { %1690 = vst.msk [vmem:[%s3156_s1 + $0x11] sm:$0xf] %vm1297_vm5, %v1350_v56  }
 0x112   :  { %1691 = vst.msk [vmem:[%s3156_s1 + $0x14] sm:$0xf0] %vm1297_vm5, %v1350_v56  }
 0x114   :  { %v1323_v57 = vpop.permute.xlu0 %1322  }
 0x115   :  { %1683 = vst.msk [vmem:[%s3156_s1 + $0x20] sm:$0x1f] %vm1297_vm5, %v1323_v57  }
 0x116   :  { %1684 = vst.msk [vmem:[%s3156_s1 + $0x6] sm:$0x60] %vm1297_vm5, %v1323_v57  }
 0x117   :  { %1685 = vst.msk [vmem:[%s3156_s1 + $0x9] sm:$0x80] %vm1297_vm5, %v1323_v57  }

// kernel: tile.51
= control target key start
LH: loop header
LB: loop body
LE: loop exit
PB: predicated region body
PF: predicated region fallthrough
CT: control target
= control target key end

     0   :  { %s28_s0 = inlined_call_operand.vmem [shape: f32[32], index: 0, kind: input, shape index: {}]   ;;  %s29_s1 = inlined_call_operand.vmem [shape: f32[16,32], index: 1, kind: output, shape index: {}]  }
   0x1   :  { %v4_v0 = vld [vmem:[%s28_s0] ss:$0 sm:$0xff] }
   0x2   :  { %5 = vst [vmem:[%s29_s1] sm:$0xff] %v4_v0 }
   0x3   :  { %8 = vst [vmem:[%s29_s1 + $0x8] sm:$0xff] %v4_v0 }

// kernel: tile.52
= control target key start
LH: loop header
LB: loop body
LE: loop exit
PB: predicated region body
PF: predicated region fallthrough
CT: control target
= control target key end

     0   :  { %s56_s8 = smov 96   ;;  %s57_s11 = smov 32   ;;  %vm3_vm0 = vcmask 261120   ;;  %vm9_vm1 = vcmask 1048320   ;;  %vm15_vm2 = vcmask 785920   ;;  %vm21_vm3 = vcmask 523520   ;;  %s93_s0 = inlined_call_operand.vmem [shape: f32[16,32], index: 0, kind: input, shape index: {}]   ;;  %s94_s1 = inlined_call_operand.vmem [shape: f32[1,512], index: 1, kind: output, shape index: {}]  }
   0x1   :  { %v47_v0 = vld [vmem:[%s93_s0 + $0x3] ss:$4 sm:$0xf]   ;;  %v49_v1 = vld [vmem:[%s93_s0 + $0x1] ss:$4 sm:$0xf]  }
   0x2   :  { %7 = vrot.lane.b32.xlu0 %v47_v0, %s56_s8  ;;  %19 = vrot.lane.b32.xlu1 %v49_v1, %s57_s11  ;;  %v48_v2 = vld [vmem:[%s93_s0 + $0x2] ss:$4 sm:$0xf]   ;;  %s58_s14 = smov 64  }
   0x3   :  { %v2_v3 = vld [vmem:[%s93_s0] ss:$4 sm:$0xf]  }
   0x4   :  { %4 = vst.msk [vmem:[#allocation0] ss:$8 sm:$0xf] %vm3_vm0, %v2_v3  }
   0xa   :  { %13 = vrot.lane.b32.xlu0 %v48_v2, %s58_s14 }
  0x74   :  { %v8_v4 = vpop.permute.xlu0 %7   ;;  %v20_v5 = vpop.permute.xlu1 %19  }
  0x75   :  { %10 = vst.msk [vmem:[#allocation0] ss:$8 sm:$0xf] %vm9_vm1, %v8_v4  }
  0x7c   :  { %v14_v6 = vpop.permute.xlu0 %13  }
  0x7d   :  { %16 = vst.msk [vmem:[#allocation0] ss:$8 sm:$0xf] %vm15_vm2, %v14_v6  }
  0x7e   :  { %22 = vst.msk [vmem:[#allocation0] ss:$8 sm:$0xf] %vm21_vm3, %v20_v5  }
  0x85   :  { %v25_v7 = vld [vmem:[#allocation0] sm:$0x1]  ;;  %v30_v8 = vld [vmem:[#allocation0 + $0x8] sm:$0x1]  ;;  %v36_v9 = vld [vmem:[#allocation0 + $0x10] sm:$0x1] }
  0x86   :  { %28 = vst [vmem:[%s94_s1] sm:$0x1] %v25_v7  ;;  %v42_v10 = vld [vmem:[#allocation0 + $0x18] sm:$0x1] }
  0x87   :  { %50 = vst [vmem:[%s94_s1 + $0x1] sm:$0x1] %v30_v8 }
  0x88   :  { %51 = vst [vmem:[%s94_s1 + $0x2] sm:$0x1] %v36_v9 }
  0x89   :  { %52 = vst [vmem:[%s94_s1 + $0x3] sm:$0x1] %v42_v10 }

// kernel: transformer_block.1
= control target key start
LH: loop header
LB: loop body
LE: loop exit
PB: predicated region body
PF: predicated region fallthrough
CT: control target
= control target key end

     0   :  { %vm159_vm0 = vcmask 261120   ;;  %vm793_vm1 = vcmask 1046528   ;;  %vm884_vm2 = vcmask 1045504   ;;  %vm975_vm3 = vcmask 1044480   ;;  %s4351_s2 = inlined_call_operand.vmem [shape: f32[160,640], index: 2, kind: input, shape index: {}]   ;;  %s4352_s0 = inlined_call_operand.vmem [shape: f32[2,20,160], index: 0, kind: input, shape index: {}]   ;;  %s4353_s5 = inlined_call_operand.vmem [shape: f32[1,128], index: 5, kind: input, shape index: {}]   ;;  %s4354_s3 = inlined_call_operand.vmem [shape: f32[1,640], index: 3, kind: input, shape index: {}]   ;;  %s4355_s4 = inlined_call_operand.vmem [shape: f32[5,5,128], index: 4, kind: input, shape index: {}]   ;;  %s4356_s6 = inlined_call_operand.vmem [shape: f32[128,128], index: 6, kind: input, shape index: {}]   ;;  %s4357_s7 = inlined_call_operand.vmem [shape: f32[1,128], index: 7, kind: input, shape index: {}]   ;;  %s4358_s8 = inlined_call_operand.vmem [shape: f32[128,512], index: 8, kind: input, shape index: {}]   ;;  %s4359_s1 = inlined_call_operand.vmem [shape: f32[32,128], index: 1, kind: input, shape index: {}]   ;;  %s4360_s10 = inlined_call_operand.vmem [shape: f32[512,128], index: 10, kind: input, shape index: {}]   ;;  %s4361_s9 = inlined_call_operand.vmem [shape: f32[1,512], index: 9, kind: input, shape index: {}]   ;;  %s4362_s11 = inlined_call_operand.vmem [shape: f32[1,128], index: 11, kind: input, shape index: {}]   ;;  %s4363_s12 = inlined_call_operand.vmem [shape: f32[32,128], index: 12, kind: output, shape index: {}]  }
   0x1   :  { %v2084_v0 = vld [vmem:[%s4351_s2 + $0x258] sm:$0xff]  ;;  %v2094_v2 = vld [vmem:[%s4351_s2 + $0x260] sm:$0xff]  ;;  %v2101_v3 = vld [vmem:[%s4351_s2 + $0x230] sm:$0xff]  ;;  %vm1066_vm4 = vcmask 1043456  }
   0x2   :  { %v2089_v1 = vld [vmem:[%s4351_s2 + $0x2f8] sm:$0xff]  ;;  %169 = vmatpush.msra.mxu0 %v2084_v0  ;;  %v2106_v4 = vld [vmem:[%s4351_s2 + $0x2d0] sm:$0xff]  ;;  %221 = vmatpush.msra.mxu2 %v2094_v2  ;;  %v2117_v6 = vld [vmem:[%s4351_s2 + $0x208] sm:$0xff] }
   0x3   :  { %207 = vmatpush.msra.mxu3 %v2089_v1  ;;  %v2111_v5 = vld [vmem:[%s4351_s2 + $0x238] sm:$0xff]  ;;  %v2122_v7 = vld [vmem:[%s4351_s2 + $0x2a8] sm:$0xff]  ;;  %v2129_v8 = vld [vmem:[%s4351_s2 + $0x210] sm:$0xff] }
   0x4   :  { %170 = vmatpush.msra.mxu0 %v2101_v3  ;;  %222 = vmatpush.msra.mxu2 %v2111_v5  ;;  %v2135_v9 = vld [vmem:[%s4351_s2 + $0x1e0] sm:$0xff]  ;;  %v2147_v11 = vld [vmem:[%s4351_s2 + $0x1e8] sm:$0xff]  ;;  %v2163_v14 = vld [vmem:[%s4351_s2 + $0x1b8] sm:$0xff] }
   0x5   :  { %208 = vmatpush.msra.mxu3 %v2106_v4  ;;  %v2140_v10 = vld [vmem:[%s4351_s2 + $0x280] sm:$0xff]  ;;  %v2152_v12 = vld [vmem:[%s4352_s0 + $0x8] sm:$0xff]  ;;  %v2178_v16 = vld [vmem:[%s4351_s2 + $0x190] sm:$0xff] }
   0x6   :  { %171 = vmatpush.msra.mxu0 %v2117_v6  ;;  %223 = vmatpush.msra.mxu2 %v2129_v8  ;;  %v2158_v13 = vld [vmem:[%s4351_s2 + $0x300] sm:$0xff]  ;;  %v2183_v17 = vld [vmem:[%s4351_s2 + $0x2d8] sm:$0xff]  ;;  %v2196_v19 = vld [vmem:[%s4351_s2 + $0x168] sm:$0xff] }
   0x7   :  { %209 = vmatpush.msra.mxu3 %v2122_v7  ;;  %v2170_v15 = vld [vmem:[%s4351_s2 + $0x1c0] sm:$0xff]  ;;  %v2190_v18 = vld [vmem:[%s4351_s2 + $0x198] sm:$0xff]  ;;  %v2201_v20 = vld [vmem:[%s4351_s2 + $0x2b0] sm:$0xff] }
   0x8   :  { %172 = vmatpush.msra.mxu0 %v2135_v9  ;;  %224 = vmatpush.msra.mxu2 %v2147_v11  ;;  %v2207_v21 = vld [vmem:[%s4351_s2 + $0x170] sm:$0xff]  ;;  %v2214_v22 = vld [vmem:[%s4351_s2 + $0x140] sm:$0xff]  ;;  %v2219_v23 = vld [vmem:[%s4351_s2 + $0x288] sm:$0xff] }
   0x9   :  { %210 = vmatpush.msra.mxu3 %v2140_v10  ;;  %v2225_v24 = vld [vmem:[%s4351_s2 + $0x148] sm:$0xff]  ;;  %v2230_v25 = vld [vmem:[%s4352_s0 + $0x18] sm:$0xff]  ;;  %v2248_v28 = vld [vmem:[%s4351_s2 + $0x240] sm:$0xff] }
   0xa   :  { %1977 = vmatmul.msk.f32.vlgmr.msra.gmra.mxu3 %vm159_vm0, %v2152_v12  ;;  %173 = vmatpush.msra.mxu0 %v2163_v14  ;;  %v2236_v26 = vld [vmem:[%s4351_s2 + $0x268] sm:$0xff]  ;;  %v2242_v27 = vld [vmem:[%s4351_s2 + $0x118] sm:$0xff]  ;;  %v2254_v29 = vld [vmem:[%s4351_s2 + $0x120] sm:$0xff] }
   0xb   :  { %259 = vmatpush.msrb.mxu3 %v2158_v13  ;;  %225 = vmatpush.msra.mxu2 %v2170_v15  ;;  %v2260_v30 = vld [vmem:[%s4351_s2 + $0x308] sm:$0xff]  ;;  %v2268_v31 = vld [vmem:[%s4351_s2 + $0xf0] sm:$0xff]  ;;  %v2273_v32 = vld [vmem:[%s4351_s2 + $0x218] sm:$0xff] }
   0xc   :  { %174 = vmatpush.msra.mxu0 %v2178_v16  ;;  %273 = vmatpush.msra.mxu1 %v2236_v26  ;;  %v2279_v33 = vld [vmem:[%s4351_s2 + $0xf8] sm:$0xff]  ;;  %v2286_v34 = vld [vmem:[%s4351_s2 + $0xc8] sm:$0xff]  ;;  %v2292_v35 = vld [vmem:[%s4351_s2 + $0x1f0] sm:$0xff] }
   0xd   :  { %260 = vmatpush.msrb.mxu3 %v2183_v17  ;;  %226 = vmatpush.msra.mxu2 %v2190_v18  ;;  %v2297_v36 = vld [vmem:[%s4351_s2 + $0x2e0] sm:$0xff]  ;;  %v2303_v37 = vld [vmem:[%s4351_s2 + $0xd0] sm:$0xff]  ;;  %v2315_v39 = vld [vmem:[%s4351_s2 + $0x1c8] sm:$0xff] }
   0xe   :  { %175 = vmatpush.msra.mxu0 %v2196_v19  ;;  %274 = vmatpush.msra.mxu1 %v2248_v28  ;;  %4447 = vst [vmem:[#allocation3_spill] sm:$0xff] %v2303_v37  ;;  %v2310_v38 = vld [vmem:[%s4351_s2 + $0xa0] sm:$0xff]  ;;  %v2322_v40 = vld [vmem:[%s4351_s2 + $0xa8] sm:$0xff]  ;;  %v2333_v42 = vld [vmem:[%s4351_s2 + $0x2b8] sm:$0xff] }
   0xf   :  { %261 = vmatpush.msrb.mxu3 %v2201_v20  ;;  %227 = vmatpush.msra.mxu2 %v2207_v21  ;;  %4448 = vst [vmem:[#allocation4_spill] sm:$0xff] %v2322_v40  ;;  %v2327_v41 = vld [vmem:[%s4352_s0 + $0x28] sm:$0xf]  ;;  %v2339_v43 = vld [vmem:[%s4351_s2 + $0x78] sm:$0xff]  ;;  %v2344_v44 = vld [vmem:[%s4351_s2 + $0x1a0] sm:$0xff] }
  0x10   :  { %176 = vmatpush.msra.mxu0 %v2214_v22  ;;  %275 = vmatpush.msra.mxu1 %v2273_v32  ;;  %v2351_v45 = vld [vmem:[%s4351_s2 + $0x80] sm:$0xff]  ;;  %v2357_v46 = vld [vmem:[%s4351_s2 + $0x290] sm:$0xff]  ;;  %v2370_v48 = vld [vmem:[%s4351_s2 + $0x178] sm:$0xff] }
  0x11   :  { %262 = vmatpush.msrb.mxu3 %v2219_v23  ;;  %228 = vmatpush.msra.mxu2 %v2225_v24  ;;  %4449 = vst [vmem:[#allocation5_spill] sm:$0xff] %v2351_v45  ;;  %v2365_v47 = vld [vmem:[%s4351_s2 + $0x50] sm:$0xff]  ;;  %v2376_v49 = vld [vmem:[%s4351_s2 + $0x58] sm:$0xff]  ;;  %v2383_v50 = vld [vmem:[%s4351_s2 + $0x28] sm:$0xff] }
  0x12   :  { %1978 = vmatmul.msk.f32.gmra.mxu3 %vm159_vm0, %v2230_v25  ;;  %177 = vmatpush.msra.mxu0 %v2242_v27  ;;  %4450 = vst [vmem:[#allocation6_spill] sm:$0xff] %v2376_v49  ;;  %v2388_v51 = vld [vmem:[%s4351_s2 + $0x150] sm:$0xff]  ;;  %v2402_v53 = vld [vmem:[%s4351_s2] sm:$0xff]  ;;  %v2407_v54 = vld [vmem:[%s4351_s2 + $0x128] sm:$0xff] }
  0x13   :  { %229 = vmatpush.msra.mxu2 %v2254_v29  ;;  %311 = vmatpush.msra.mxu3 %v2260_v30  ;;  %v2395_v52 = vld [vmem:[%s4351_s2 + $0x30] sm:$0xff]  ;;  %v2413_v55 = vld [vmem:[%s4351_s2 + $0x8] sm:$0xff]  ;;  %v2418_v56 = vld [vmem:[%s4352_s0] sm:$0xff] }
  0x14   :  { %178 = vmatpush.msra.mxu0 %v2268_v31  ;;  %276 = vmatpush.msra.mxu1 %v2292_v35  ;;  %4451 = vst [vmem:[#allocation7_spill] sm:$0xff] %v2395_v52  ;;  %v2426_v57 = vld [vmem:[%s4351_s2 + $0x270] sm:$0xff]  ;;  %v2439_v59 = vld [vmem:[%s4351_s2 + $0x100] sm:$0xff]  ;;  %v2444_v60 = vld [vmem:[%s4351_s2 + $0x278] sm:$0xff] }
  0x15   :  { %230 = vmatpush.msra.mxu2 %v2279_v33  ;;  %312 = vmatpush.msra.mxu3 %v2297_v36  ;;  %4452 = vst [vmem:[#allocation8_spill] sm:$0xff] %v2413_v55  ;;  %v2431_v58 = vld [vmem:[%s4351_s2 + $0x310] sm:$0xff]  ;;  %v2452_v61 = vld [vmem:[%s4351_s2 + $0x248] sm:$0xff]  ;;  %v2464_v63 = vld [vmem:[%s4351_s2 + $0xd8] sm:$0xff] }
  0x16   :  { %179 = vmatpush.msra.mxu0 %v2286_v34  ;;  %277 = vmatpush.msra.mxu1 %v2315_v39  ;;  %4453 = vst [vmem:[#allocation9_spill] sm:$0xff] %v2431_v58  ;;  %v2457_v62 = vld [vmem:[%s4351_s2 + $0x2e8] sm:$0xff] }
  0x17   :  { %231 = vmatpush.msra.mxu2 %v2303_v37  ;;  %313 = vmatpush.msra.mxu3 %v2333_v42  ;;  %4454 = vst [vmem:[#allocation10_spill] sm:$0xff] %v2439_v59  ;;  %v2517_v37 = vld [vmem:[%s4351_s2 + $0x1d0] sm:$0xff] }
  0x18   :  { %180 = vmatpush.msra.mxu0 %v2310_v38  ;;  %278 = vmatpush.msra.mxu1 %v2344_v44  ;;  %4455 = vst [vmem:[#allocation11_spill] sm:$0xff] %v2457_v62 }
  0x19   :  { %232 = vmatpush.msra.mxu2 %v2322_v40  ;;  %314 = vmatpush.msra.mxu3 %v2357_v46  ;;  %4456 = vst [vmem:[#allocation12_spill] sm:$0xff] %v2464_v63  ;;  %v2498_v40 = vld [vmem:[%s4351_s2 + $0x1f8] sm:$0xff] }
  0x1a   :  { %1979 = vmatmul.msk.f32.gmra.mxu3 %vm159_vm0, %v2327_v41  ;;  %181 = vmatpush.msra.mxu0 %v2339_v43  ;;  %4460 = vst [vmem:[#allocation16_spill] sm:$0xff] %v2498_v40 }
  0x1b   :  { %233 = vmatpush.msra.mxu2 %v2351_v45  ;;  %279 = vmatpush.msra.mxu1 %v2370_v48  ;;  %v2493_v45 = vld [vmem:[%s4351_s2 + $0x228] sm:$0xff]  ;;  %4462 = vst [vmem:[#allocation18_spill] sm:$0xff] %v2517_v37 }
  0x1c   :  { %182 = vmatpush.msra.mxu0 %v2365_v47  ;;  %4459 = vst [vmem:[#allocation15_spill] sm:$0xff] %v2493_v45 }
  0x1d   :  { %234 = vmatpush.msra.mxu2 %v2376_v49  ;;  %280 = vmatpush.msra.mxu1 %v2388_v51  ;;  %v2479_v49 = vld [vmem:[%s4351_s2 + $0x2c0] sm:$0xff] }
  0x1e   :  { %183 = vmatpush.msra.mxu0 %v2383_v50  ;;  %4457 = vst [vmem:[#allocation13_spill] sm:$0xff] %v2479_v49 }
  0x1f   :  { %235 = vmatpush.msra.mxu2 %v2395_v52  ;;  %281 = vmatpush.msra.mxu1 %v2407_v54  ;;  %v2474_v52 = vld [vmem:[%s4351_s2 + $0x220] sm:$0xff] }
  0x20   :  { %184 = vmatpush.msra.mxu0 %v2402_v53 }
  0x21   :  { %236 = vmatpush.msra.mxu2 %v2413_v55  ;;  %185 = vmatmul.f32.vlgmr.msra.gmra.mxu0 %v2418_v56  ;;  %v2469_v55 = vld [vmem:[%s4351_s2 + $0x250] sm:$0xff] }
  0x22   :  { %237 = vmatmul.f32.vlgmr.msra.gmra.mxu2 %v2418_v56  ;;  %1980 = vmatmul.msk.f32.vlgmr.msrb.gmra.mxu3 %vm159_vm0, %v2152_v12 }
  0x23   :  { %325 = vmatpush.msrb.mxu0 %v2426_v57  ;;  %363 = vmatpush.msrb.mxu2 %v2431_v58  ;;  %v2488_v58 = vld [vmem:[%s4351_s2 + $0xb0] sm:$0xff] }
  0x24   :  { %282 = vmatpush.msra.mxu1 %v2439_v59  ;;  %377 = vmatpush.msrb.mxu3 %v2444_v60  ;;  %4458 = vst [vmem:[#allocation14_spill] sm:$0xff] %v2488_v58  ;;  %v2503_v59 = vld [vmem:[%s4351_s2 + $0x298] sm:$0xff] }
  0x25   :  { %326 = vmatpush.msrb.mxu0 %v2452_v61  ;;  %364 = vmatpush.msrb.mxu2 %v2457_v62  ;;  %4461 = vst [vmem:[#allocation17_spill] sm:$0xff] %v2503_v59  ;;  %v2511_v62 = vld [vmem:[%s4352_s0 + $0x10] sm:$0xff] }
  0x26   :  { %283 = vmatpush.msra.mxu1 %v2464_v63  ;;  %378 = vmatpush.msrb.mxu3 %v2469_v55  ;;  %v2526_v63 = vld [vmem:[%s4351_s2 + $0x88] sm:$0xff] }
  0x27   :  { %327 = vmatpush.msrb.mxu0 %v2474_v52  ;;  %365 = vmatpush.msrb.mxu2 %v2479_v49  ;;  %4463 = vst [vmem:[#allocation19_spill] sm:$0xff] %v2526_v63  ;;  %v2533_v49 = vld [vmem:[%s4351_s2 + $0x1a8] sm:$0xff] }
  0x28   :  { %284 = vmatpush.msra.mxu1 %v2488_v58  ;;  %379 = vmatpush.msrb.mxu3 %v2493_v45  ;;  %4464 = vst [vmem:[#allocation20_spill] sm:$0xff] %v2533_v49  ;;  %v2538_v58 = vld [vmem:[%s4351_s2 + $0x200] sm:$0xff]  ;;  %v2558_v45 = vld [vmem:[%s4351_s2 + $0x1d8] sm:$0xff] }
  0x29   :  { %328 = vmatpush.msrb.mxu0 %v2498_v40  ;;  %366 = vmatpush.msrb.mxu2 %v2503_v59  ;;  %v2546_v59 = vld [vmem:[%s4351_s2 + $0x60] sm:$0xff] }
  0x2a   :  { %188 = vmatmul.f32.gmra.mxu0 %v2511_v62  ;;  %240 = vmatmul.f32.gmra.mxu2 %v2511_v62  ;;  %4465 = vst [vmem:[#allocation21_spill] sm:$0xff] %v2546_v59  ;;  %v2551_v40 = vld [vmem:[%s4351_s2 + $0x180] sm:$0xff] }
  0x2b   :  { %1981 = vmatmul.msk.f32.gmra.mxu3 %vm159_vm0, %v2230_v25  ;;  %329 = vmatpush.msrb.mxu0 %v2517_v37  ;;  %4466 = vst [vmem:[#allocation22_spill] sm:$0xff] %v2551_v40  ;;  %v2565_v37 = vld [vmem:[%s4351_s2 + $0x38] sm:$0xff] }
  0x2c   :  { %460 = vmatpush.msra.mxu2 %v2084_v0  ;;  %285 = vmatpush.msra.mxu1 %v2526_v63  ;;  %4467 = vst [vmem:[#allocation23_spill] sm:$0xff] %v2565_v37  ;;  %v2570_v0 = vld [vmem:[%s4351_s2 + $0x158] sm:$0xff]  ;;  %v2583_v63 = vld [vmem:[%s4352_s0 + $0x20] sm:$0xf] }
  0x2d   :  { %330 = vmatpush.msrb.mxu0 %v2533_v49  ;;  %380 = vmatpush.msrb.mxu3 %v2538_v58  ;;  %4468 = vst [vmem:[#allocation24_spill] sm:$0xff] %v2570_v0  ;;  %v2577_v49 = vld [vmem:[%s4351_s2 + $0x1b0] sm:$0xff] }
  0x2e   :  { %461 = vmatpush.msra.mxu2 %v2101_v3  ;;  %286 = vmatpush.msra.mxu1 %v2546_v59  ;;  %v2589_v3 = vld [vmem:[%s4351_s2 + $0x130] sm:$0xff]  ;;  %v2605_v59 = vld [vmem:[%s4351_s2 + $0x108] sm:$0xff] }
  0x2f   :  { %331 = vmatpush.msrb.mxu0 %v2551_v40  ;;  %381 = vmatpush.msrb.mxu3 %v2558_v45  ;;  %4469 = vst [vmem:[#allocation25_spill] sm:$0xff] %v2589_v3  ;;  %v2597_v40 = vld [vmem:[%s4351_s2 + $0x10] sm:$0xff] }
  0x30   :  { %462 = vmatpush.msra.mxu2 %v2117_v6  ;;  %287 = vmatpush.msra.mxu1 %v2565_v37  ;;  %4470 = vst [vmem:[#allocation26_spill] sm:$0xff] %v2597_v40  ;;  %v2613_v6 = vld [vmem:[%s4351_s2 + $0x188] sm:$0xff]  ;;  %v2625_v37 = vld [vmem:[%s4351_s2 + $0x318] sm:$0xff] }
  0x31   :  { %332 = vmatpush.msrb.mxu0 %v2570_v0  ;;  %382 = vmatpush.msrb.mxu3 %v2577_v49  ;;  %4471 = vst [vmem:[#allocation27_spill] sm:$0xff] %v2605_v59  ;;  %v2618_v0 = vld [vmem:[%s4351_s2 + $0xe0] sm:$0xff] }
  0x32   :  { %191 = vmatmul.f32.gmra.mxu0 %v2583_v63  ;;  %243 = vmatmul.f32.gmra.mxu2 %v2583_v63  ;;  %4472 = vst [vmem:[#allocation28_spill] sm:$0xff] %v2618_v0 }
  0x33   :  { %1982 = vmatmul.msk.f32.gmra.mxu3 %vm159_vm0, %v2327_v41  ;;  %333 = vmatpush.msrb.mxu0 %v2589_v3  ;;  %4473 = vst [vmem:[#allocation29_spill] sm:$0xff] %v2625_v37  ;;  %v2632_v3 = vld [vmem:[%s4351_s2 + $0x160] sm:$0xff] }
  0x34   :  { %463 = vmatpush.msra.mxu2 %v2135_v9  ;;  %288 = vmatpush.msra.mxu1 %v2597_v40  ;;  %v2637_v9 = vld [vmem:[%s4351_s2 + $0xb8] sm:$0xff] }
  0x35   :  { %334 = vmatpush.msrb.mxu0 %v2605_v59  ;;  %289 = vmatmul.f32.vlgmr.msra.gmra.mxu1 %v2418_v56  ;;  %4474 = vst [vmem:[#allocation30_spill] sm:$0xff] %v2637_v9  ;;  %v2644_v59 = vld [vmem:[%s4351_s2 + $0x2f0] sm:$0xff]  ;;  %v2651_v40 = vld [vmem:[%s4351_s2 + $0x138] sm:$0xff] }
  0x36   :  { %464 = vmatpush.msra.mxu2 %v2163_v14  ;;  %383 = vmatpush.msrb.mxu3 %v2613_v6  ;;  %4475 = vst [vmem:[#allocation31_spill] sm:$0xff] %v2644_v59  ;;  %v2656_v14 = vld [vmem:[%s4351_s2 + $0x90] sm:$0xff] }
  0x37   :  { %335 = vmatpush.msrb.mxu0 %v2618_v0  ;;  %415 = vmatpush.msrb.mxu1 %v2625_v37  ;;  %4476 = vst [vmem:[#allocation32_spill] sm:$0xff] %v2656_v14  ;;  %v2664_v0 = vld [vmem:[%s4351_s2 + $0x110] sm:$0xff]  ;;  %v2672_v37 = vld [vmem:[%s4351_s2 + $0x68] sm:$0xff] }
  0x38   :  { %465 = vmatpush.msra.mxu2 %v2178_v16  ;;  %384 = vmatpush.msrb.mxu3 %v2632_v3  ;;  %4477 = vst [vmem:[#allocation33_spill] sm:$0xff] %v2672_v37  ;;  %v2681_v16 = vld [vmem:[%s4351_s2 + $0xe8] sm:$0xff] }
  0x39   :  { %336 = vmatpush.msrb.mxu0 %v2637_v9  ;;  %416 = vmatpush.msrb.mxu1 %v2644_v59  ;;  %v2686_v9 = vld [vmem:[%s4351_s2 + $0x40] sm:$0xff]  ;;  %v2693_v59 = vld [vmem:[%s4351_s2 + $0x2c8] sm:$0xff] }
  0x3a   :  { %1986 = vmatmul.msk.f32.vlgmr.msrb.gmra.mxu2 %vm159_vm0, %v2152_v12  ;;  %385 = vmatpush.msrb.mxu3 %v2651_v40 }
  0x3b   :  { %1983 = vmatmul.msk.f32.vlgmr.msra.gmra.mxu3 %vm159_vm0, %v2152_v12  ;;  %337 = vmatpush.msrb.mxu0 %v2656_v14  ;;  %v2700_v14 = vld [vmem:[%s4351_s2 + $0xc0] sm:$0xff] }
  0x3c   :  { %466 = vmatpush.msra.mxu2 %v2196_v19  ;;  %386 = vmatpush.msrb.mxu3 %v2664_v0  ;;  %v2705_v19 = vld [vmem:[%s4351_s2 + $0x18] sm:$0xff] }
  0x3d   :  { %338 = vmatpush.msrb.mxu0 %v2672_v37  ;;  %292 = vmatmul.f32.gmra.mxu1 %v2511_v62  ;;  %4478 = vst [vmem:[#allocation34_spill] sm:$0xff] %v2705_v19  ;;  %v2712_v37 = vld [vmem:[%s4351_s2 + $0x2a0] sm:$0xff] }
  0x3e   :  { %467 = vmatpush.msra.mxu2 %v2214_v22  ;;  %387 = vmatpush.msrb.mxu3 %v2681_v16  ;;  %v2722_v22 = vld [vmem:[%s4351_s2 + $0x98] sm:$0xff] }
  0x3f   :  { %339 = vmatpush.msrb.mxu0 %v2686_v9  ;;  %417 = vmatpush.msrb.mxu1 %v2693_v59 }
  0x40   :  { %468 = vmatpush.msra.mxu2 %v2242_v27  ;;  %388 = vmatpush.msrb.mxu3 %v2700_v14  ;;  %v2734_v27 = vld [vmem:[%s4351_s2 + $0x70] sm:$0xff] }
  0x41   :  { %340 = vmatpush.msrb.mxu0 %v2705_v19  ;;  %418 = vmatpush.msrb.mxu1 %v2712_v37  ;;  %v2743_v19 = vld [vmem:[%s4351_s2 + $0x48] sm:$0xff] }
  0x42   :  { %341 = vmatmul.f32.vlgmr.msrb.gmra.mxu0 %v2418_v56  ;;  %1987 = vmatmul.msk.f32.gmra.mxu2 %vm159_vm0, %v2230_v25 }
  0x43   :  { %1984 = vmatmul.msk.f32.gmra.mxu3 %vm159_vm0, %v2230_v25  ;;  %498 = vmatpush.msra.mxu0 %v2089_v1  ;;  %v2754_v1 = vld [vmem:[%s4351_s2 + $0x20] sm:$0xff] }
  0x44   :  { %469 = vmatpush.msra.mxu2 %v2268_v31  ;;  %389 = vmatpush.msrb.mxu3 %v2722_v22  ;;  %v4494_v31 = vld [vmem:[#allocation22_spill] sm:$0xff] }
  0x45   :  { %499 = vmatpush.msra.mxu0 %v2106_v4  ;;  %295 = vmatmul.f32.gmra.mxu1 %v2583_v63  ;;  %v2795_v4 = vld [vmem:[%s4352_s0 + $0x38] sm:$0xff] }
  0x46   :  { %470 = vmatpush.msra.mxu2 %v2286_v34  ;;  %390 = vmatpush.msrb.mxu3 %v2734_v27  ;;  %v4497_v34 = vld [vmem:[#allocation26_spill] sm:$0xff] }
  0x47   :  { %500 = vmatpush.msra.mxu0 %v2122_v7  ;;  %512 = vmatpush.msra.mxu1 %v2094_v2  ;;  %v2774_v2 = vld [vmem:[%s4352_s0 + $0x30] sm:$0xff]  ;;  %v2823_v7 = vld [vmem:[%s4352_s0 + $0x48] sm:$0xff] }
  0x48   :  { %471 = vmatpush.msra.mxu2 %v2310_v38  ;;  %391 = vmatpush.msrb.mxu3 %v2743_v19  ;;  %v4500_v38 = vld [vmem:[#allocation29_spill] sm:$0xff] }
  0x49   :  { %501 = vmatpush.msra.mxu0 %v2140_v10  ;;  %513 = vmatpush.msra.mxu1 %v2111_v5  ;;  %v2800_v5 = vld [vmem:[%s4352_s0 + $0x40] sm:$0xff]  ;;  %v4479_v10 = vld [vmem:[#allocation3_spill] sm:$0xff] }
  0x4a   :  { %344 = vmatmul.f32.gmra.mxu0 %v2511_v62  ;;  %1988 = vmatmul.msk.f32.gmra.mxu2 %vm159_vm0, %v2327_v41 }
  0x4b   :  { %1985 = vmatmul.msk.f32.gmra.mxu3 %vm159_vm0, %v2327_v41  ;;  %472 = vmatpush.msra.mxu2 %v2339_v43  ;;  %v4504_v43 = vld [vmem:[#allocation31_spill] sm:$0xff] }
  0x4c   :  { %392 = vmatpush.msrb.mxu3 %v2754_v1  ;;  %564 = vmatpush.msrb.mxu0 %v2236_v26  ;;  %v4490_v26 = vld [vmem:[#allocation20_spill] sm:$0xff] }
  0x4d   :  { %473 = vmatpush.msra.mxu2 %v2365_v47  ;;  %514 = vmatpush.msra.mxu1 %v2129_v8  ;;  %v2829_v8 = vld [vmem:[%s4352_s0 + $0x50] sm:$0xf]  ;;  %v4509_v47 = vld [vmem:[#allocation33_spill] sm:$0xff] }
  0x4e   :  { %550 = vmatpush.msra.mxu3 %v2158_v13  ;;  %565 = vmatpush.msrb.mxu0 %v2248_v28  ;;  %v4482_v13 = vld [vmem:[#allocation15_spill] sm:$0xff] }
  0x4f   :  { %474 = vmatpush.msra.mxu2 %v2383_v50  ;;  %1989 = vmatmul.msk.f32.vlgmr.msrb.gmra.mxu1 %vm159_vm0, %v2152_v12  ;;  %v4481_v12 = vld [vmem:[#allocation4_spill] sm:$0xff]  ;;  %v4491_v28 = vld [vmem:[#allocation7_spill] sm:$0xff]  ;;  %v2932_v50 = vld [vmem:[%s4354_s3] sm:$0x1f] }
  0x50   :  { %515 = vmatpush.msra.mxu1 %v2147_v11  ;;  %566 = vmatpush.msrb.mxu0 %v2273_v32  ;;  %v4480_v11 = vld [vmem:[#allocation10_spill] sm:$0xff]  ;;  %v4495_v32 = vld [vmem:[#allocation23_spill] sm:$0xff] }
  0x51   :  { %475 = vmatpush.msra.mxu2 %v2402_v53  ;;  %551 = vmatpush.msra.mxu3 %v2183_v17  ;;  %v4484_v17 = vld [vmem:[#allocation16_spill] sm:$0xff] }
  0x52   :  { %347 = vmatmul.f32.gmra.mxu0 %v2583_v63  ;;  %476 = vmatmul.f32.vlgmr.msra.gmra.mxu2 %v2774_v2 }
  0x53   :  { %393 = vmatmul.f32.vlgmr.msrb.gmra.mxu3 %v2418_v56  ;;  %602 = vmatpush.msrb.mxu2 %v2260_v30  ;;  %v4493_v30 = vld [vmem:[#allocation8_spill] sm:$0xff]  ;;  %v2943_v56 = vperm.slane %v2932_v50, 1 }
  0x54   :  { %516 = vmatpush.msra.mxu1 %v2170_v15  ;;  %567 = vmatpush.msrb.mxu0 %v2292_v35  ;;  %v4483_v15 = vld [vmem:[#allocation12_spill] sm:$0xff]  ;;  %v4498_v35 = vld [vmem:[#allocation9_spill] sm:$0xff] }
  0x55   :  { %603 = vmatpush.msrb.mxu2 %v2297_v36  ;;  %552 = vmatpush.msra.mxu3 %v2201_v20  ;;  %v4486_v20 = vld [vmem:[#allocation14_spill] sm:$0xff]  ;;  %v4499_v36 = vld [vmem:[#allocation25_spill] sm:$0xff]  ;;  %4511 = vst [vmem:[#allocation3_spill] sm:$0xff] %v2943_v56 }
  0x56   :  { %517 = vmatpush.msra.mxu1 %v2190_v18  ;;  %568 = vmatpush.msrb.mxu0 %v2315_v39  ;;  %v4485_v18 = vld [vmem:[#allocation5_spill] sm:$0xff]  ;;  %v4501_v39 = vld [vmem:[#allocation27_spill] sm:$0xff] }
  0x57   :  { %1990 = vmatmul.msk.f32.gmra.mxu1 %vm159_vm0, %v2230_v25  ;;  %604 = vmatpush.msrb.mxu2 %v2333_v42  ;;  %v4489_v25 = vld [vmem:[#allocation19_spill] sm:$0xff]  ;;  %v4503_v42 = vld [vmem:[#allocation28_spill] sm:$0xff] }
  0x58   :  { %518 = vmatpush.msra.mxu1 %v2207_v21  ;;  %569 = vmatpush.msrb.mxu0 %v2344_v44  ;;  %v2852_v21 = vld [vmem:[%s4352_s0 + $0x58] sm:$0xf]  ;;  %v4505_v44 = vld [vmem:[#allocation30_spill] sm:$0xff] }
  0x59   :  { %553 = vmatpush.msra.mxu3 %v2219_v23  ;;  %605 = vmatpush.msrb.mxu2 %v2357_v46  ;;  %v4487_v23 = vld [vmem:[#allocation18_spill] sm:$0xff]  ;;  %v4508_v46 = vld [vmem:[#allocation17_spill] sm:$0xff] }
  0x5a   :  { %1998 = vmatmul.msk.f32.vlgmr.msra.gmra.mxu0 %vm159_vm0, %v2795_v4  ;;  %479 = vmatmul.f32.gmra.mxu2 %v2800_v5 }
  0x5b   :  { %396 = vmatmul.f32.gmra.mxu3 %v2511_v62  ;;  %519 = vmatpush.msra.mxu1 %v2225_v24  ;;  %v4488_v24 = vld [vmem:[#allocation6_spill] sm:$0xff] }
  0x5c   :  { %570 = vmatpush.msrb.mxu0 %v2370_v48  ;;  %616 = vmatpush.msrb.mxu3 %v2426_v57  ;;  %v4510_v48 = vld [vmem:[#allocation34_spill] sm:$0xff] }
  0x5d   :  { %520 = vmatpush.msra.mxu1 %v2254_v29  ;;  %668 = vmatpush.msra.mxu2 %v2444_v60  ;;  %v4492_v29 = vld [vmem:[#allocation21_spill] sm:$0xff] }
  0x5e   :  { %571 = vmatpush.msrb.mxu0 %v2388_v51  ;;  %617 = vmatpush.msrb.mxu3 %v2452_v61  ;;  %v2937_v51 = vperm.slane %v2932_v50, 0 }
  0x5f   :  { %521 = vmatpush.msra.mxu1 %v2279_v33  ;;  %669 = vmatpush.msra.mxu2 %v2469_v55  ;;  %v4496_v33 = vld [vmem:[#allocation24_spill] sm:$0xff] }
  0x60   :  { %572 = vmatpush.msrb.mxu0 %v2407_v54  ;;  %1991 = vmatmul.msk.f32.gmra.mxu1 %vm159_vm0, %v2327_v41  ;;  %v4502_v41 = vld [vmem:[#allocation11_spill] sm:$0xff] }
  0x61   :  { %522 = vmatpush.msra.mxu1 %v4479_v10  ;;  %618 = vmatpush.msrb.mxu3 %v2474_v52  ;;  %v2966_v10 = vld [vmem:[%s4355_s4 + $0x10] sm:$0x1f] }
  0x62   :  { %1999 = vmatmul.msk.f32.gmra.mxu0 %vm159_vm0, %v2823_v7  ;;  %482 = vmatmul.f32.gmra.mxu2 %v2829_v8 }
  0x63   :  { %399 = vmatmul.f32.gmra.mxu3 %v2583_v63  ;;  %573 = vmatpush.msrb.mxu0 %v4480_v11 }
  0x64   :  { %523 = vmatpush.msra.mxu1 %v4481_v12  ;;  %670 = vmatpush.msra.mxu2 %v4482_v13  ;;  %v2972_v12 = vld [vmem:[%s4355_s4] sm:$0x1f]  ;;  %v2975_v13 = vperm.slane %v2932_v50, 3 }
  0x65   :  { %574 = vmatpush.msrb.mxu0 %v4483_v15  ;;  %619 = vmatpush.msrb.mxu3 %v4484_v17  ;;  %v2980_v15 = vld [vmem:[%s4355_s4 + $0x18] sm:$0x1f] }
  0x66   :  { %524 = vmatpush.msra.mxu1 %v4485_v18  ;;  %671 = vmatpush.msra.mxu2 %v2538_v58  ;;  %4513 = vst [vmem:[#allocation4_spill] sm:$0xff] %v2975_v13  ;;  %v2985_v18 = vld [vmem:[%s4355_s4 + $0x20] sm:$0x1f] }
  0x67   :  { %575 = vmatpush.msrb.mxu0 %v4486_v20  ;;  %620 = vmatpush.msrb.mxu3 %v4487_v23  ;;  %v2994_v23 = vperm.slane %v2972_v12, 1 }
  0x68   :  { %525 = vmatpush.msra.mxu1 %v4488_v24  ;;  %672 = vmatpush.msra.mxu2 %v2558_v45  ;;  %v4506_v45 = vld [vmem:[#allocation13_spill] sm:$0xff] }
  0x69   :  { %576 = vmatpush.msrb.mxu0 %v4489_v25  ;;  %621 = vmatpush.msrb.mxu3 %v4490_v26  ;;  %4515 = vst [vmem:[#allocation12_spill] sm:$0xff] %v2994_v23  ;;  %v2997_v25 = vperm.slane %v2972_v12, 0 }
  0x6a   :  { %2000 = vmatmul.msk.f32.gmra.mxu0 %vm159_vm0, %v2852_v21  ;;  %2004 = vmatmul.msk.f32.vlgmr.msrb.gmra.mxu2 %vm159_vm0, %v2795_v4 }
  0x6b   :  { %2001 = vmatmul.msk.f32.vlgmr.msra.gmra.mxu3 %vm159_vm0, %v2795_v4  ;;  %526 = vmatpush.msra.mxu1 %v4491_v28  ;;  %4516 = vst [vmem:[#allocation16_spill] sm:$0xff] %v2997_v25 }
  0x6c   :  { %577 = vmatpush.msrb.mxu0 %v4492_v29  ;;  %673 = vmatpush.msra.mxu2 %v2577_v49 }
  0x6d   :  { %527 = vmatpush.msra.mxu1 %v4493_v30  ;;  %622 = vmatpush.msrb.mxu3 %v4494_v31  ;;  %v3002_v31 = vperm.slane %v2980_v15, 0 }
  0x6e   :  { %528 = vmatmul.f32.vlgmr.msra.gmra.mxu1 %v2774_v2  ;;  %578 = vmatpush.msrb.mxu0 %v4495_v32 }
  0x6f   :  { %674 = vmatpush.msra.mxu2 %v2613_v6  ;;  %623 = vmatpush.msrb.mxu3 %v4496_v33  ;;  %v3008_v33 = vperm.slane %v2966_v10, 1 }
  0x70   :  { %579 = vmatpush.msrb.mxu0 %v4497_v34  ;;  %654 = vmatpush.msrb.mxu1 %v4498_v35 }
  0x71   :  { %675 = vmatpush.msra.mxu2 %v2632_v3  ;;  %624 = vmatpush.msrb.mxu3 %v4499_v36  ;;  %4518 = vst [vmem:[#allocation14_spill] sm:$0xff] %v3008_v33  ;;  %v3012_v36 = vperm.slane %v2985_v18, 0 }
  0x72   :  { %580 = vmatmul.f32.vlgmr.msrb.gmra.mxu0 %v2774_v2  ;;  %2005 = vmatmul.msk.f32.gmra.mxu2 %vm159_vm0, %v2823_v7 }
  0x73   :  { %2002 = vmatmul.msk.f32.gmra.mxu3 %vm159_vm0, %v2823_v7  ;;  %676 = vmatpush.msra.mxu2 %v2651_v40  ;;  %v4507_v40 = vld [vmem:[#allocation32_spill] sm:$0xff]  ;;  %4519 = vst [vmem:[#allocation18_spill] sm:$0xff] %v3012_v36 }
  0x74   :  { %706 = vmatpush.msra.mxu0 %v4500_v38  ;;  %625 = vmatpush.msrb.mxu3 %v4501_v39  ;;  %v3016_v38 = vperm.slane %v2972_v12, 2  ;;  %v3019_v39 = vperm.slane %v2980_v15, 1 }
  0x75   :  { %677 = vmatpush.msra.mxu2 %v2664_v0  ;;  %655 = vmatpush.msrb.mxu1 %v4502_v41  ;;  %v3022_v41 = vperm.slane %v2985_v18, 1 }
  0x76   :  { %531 = vmatmul.f32.gmra.mxu1 %v2800_v5  ;;  %626 = vmatpush.msrb.mxu3 %v4503_v42  ;;  %4520 = vst [vmem:[#allocation6_spill] sm:$0xff] %v3019_v39 }
  0x77   :  { %678 = vmatpush.msra.mxu2 %v2681_v16  ;;  %707 = vmatpush.msra.mxu0 %v4504_v43  ;;  %4521 = vst [vmem:[#allocation19_spill] sm:$0xff] %v3022_v41 }
  0x78   :  { %627 = vmatpush.msrb.mxu3 %v4505_v44  ;;  %656 = vmatpush.msrb.mxu1 %v4506_v45 }
  0x79   :  { %679 = vmatpush.msra.mxu2 %v2700_v14  ;;  %708 = vmatpush.msra.mxu0 %v2693_v59 }
  0x7a   :  { %583 = vmatmul.f32.gmra.mxu0 %v2800_v5  ;;  %2006 = vmatmul.msk.f32.gmra.mxu2 %vm159_vm0, %v2852_v21 }
  0x7b   :  { %2003 = vmatmul.msk.f32.gmra.mxu3 %vm159_vm0, %v2852_v21  ;;  %680 = vmatpush.msra.mxu2 %v2722_v22 }
  0x7c   :  { %628 = vmatpush.msrb.mxu3 %v4507_v40  ;;  %657 = vmatpush.msrb.mxu1 %v4508_v46 }
  0x7d   :  { %681 = vmatpush.msra.mxu2 %v2734_v27  ;;  %709 = vmatpush.msra.mxu0 %v2712_v37 }
  0x7e   :  { %629 = vmatpush.msrb.mxu3 %v4509_v47  ;;  %534 = vmatmul.f32.gmra.mxu1 %v2829_v8 }
  0x7f   :  { %682 = vmatpush.msra.mxu2 %v2743_v19 }
  0x80   :  { %630 = vmatpush.msrb.mxu3 %v2686_v9 }
  0x81   :  { %683 = vmatpush.msra.mxu2 %v2754_v1 }
  0x82   :  { %586 = vmatmul.f32.gmra.mxu0 %v2829_v8  ;;  %631 = vmatpush.msrb.mxu3 %v4510_v48 }
  0x83   :  { %632 = vmatmul.f32.vlgmr.msrb.gmra.mxu3 %v2774_v2  ;;  %684 = vmatmul.f32.vlgmr.msra.gmra.mxu2 %v2774_v2 }
  0x86   :  { %2007 = vmatmul.msk.f32.vlgmr.msrb.gmra.mxu1 %vm159_vm0, %v2795_v4 }
  0x8a   :  { %2010 = vmatmul.msk.f32.vlgmr.msra.gmra.mxu0 %vm159_vm0, %v2795_v4  ;;  %v2956_v4 = vperm.slane %v2932_v50, 2 }
  0x8b   :  { %635 = vmatmul.f32.gmra.mxu3 %v2800_v5  ;;  %687 = vmatmul.f32.gmra.mxu2 %v2800_v5 }
  0x8c   :  { %4512 = vst [vmem:[#allocation10_spill] sm:$0xff] %v2956_v4 }
  0x8d   :  { %v212_v37 = vpop.f32.mrf.mxu3 }
  0x8e   :  { %2008 = vmatmul.msk.f32.gmra.mxu1 %vm159_vm0, %v2823_v7 }
  0x92   :  { %2011 = vmatmul.msk.f32.gmra.mxu0 %vm159_vm0, %v2823_v7 }
  0x93   :  { %638 = vmatmul.f32.gmra.mxu3 %v2829_v8  ;;  %690 = vmatmul.f32.gmra.mxu2 %v2829_v8  ;;  %v2961_v8 = vld [vmem:[%s4355_s4 + $0x8] sm:$0x1f] }
  0x94   :  { %v2988_v20 = vperm.slane %v2961_v8, 0  ;;  %v3005_v32 = vperm.slane %v2961_v8, 1 }
  0x95   :  { %v215_v49 = vpop.f32.mrf.mxu3 }
  0x96   :  { %2009 = vmatmul.msk.f32.gmra.mxu1 %vm159_vm0, %v2852_v21  ;;  %4514 = vst [vmem:[#allocation15_spill] sm:$0xff] %v2988_v20 }
  0x97   :  { %4517 = vst [vmem:[#allocation5_spill] sm:$0xff] %v3005_v32 }
  0x9a   :  { %2012 = vmatmul.msk.f32.gmra.mxu0 %vm159_vm0, %v2852_v21  ;;  %v2991_v21 = vperm.slane %v2966_v10, 0 }
  0x9d   :  { %v218_v52 = vpop.f32.mrf.mxu3 }
  0x9e   :  { %v186_v53 = vpop.f32.mrf.mxu0 }
  0x9f   :  { %v187_v54 = vadd.f32 %v186_v53, %v2937_v51  ;;  %v3046_v53 = vperm.slane %v2972_v12, 3 }
  0xa1   :  { %v2940_v55 = vadd.f32 %v212_v37, %v187_v54  ;;  %4523 = vst [vmem:[#allocation7_spill] sm:$0xff] %v3046_v53 }
  0xa3   :  { %429 = vst [vmem:[#allocation2 + $0xb0] sm:$0xff] %v2940_v55 }
  0xa5   :  { %v238_v57 = vpop.f32.mrf.mxu2  ;;  %v264_v58 = vpop.f32.mrf.mxu3 }
  0xa6   :  { %v239_v59 = vadd.f32 %v238_v57, %v2943_v56 }
  0xa7   :  { %v189_v60 = vpop.f32.mrf.mxu0 }
  0xa8   :  { %v265_v61 = vadd.f32 %v264_v58, %v239_v59  ;;  %v190_v62 = vadd.f32 %v189_v60, %v2937_v51  ;;  %v3053_v58 = vperm.slane %v2966_v10, 2  ;;  %v3056_v59 = vperm.slane %v2961_v8, 3 }
  0xaa   :  { %430 = vst [vmem:[#allocation2] sm:$0xff] %v265_v61  ;;  %v2948_v63 = vadd.f32 %v215_v49, %v190_v62  ;;  %v776_v26 = vld [vmem:[#allocation2 + $0xb0] sm:$0xfe]  ;;  %v757_v44 = vmul.f32 %v2994_v23, %v265_v61  ;;  %v752_v49 = vmul.f32 %v2997_v25, %v2940_v55  ;;  %v3059_v55 = vperm.slane %v2966_v10, 3 }
  0xab   :  { %v867_v28 = vld [vmem:[#allocation2 + $0xb0] sm:$0xfc]  ;;  %v787_v42 = vmul.f32 %v2988_v20, %v776_v26  ;;  %4524 = vst [vmem:[#allocation21_spill] sm:$0xff] %v3053_v58  ;;  %v3062_v61 = vperm.slane %v2980_v15, 2 }
  0xac   :  { %v958_v35 = vld [vmem:[#allocation2 + $0xb0] sm:$0xf8]  ;;  %v878_v43 = vmul.f32 %v2991_v21, %v867_v28  ;;  %v3032_v47 = vmul.f32 %v2988_v20, %v2948_v63  ;;  %v3036_v48 = vmul.f32 %v2991_v21, %v2948_v63  ;;  %v3050_v54 = vmul.f32 %v3002_v31, %v2948_v63  ;;  %4525 = vst [vmem:[#allocation8_spill] sm:$0xff] %v3056_v59 }
  0xad   :  { %v241_v0 = vpop.f32.mrf.mxu2  ;;  %v969_v37 = vmul.f32 %v3002_v31, %v958_v35  ;;  %4526 = vst [vmem:[#allocation22_spill] sm:$0xff] %v3062_v61  ;;  %v794_v62 = vrot.slane %v787_v42, 1  ;;  %v753_v28 = vmul.f32 %v2997_v25, %v2948_v63  ;;  %v3138_v25 = vperm.slane %v2932_v50, 4 }
  0xae   :  { %v242_v3 = vadd.f32 %v241_v0, %v2943_v56  ;;  %v267_v6 = vpop.f32.mrf.mxu3  ;;  %v885_v0 = vrot.slane %v878_v43, 2  ;;  %v1537_v43 = vld [vmem:[%s4356_s6 + $0x78] sm:$0xff] }
  0xaf   :  { %v192_v9 = vpop.f32.mrf.mxu0  ;;  %1542 = vmatpush.msra.mxu1 %v1537_v43  ;;  %4529 = vst [vmem:[#allocation26_spill] sm:$0xff] %v3138_v25 }
  0xb0   :  { %v2951_v14 = vadd.f32 %v267_v6, %v242_v3  ;;  %v193_v16 = vadd.f32 %v192_v9, %v2937_v51  ;;  %v3064_v3 = vadd.f32 %v757_v44, %v752_v49 }
  0xb1   :  { %v777_v57 = vld [vmem:[#allocation2] sm:$0xfe] }
  0xb2   :  { %v219_v19 = vadd.f32 %v218_v52, %v193_v16  ;;  %v290_v22 = vpop.f32.mrf.mxu1  ;;  %v3042_v52 = vperm.slane %v2961_v8, 2  ;;  %v868_v6 = vld [vmem:[#allocation2] sm:$0xfc]  ;;  %v1049_v16 = vld [vmem:[#allocation2 + $0xb0] sm:$0xf0]  ;;  %v758_v44 = vmul.f32 %v2994_v23, %v2951_v14  ;;  %v3135_v23 = vmul.f32 %v3022_v41, %v2951_v14 }
  0xb3   :  { %v291_v11 = vadd.f32 %v290_v22, %v2956_v4  ;;  %v3078_v26 = vmul.f32 %v3008_v33, %v868_v6  ;;  %v1050_v49 = vld [vmem:[#allocation2] sm:$0xf0]  ;;  %v3108_v6 = vmul.f32 %v3019_v39, %v2951_v14 }
  0xb4   :  { %439 = vst [vmem:[#allocation2 + $0xe8] sm:$0xf] %v219_v19 }
  0xb5   :  { %v244_v27 = vpop.f32.mrf.mxu2  ;;  %4522 = vst [vmem:[#allocation20_spill] sm:$0xff] %v3042_v52 }
  0xb6   :  { %v245_v1 = vadd.f32 %v244_v27, %v2943_v56  ;;  %v270_v2 = vpop.f32.mrf.mxu3  ;;  %v4396_v27 = vrot.slane %v3032_v47, 1 }
  0xb8   :  { %v271_v5 = vadd.f32 %v270_v2, %v245_v1  ;;  %v4399_v1 = vrot.slane %v3036_v48, 2  ;;  %v959_v2 = vld [vmem:[#allocation2] sm:$0xf8] }
  0xba   :  { %440 = vst [vmem:[#allocation2 + $0xb8] sm:$0xf] %v271_v5  ;;  %v293_v7 = vpop.f32.mrf.mxu1  ;;  %v976_v5 = vrot.slane %v969_v37, 3  ;;  %v986_v37 = vmul.f32 %v3019_v39, %v959_v2  ;;  %v1077_v2 = vmul.f32 %v3022_v41, %v1050_v49 }
  0xbb   :  { %v294_v40 = vadd.f32 %v293_v7, %v2956_v4  ;;  %v804_v7 = vmul.f32 %v3005_v32, %v777_v57  ;;  %v781_v35 = vld [vmem:[#allocation2 + $0xe8] sm:$0x1] }
  0xbd   :  { %v368_v17 = vpop.f32.mrf.mxu2 }
  0xbe   :  { %v316_v24 = vpop.f32.mrf.mxu3 }
  0xbf   :  { %v2999_v29 = vadd.f32 %v316_v24, %v291_v11  ;;  %v342_v30 = vpop.f32.mrf.mxu0  ;;  %v4402_v24 = vrot.slane %v3050_v54, 3 }
  0xc0   :  { %v343_v34 = vadd.f32 %v342_v30, %v2975_v13  ;;  %v3083_v30 = vperm.slane %v2980_v15, 3 }
  0xc1   :  { %431 = vst [vmem:[#allocation2 + $0xd8] sm:$0xff] %v2999_v29  ;;  %v873_v56 = vld [vmem:[#allocation2 + $0xb8] sm:$0x3] }
  0xc2   :  { %v3027_v45 = vadd.f32 %v368_v17, %v343_v34  ;;  %v296_v46 = vpop.f32.mrf.mxu1  ;;  %v3074_v17 = vmul.f32 %v3005_v32, %v2951_v14  ;;  %v3086_v34 = vmul.f32 %v3012_v36, %v1049_v16  ;;  %v810_v16 = vrot.slane %v804_v7, 1 }
  0xc3   :  { %v297_v57 = vadd.f32 %v296_v46, %v2956_v4  ;;  %v1536_v46 = vld [vmem:[%s4356_s6 + $0x70] sm:$0xff]  ;;  %v789_v7 = vmul.f32 %v2988_v20, %v781_v35  ;;  %v782_v20 = vld [vmem:[#allocation2 + $0xb8] sm:$0x1] }
  0xc4   :  { %432 = vst [vmem:[#allocation2 + $0x18] sm:$0xff] %v3027_v45  ;;  %1543 = vmatpush.msra.mxu1 %v1536_v46  ;;  %v992_v46 = vrot.slane %v986_v37, 3  ;;  %v1067_v50 = vrot.slane %v3086_v34, 4  ;;  %v1083_v34 = vrot.slane %v1077_v2, 4  ;;  %v806_v35 = vmul.f32 %v3005_v32, %v782_v20 }
  0xc5   :  { %v371_v60 = vpop.f32.mrf.mxu2 }
  0xc6   :  { %v319_v9 = vpop.f32.mrf.mxu3 }
  0xc7   :  { %v3066_v19 = vadd.f32 %v319_v9, %v294_v40  ;;  %v345_v22 = vpop.f32.mrf.mxu0  ;;  %v3097_v40 = vmul.f32 %v3008_v33, %v2951_v14  ;;  %v3112_v9 = vmul.f32 %v3012_v36, %v2948_v63  ;;  %v901_v63 = vrot.slane %v3078_v26, 2 }
  0xc8   :  { %v346_v11 = vadd.f32 %v345_v22, %v2975_v13  ;;  %v872_v22 = vld [vmem:[#allocation2 + $0xe8] sm:$0x3]  ;;  %v3143_v26 = vadd.f32 %v758_v44, %v753_v28  ;;  %v1534_v28 = vld [vmem:[%s4356_s6 + $0x60] sm:$0xff]  ;;  %v4530_v44 = vrot.slane %v3074_v17, 1 }
  0xc9   :  { %v880_v49 = vmul.f32 %v2991_v21, %v872_v22 }
  0xca   :  { %v3088_v42 = vadd.f32 %v371_v60, %v346_v11  ;;  %v3104_v60 = vsel %vm793_vm1, %v794_v62, %v4396_v27  ;;  %v3121_v62 = vsel %vm884_vm2, %v885_v0, %v4399_v1  ;;  %v3126_v11 = vsel %vm975_vm3, %v976_v5, %v4402_v24  ;;  %v963_v0 = vld [vmem:[#allocation2 + $0xe8] sm:$0x7] }
  0xcb   :  { %4527 = vst [vmem:[#allocation23_spill] sm:$0xff] %v3121_v62  ;;  %v1535_v5 = vld [vmem:[%s4356_s6 + $0x68] sm:$0xff]  ;;  %v3156_v37 = vsel %vm793_vm1, %v810_v16, %v4530_v44  ;;  %v971_v22 = vmul.f32 %v3002_v31, %v963_v0  ;;  %v4531_v0 = vrot.slane %v3097_v40, 2  ;;  %v888_v2 = vrot.slane %v880_v49, 2 }
  0xcc   :  { %4528 = vst [vmem:[#allocation24_spill] sm:$0xff] %v3126_v11  ;;  %v3130_v27 = vpop.f32.mrf.mxu1  ;;  %v1054_v24 = vld [vmem:[#allocation2 + $0xe8] sm:$0xf]  ;;  %1544 = vmatpush.msra.mxu1 %v1535_v5  ;;  %v797_v5 = vrot.slane %v789_v7, 1 }
  0xcd   :  { %v374_v43 = vpop.f32.mrf.mxu2  ;;  %v1062_v4 = vmul.f32 %v3012_v36, %v1054_v24  ;;  %v3171_v7 = vsel %vm884_vm2, %v901_v63, %v4531_v0  ;;  %v4532_v24 = vrot.slane %v3108_v6, 3  ;;  %v1532_v63 = vld [vmem:[%s4356_s6 + $0x50] sm:$0xff]  ;;  %v979_v49 = vrot.slane %v971_v22, 3  ;;  %v778_v0 = vld [vmem:[#allocation2 + $0xd8] sm:$0xfe] }
  0xce   :  { %v322_v1 = vpop.f32.mrf.mxu3  ;;  %1545 = vmatpush.msra.mxu1 %v1534_v28 }
  0xcf   :  { %v323_v14 = vadd.f32 %v322_v1, %v297_v57  ;;  %v348_v11 = vpop.f32.mrf.mxu0  ;;  %v1068_v1 = vrot.slane %v3112_v9, 4  ;;  %v964_v57 = vld [vmem:[#allocation2 + $0xb8] sm:$0x7]  ;;  %v3177_v20 = vsel %vm975_vm3, %v992_v46, %v4532_v24  ;;  %v4534_v46 = vrot.slane %v3032_v47, 1 }
  0xd0   :  { %v349_v62 = vadd.f32 %v348_v11, %v2975_v13  ;;  %v4411_v11 = vrot.slane %v3135_v23, 4  ;;  %v762_v13 = vmul.f32 %v3016_v38, %v2999_v29  ;;  %v1533_v9 = vld [vmem:[%s4356_s6 + $0x58] sm:$0xff]  ;;  %v988_v29 = vmul.f32 %v3019_v39, %v964_v57 }
  0xd1   :  { %441 = vst [vmem:[#allocation2 + $0x60] sm:$0xf] %v323_v14  ;;  %v897_v14 = vmul.f32 %v3008_v33, %v873_v56  ;;  %1546 = vmatpush.msra.mxu1 %v1533_v9  ;;  %v3190_v56 = vperm.slane %v2985_v18, 2  ;;  %v3195_v44 = vsel %vm793_vm1, %v4534_v46, %v797_v5  ;;  %v3203_v57 = vperm.slane %v2985_v18, 3 }
  0xd2   :  { %v375_v16 = vadd.f32 %v374_v43, %v349_v62  ;;  %v3181_v62 = vperm.slane %v2972_v12, 4  ;;  %v3187_v43 = vsel %vm1066_vm4, %v1067_v50, %v1068_v1  ;;  %v3200_v12 = vsel %vm1066_vm4, %v1083_v34, %v4411_v11  ;;  %v1055_v50 = vld [vmem:[#allocation2 + $0xb8] sm:$0xf]  ;;  %v1531_v34 = vld [vmem:[%s4356_s6 + $0x48] sm:$0xff] }
  0xd3   :  { %1547 = vmatpush.msra.mxu1 %v1532_v63  ;;  %v813_v9 = vrot.slane %v806_v35, 1  ;;  %v764_v22 = vadd.f32 %v762_v13, %v3064_v3  ;;  %v767_v47 = vmul.f32 %v3046_v53, %v3027_v45  ;;  %v904_v63 = vrot.slane %v897_v14, 2  ;;  %v1530_v14 = vld [vmem:[%s4356_s6 + $0x40] sm:$0xff] }
  0xd4   :  { %442 = vst [vmem:[#allocation2 + $0xa8] sm:$0xf] %v375_v16  ;;  %v1070_v16 = vrot.slane %v1062_v4, 4  ;;  %v423_v39 = vpop.f32.mrf.mxu1  ;;  %v4535_v4 = vrot.slane %v3036_v48, 2  ;;  %v995_v3 = vrot.slane %v988_v29, 3  ;;  %v3219_v45 = vperm.slane %v2961_v8, 4 }
  0xd5   :  { %4533 = vst [vmem:[#allocation9_spill] sm:$0xff] %v3181_v62  ;;  %v477_v28 = vpop.f32.mrf.mxu2  ;;  %1548 = vmatpush.msra.mxu1 %v1531_v34  ;;  %v3232_v48 = vmul.f32 %v3022_v41, %v1055_v50  ;;  %v869_v29 = vld [vmem:[#allocation2 + $0xd8] sm:$0xfc]  ;;  %v4539_v50 = vrot.slane %v3074_v17, 1  ;;  %v4540_v17 = vrot.slane %v3097_v40, 2  ;;  %v3282_v40 = vmul.f32 %v3056_v59, %v3088_v42 }
  0xd6   :  { %v394_v24 = vpop.f32.mrf.mxu3  ;;  %v478_v5 = vadd.f32 %v477_v28, %v2937_v51  ;;  %v3216_v13 = vsel %vm884_vm2, %v4535_v4, %v888_v2  ;;  %v4536_v28 = vrot.slane %v3050_v54, 3  ;;  %v3235_v2 = vmul.f32 %v3042_v52, %v778_v0  ;;  %v779_v8 = vld [vmem:[#allocation2 + $0x18] sm:$0xfe] }
  0xd7   :  { %v395_v46 = vadd.f32 %v394_v24, %v3138_v25  ;;  %v503_v11 = vpop.f32.mrf.mxu0  ;;  %1549 = vmatpush.msra.mxu1 %v1530_v14  ;;  %v3241_v34 = vsel %vm1066_vm4, %v1068_v1, %v1070_v16  ;;  %v769_v54 = vadd.f32 %v767_v47, %v764_v22  ;;  %v3250_v0 = vsel %vm793_vm1, %v4539_v50, %v813_v9  ;;  %v870_v1 = vld [vmem:[#allocation2 + $0x18] sm:$0xfc] }
  0xd8   :  { %v3221_v35 = vadd.f32 %v503_v11, %v478_v5  ;;  %v3229_v24 = vsel %vm975_vm3, %v4536_v28, %v979_v49  ;;  %v763_v5 = vmul.f32 %v3016_v38, %v3066_v19  ;;  %4538 = vst [vmem:[#allocation29_spill] sm:$0xff] %v3241_v34  ;;  %v1529_v49 = vld [vmem:[%s4356_s6 + $0x38] sm:$0xff]  ;;  %v3261_v22 = vperm.slane %v2980_v15, 4  ;;  %v1528_v15 = vld [vmem:[%s4356_s6 + $0x30] sm:$0xff] }
  0xd9   :  { %4537 = vst [vmem:[#allocation25_spill] sm:$0xff] %v3229_v24  ;;  %v421_v11 = vadd.f32 %v3130_v27, %v395_v46  ;;  %v3254_v27 = vmul.f32 %v3042_v52, %v3066_v19  ;;  %v3257_v46 = vperm.slane %v2966_v10, 4  ;;  %1550 = vmatpush.msra.mxu1 %v1529_v49  ;;  %v3266_v9 = vsel %vm884_vm2, %v4540_v17, %v904_v63  ;;  %v960_v63 = vld [vmem:[#allocation2 + $0xd8] sm:$0xf8] }
  0xda   :  { %721 = vst [vmem:[#allocation2 + $0x40] sm:$0xff] %v3221_v35  ;;  %v4541_v47 = vrot.slane %v3108_v6, 3  ;;  %v3274_v10 = vmul.f32 %v3053_v58, %v869_v29  ;;  %v836_v14 = vmul.f32 %v3056_v59, %v779_v8  ;;  %v826_v6 = vrot.slane %v3235_v2, 1  ;;  %v1525_v34 = vld [vmem:[%s4356_s6 + $0x18] sm:$0xff] }
  0xdb   :  { %433 = vst [vmem:[#allocation2 + $0x50] sm:$0xff] %v421_v11  ;;  %v772_v16 = vmul.f32 %v3181_v62, %v421_v11  ;;  %1551 = vmatpush.msra.mxu1 %v1528_v15  ;;  %v765_v29 = vadd.f32 %v763_v5, %v3143_v26  ;;  %v3289_v8 = vmul.f32 %v3053_v58, %v3066_v19  ;;  %v4543_v32 = vrot.slane %v3254_v27, 1 }
  0xdc   :  { %v3271_v4 = vsel %vm975_vm3, %v4541_v47, %v995_v3  ;;  %v927_v49 = vmul.f32 %v3059_v55, %v870_v1  ;;  %v1527_v47 = vld [vmem:[%s4356_s6 + $0x28] sm:$0xff]  ;;  %v768_v2 = vmul.f32 %v3046_v53, %v3088_v42  ;;  %v3303_v1 = vmul.f32 %v3059_v55, %v3088_v42 }
  0xdd   :  { %4542 = vst [vmem:[#allocation27_spill] sm:$0xff] %v3271_v4  ;;  %v774_v3 = vadd.f32 %v772_v16, %v769_v54  ;;  %v480_v11 = vpop.f32.mrf.mxu2  ;;  %v1051_v16 = vld [vmem:[#allocation2 + $0xd8] sm:$0xf0]  ;;  %1552 = vmatpush.msra.mxu1 %v1527_v47  ;;  %v842_v28 = vrot.slane %v836_v14, 1  ;;  %v1526_v54 = vld [vmem:[%s4356_s6 + $0x20] sm:$0xff]  ;;  %v426_v47 = vpop.f32.mrf.mxu1  ;;  %v4545_v4 = vrot.slane %v3289_v8, 2 }
  0xde   :  { %v397_v50 = vpop.f32.mrf.mxu3  ;;  %v481_v17 = vadd.f32 %v480_v11, %v2937_v51  ;;  %v1002_v11 = vmul.f32 %v3062_v61, %v960_v63  ;;  %v961_v63 = vld [vmem:[#allocation2 + $0x18] sm:$0xf8]  ;;  %v770_v53 = vadd.f32 %v768_v2, %v765_v29  ;;  %v4544_v29 = vrot.slane %v3282_v40, 1 }
  0xdf   :  { %v398_v26 = vadd.f32 %v397_v50, %v3138_v25  ;;  %v506_v5 = vpop.f32.mrf.mxu0  ;;  %v801_v15 = vadd.f32 %v3104_v60, %v774_v3  ;;  %v3314_v50 = vmul.f32 %v3062_v61, %v3066_v19  ;;  %v917_v60 = vrot.slane %v3274_v10, 2  ;;  %1553 = vmatpush.msra.mxu1 %v1526_v54  ;;  %v783_v10 = vld [vmem:[#allocation2 + $0x60] sm:$0x1] }
  0xe0   :  { %v3306_v41 = vadd.f32 %v506_v5, %v481_v17  ;;  %v3321_v17 = vmul.f32 %v3190_v56, %v1051_v16  ;;  %v933_v5 = vrot.slane %v927_v49, 2  ;;  %v844_v2 = vsel %vm793_vm1, %v842_v28, %v4544_v29  ;;  %v1523_v29 = vld [vmem:[%s4356_s6 + $0x8] sm:$0xff] }
  0xe1   :  { %v3317_v3 = vadd.f32 %v423_v39, %v398_v26  ;;  %v817_v14 = vadd.f32 %v3156_v37, %v801_v15  ;;  %v828_v39 = vsel %vm793_vm1, %v826_v6, %v4543_v32  ;;  %1554 = vmatpush.msra.mxu1 %v1525_v34  ;;  %v1524_v26 = vld [vmem:[%s4356_s6 + $0x10] sm:$0xff]  ;;  %v3347_v34 = vmul.f32 %v3083_v30, %v3088_v42 }
  0xe2   :  { %v780_v33 = vld [vmem:[#allocation2 + $0x50] sm:$0xfe]  ;;  %v3364_v49 = vmul.f32 %v3190_v56, %v3066_v19 }
  0xe3   :  { %v852_v54 = vmul.f32 %v3219_v45, %v780_v33  ;;  %v773_v37 = vmul.f32 %v3181_v62, %v3317_v3  ;;  %v833_v16 = vadd.f32 %v828_v39, %v817_v14  ;;  %v3342_v32 = vmul.f32 %v3219_v45, %v3317_v3  ;;  %1555 = vmatpush.msra.mxu1 %v1524_v26  ;;  %v871_v26 = vld [vmem:[#allocation2 + $0x50] sm:$0xfc] }
  0xe4   :  { %v1018_v33 = vmul.f32 %v3083_v30, %v961_v63  ;;  %v1008_v39 = vrot.slane %v1002_v11, 3 }
  0xe5   :  { %v858_v6 = vrot.slane %v852_v54, 1  ;;  %v483_v15 = vpop.f32.mrf.mxu2  ;;  %v849_v14 = vadd.f32 %v844_v2, %v833_v16  ;;  %v775_v63 = vadd.f32 %v773_v37, %v770_v53  ;;  %v4428_v36 = vrot.slane %v3342_v32, 1  ;;  %1556 = vmatpush.msra.mxu1 %v1523_v29 }
  0xe6   :  { %v400_v62 = vpop.f32.mrf.mxu3  ;;  %v484_v28 = vadd.f32 %v483_v15, %v2937_v51  ;;  %v919_v54 = vsel %vm884_vm2, %v917_v60, %v4545_v4  ;;  %v4546_v2 = vrot.slane %v3303_v1, 2  ;;  %v1052_v15 = vld [vmem:[#allocation2 + $0x18] sm:$0xf0]  ;;  %v1099_v53 = vrot.slane %v3321_v17, 4  ;;  %v1522_v4 = vld [vmem:[%s4356_s6] sm:$0xff] }
  0xe7   :  { %v401_v11 = vadd.f32 %v400_v62, %v3138_v25  ;;  %v509_v16 = vpop.f32.mrf.mxu0  ;;  %v860_v62 = vsel %vm793_vm1, %v858_v6, %v4428_v36  ;;  %v1024_v60 = vrot.slane %v1018_v33, 3  ;;  %v4429_v29 = vrot.slane %v3347_v34, 3  ;;  %1557 = vmatpush.msra.mxu1 %v1522_v4 }
  0xe8   :  { %v935_v51 = vsel %vm884_vm2, %v933_v5, %v4546_v2  ;;  %v510_v37 = vadd.f32 %v509_v16, %v484_v28  ;;  %v822_v5 = vmul.f32 %v3042_v52, %v783_v10  ;;  %v874_v2 = vld [vmem:[#allocation2 + $0x60] sm:$0x3]  ;;  %v865_v19 = vadd.f32 %v860_v62, %v849_v14  ;;  %v784_v16 = vld [vmem:[#allocation2 + $0xa8] sm:$0x1] }
  0xe9   :  { %v427_v25 = vadd.f32 %v426_v47, %v401_v11  ;;  %v4547_v17 = vrot.slane %v3314_v50, 3  ;;  %v802_v24 = vadd.f32 %v3195_v44, %v775_v63  ;;  %v943_v6 = vmul.f32 %v3257_v46, %v871_v26  ;;  %v965_v47 = vld [vmem:[#allocation2 + $0x60] sm:$0x7]  ;;  %v4548_v11 = vld [vmem:[#allocation23_spill] sm:$0xff] }
  0xea   :  { %731 = vst [vmem:[#allocation2 + $0xd0] sm:$0xf] %v510_v37  ;;  %v3384_v33 = vmul.f32 %v3257_v46, %v3317_v3  ;;  %v1109_v10 = vmul.f32 %v3203_v57, %v1052_v15  ;;  %v892_v4 = vadd.f32 %v4548_v11, %v865_v19  ;;  %v3391_v37 = vmul.f32 %v3203_v57, %v3088_v42  ;;  %v4549_v63 = vld [vmem:[#allocation3_spill] sm:$0xff] }
  0xeb   :  { %v3378_v28 = vsel %vm975_vm3, %v1008_v39, %v4547_v17  ;;  %443 = vst [vmem:[#allocation2 + $0x70] sm:$0xf] %v427_v25  ;;  %v529_v14 = vpop.f32.mrf.mxu1  ;;  %v3394_v44 = vperm.slane %v2985_v18, 4  ;;  %v3400_v15 = vsel %vm975_vm3, %v1024_v60, %v4429_v29  ;;  %v875_v25 = vld [vmem:[#allocation2 + $0xa8] sm:$0x3]  ;;  %v913_v62 = vmul.f32 %v3053_v58, %v874_v2 }
  0xec   :  { %v530_v26 = vadd.f32 %v529_v14, %v4549_v63  ;;  %v4550_v19 = vrot.slane %v3232_v48, 4  ;;  %v4551_v17 = vrot.slane %v3135_v23, 4  ;;  %v829_v11 = vrot.slane %v822_v5, 1  ;;  %v1056_v60 = vld [vmem:[#allocation2 + $0x60] sm:$0xf] }
  0xed   :  { %v838_v18 = vmul.f32 %v3056_v59, %v784_v16  ;;  %v607_v36 = vpop.f32.mrf.mxu2  ;;  %v908_v14 = vadd.f32 %v3171_v7, %v892_v4  ;;  %v1004_v39 = vmul.f32 %v3062_v61, %v965_v47  ;;  %v818_v52 = vadd.f32 %v3250_v0, %v802_v24  ;;  %v966_v59 = vld [vmem:[#allocation2 + $0xa8] sm:$0x7] }
  0xee   :  { %v3408_v42 = vsel %vm1066_vm4, %v4551_v17, %v4550_v19  ;;  %v555_v29 = vpop.f32.mrf.mxu3  ;;  %v949_v2 = vrot.slane %v943_v6, 2  ;;  %v4438_v48 = vrot.slane %v3384_v33, 2  ;;  %v1115_v58 = vrot.slane %v1109_v10, 4  ;;  %v4552_v7 = vld [vmem:[#allocation10_spill] sm:$0xff] }
  0xef   :  { %v3415_v23 = vadd.f32 %v555_v29, %v530_v26  ;;  %v581_v19 = vpop.f32.mrf.mxu0  ;;  %v924_v17 = vadd.f32 %v919_v54, %v908_v14  ;;  %v929_v16 = vmul.f32 %v3059_v55, %v875_v25  ;;  %v4553_v47 = vrot.slane %v3364_v49, 4  ;;  %v962_v26 = vld [vmem:[#allocation2 + $0x50] sm:$0xf8] }
  0xf0   :  { %v582_v4 = vadd.f32 %v581_v19, %v4552_v7  ;;  %v920_v24 = vrot.slane %v913_v62, 2  ;;  %v3426_v0 = vmul.f32 %v3190_v56, %v1056_v60  ;;  %v845_v29 = vrot.slane %v838_v18, 1 }
  0xf1   :  { %v3423_v61 = vsel %vm1066_vm4, %v1099_v53, %v4553_v47  ;;  %722 = vst [vmem:[#allocation2 + $0x8] sm:$0xff] %v3415_v23  ;;  %v4554_v54 = vrot.slane %v3254_v27, 1  ;;  %v940_v10 = vadd.f32 %v935_v51, %v924_v17  ;;  %v1011_v25 = vrot.slane %v1004_v39, 3 }
  0xf2   :  { %v785_v14 = vld [vmem:[#allocation2 + $0x70] sm:$0x1]  ;;  %v3432_v19 = vadd.f32 %v607_v36, %v582_v4  ;;  %v951_v53 = vsel %vm884_vm2, %v949_v2, %v4438_v48  ;;  %v3438_v62 = vmul.f32 %v3083_v30, %v966_v59  ;;  %v936_v39 = vrot.slane %v929_v16, 2  ;;  %v4556_v36 = vld [vmem:[#allocation16_spill] sm:$0xff]  ;;  %v1170_v48 = vld [vmem:[#allocation2 + $0x40] sm:$0xfe] }
  0xf3   :  { %v830_v6 = vsel %vm793_vm1, %v4554_v54, %v829_v11  ;;  %v854_v18 = vmul.f32 %v3219_v45, %v785_v14  ;;  %v532_v60 = vpop.f32.mrf.mxu1  ;;  %v956_v27 = vadd.f32 %v951_v53, %v940_v10  ;;  %v4555_v11 = vrot.slane %v3391_v37, 4  ;;  %v4558_v54 = vld [vmem:[#allocation24_spill] sm:$0xff]  ;;  %v876_v53 = vld [vmem:[#allocation2 + $0x70] sm:$0x3] }
  0xf4   :  { %v834_v5 = vadd.f32 %v830_v6, %v818_v52  ;;  %v3448_v52 = vmul.f32 %v4556_v36, %v3221_v35  ;;  %723 = vst [vmem:[#allocation2 + $0x78] sm:$0xff] %v3432_v19  ;;  %v533_v2 = vadd.f32 %v532_v60, %v4549_v63  ;;  %v1034_v59 = vmul.f32 %v3261_v22, %v962_v26 }
  0xf5   :  { %v3444_v51 = vsel %vm1066_vm4, %v1115_v58, %v4555_v11  ;;  %v3455_v17 = vmul.f32 %v3261_v22, %v3317_v3  ;;  %v861_v4 = vrot.slane %v854_v18, 1  ;;  %v610_v47 = vpop.f32.mrf.mxu2  ;;  %v4557_v58 = vrot.slane %v3282_v40, 1 }
  0xf6   :  { %v983_v6 = vadd.f32 %v4558_v54, %v956_v27  ;;  %v558_v10 = vpop.f32.mrf.mxu3  ;;  %v4559_v60 = vrot.slane %v3289_v8, 2  ;;  %v4560_v11 = vrot.slane %v3314_v50, 3  ;;  %v1027_v40 = vrot.slane %v3438_v62, 3  ;;  %v1057_v50 = vld [vmem:[#allocation2 + $0xa8] sm:$0xf]  ;;  %v4569_v62 = vld [vmem:[#allocation25_spill] sm:$0xff] }
  0xf7   :  { %v846_v16 = vsel %vm793_vm1, %v4557_v58, %v845_v29  ;;  %v3471_v29 = vadd.f32 %v558_v10, %v533_v2  ;;  %v584_v27 = vpop.f32.mrf.mxu0  ;;  %v4561_v58 = vrot.slane %v3342_v32, 1  ;;  %v4562_v8 = vrot.slane %v3303_v1, 2  ;;  %v1255_v54 = vld [vmem:[#allocation2 + $0x40] sm:$0xfc]  ;;  %v1053_v2 = vld [vmem:[#allocation2 + $0x50] sm:$0xf0] }
  0xf8   :  { %v850_v14 = vadd.f32 %v846_v16, %v834_v5  ;;  %v921_v26 = vsel %vm884_vm2, %v4559_v60, %v920_v24  ;;  %v3468_v18 = vsel %vm975_vm3, %v4560_v11, %v1011_v25  ;;  %v999_v16 = vadd.f32 %v3177_v20, %v983_v6  ;;  %v4563_v1 = vld [vmem:[#allocation12_spill] sm:$0xff] }
  0xf9   :  { %v862_v5 = vsel %vm793_vm1, %v4561_v58, %v861_v4  ;;  %v937_v24 = vsel %vm884_vm2, %v4562_v8, %v936_v39  ;;  %v585_v25 = vadd.f32 %v584_v27, %v4552_v7  ;;  %v1040_v60 = vrot.slane %v1034_v59, 3  ;;  %v4564_v39 = vld [vmem:[#allocation15_spill] sm:$0xff] }
  0xfa   :  { %v1041_v11 = vrot.slane %v3455_v17, 3  ;;  %v866_v10 = vadd.f32 %v862_v5, %v850_v14  ;;  %v1015_v35 = vadd.f32 %v3378_v28, %v999_v16  ;;  %v945_v32 = vmul.f32 %v3257_v46, %v876_v53 }
  0xfb   :  { %v1151_v20 = vmul.f32 %v4556_v36, %v3306_v41  ;;  %v1155_v4 = vmul.f32 %v4563_v1, %v3471_v29  ;;  %v1180_v6 = vmul.f32 %v1170_v48, %v4564_v39  ;;  %v3489_v58 = vadd.f32 %v610_v47, %v585_v25  ;;  %v535_v5 = vpop.f32.mrf.mxu1 }
  0xfc   :  { %v893_v59 = vadd.f32 %v3216_v13, %v866_v10  ;;  %v1111_v27 = vmul.f32 %v3203_v57, %v1057_v50  ;;  %v1265_v14 = vmul.f32 %v1255_v54, %v2991_v21  ;;  %v1031_v28 = vadd.f32 %v3400_v15, %v1015_v35 }
  0xfd   :  { %v1125_v53 = vmul.f32 %v3394_v44, %v1053_v2  ;;  %v1157_v16 = vadd.f32 %v1155_v4, %v1151_v20  ;;  %v536_v36 = vadd.f32 %v535_v5, %v4549_v63  ;;  %v1042_v48 = vsel %vm975_vm3, %v1040_v60, %v1041_v11  ;;  %v613_v8 = vpop.f32.mrf.mxu2 }
  0xfe   :  { %v909_v47 = vadd.f32 %v3266_v9, %v893_v59  ;;  %v1159_v13 = vmul.f32 %v3016_v38, %v3489_v58  ;;  %v1047_v50 = vadd.f32 %v1042_v48, %v1031_v28  ;;  %v3505_v54 = vmul.f32 %v3394_v44, %v3317_v3  ;;  %v561_v63 = vpop.f32.mrf.mxu3 }
  0xff   :  { %v952_v15 = vrot.slane %v945_v32, 2  ;;  %v3509_v35 = vmul.f32 %v4564_v39, %v3306_v41  ;;  %v1118_v2 = vrot.slane %v1111_v27, 4  ;;  %v3515_v9 = vmul.f32 %v2991_v21, %v3306_v41  ;;  %v587_v59 = vpop.f32.mrf.mxu0  ;;  %v1340_v32 = vld [vmem:[#allocation2 + $0x40] sm:$0xf8] }
 0x100   :  { %v925_v25 = vadd.f32 %v921_v26, %v909_v47  ;;  %v3511_v60 = vadd.f32 %v1159_v13, %v1157_v16  ;;  %v1186_v10 = vrot.slane %v1180_v6, 1  ;;  %v1271_v20 = vrot.slane %v1265_v14, 2  ;;  %v967_v16 = vld [vmem:[#allocation2 + $0x70] sm:$0x7] }
 0x101   :  { %v562_v4 = vadd.f32 %v561_v63, %v536_v36  ;;  %v1074_v3 = vadd.f32 %v3187_v43, %v1047_v50  ;;  %v1154_v5 = vmul.f32 %v4563_v1, %v3415_v23  ;;  %v588_v28 = vadd.f32 %v587_v59, %v4552_v7  ;;  %v1425_v63 = vld [vmem:[#allocation2 + $0x40] sm:$0xf0] }
 0x102   :  { %v1131_v26 = vrot.slane %v1125_v53, 4  ;;  %v941_v27 = vadd.f32 %v937_v24, %v925_v25  ;;  %v1132_v47 = vrot.slane %v3505_v54, 4  ;;  %v4565_v6 = vrot.slane %v3384_v33, 2 }
 0x103   :  { %732 = vst [vmem:[#allocation2 + $0x98] sm:$0xf] %v562_v4  ;;  %v1090_v48 = vadd.f32 %v3200_v12, %v1074_v3  ;;  %v4440_v43 = vrot.slane %v3509_v35, 1  ;;  %v614_v36 = vadd.f32 %v613_v8, %v588_v28  ;;  %v4439_v23 = vrot.slane %v3515_v9, 2  ;;  %v659_v24 = vpop.f32.mrf.mxu1  ;;  %v4571_v3 = vld [vmem:[#allocation27_spill] sm:$0xff] }
 0x104   :  { %v953_v14 = vsel %vm884_vm2, %v4565_v6, %v952_v15  ;;  %v3529_v7 = vmul.f32 %v1340_v32, %v3002_v31  ;;  %v4566_v12 = vrot.slane %v3347_v34, 3  ;;  %v1036_v53 = vmul.f32 %v3261_v22, %v967_v16  ;;  %v4573_v16 = vld [vmem:[#allocation4_spill] sm:$0xff]  ;;  %v4574_v6 = vld [vmem:[#allocation26_spill] sm:$0xff] }
 0x105   :  { %v957_v13 = vadd.f32 %v953_v14, %v941_v27  ;;  %v1106_v1 = vadd.f32 %v3423_v61, %v1090_v48  ;;  %v4567_v50 = vrot.slane %v3426_v0, 4  ;;  %v4568_v8 = vrot.slane %v3364_v49, 4  ;;  %733 = vst [vmem:[#allocation2 + $0xc8] sm:$0xf] %v614_v36 }
 0x106   :  { %v1028_v33 = vsel %vm975_vm3, %v4566_v12, %v1027_v40  ;;  %v1156_v25 = vadd.f32 %v1154_v5, %v3448_v52  ;;  %v1158_v61 = vmul.f32 %v3016_v38, %v3432_v19  ;;  %v4570_v40 = vrot.slane %v3391_v37, 4  ;;  %v3561_v52 = vld [vmem:[%s4353_s5] ss:$0 sm:$0xff]  ;;  %v1058_v38 = vld [vmem:[#allocation2 + $0x70] sm:$0xf]  ;;  %v685_v59 = vpop.f32.mrf.mxu2 }
 0x107   :  { %v3543_v15 = vsel %vm1066_vm4, %v4568_v8, %v4567_v50  ;;  %v984_v34 = vadd.f32 %v4569_v62, %v957_v13  ;;  %v1122_v0 = vadd.f32 %v3444_v51, %v1106_v1  ;;  %v1133_v49 = vsel %vm1066_vm4, %v1131_v26, %v1132_v47  ;;  %v1171_v51 = vld [vmem:[#allocation2 + $0x8] sm:$0xfe]  ;;  %v711_v36 = vpop.f32.mrf.mxu0 }
 0x108   :  { %v3552_v4 = vsel %vm1066_vm4, %v4570_v40, %v1118_v2  ;;  %v3566_v19 = vsel %vm793_vm1, %v1186_v10, %v4440_v43  ;;  %v3570_v37 = vmul.f32 %v3002_v31, %v3306_v41  ;;  %v633_v2 = vpop.f32.mrf.mxu3  ;;  %v3576_v5 = vsel %vm884_vm2, %v1271_v20, %v4439_v23  ;;  %v4572_v26 = vld [vmem:[#allocation18_spill] sm:$0xff]  ;;  %v1172_v10 = vld [vmem:[#allocation2 + $0x78] sm:$0xfe] }
 0x109   :  { %v1000_v32 = vadd.f32 %v4571_v3, %v984_v34  ;;  %v1356_v28 = vrot.slane %v3529_v7, 3  ;;  %v3580_v27 = vmul.f32 %v1425_v63, %v4572_v26  ;;  %v634_v48 = vadd.f32 %v633_v2, %v4573_v16  ;;  %v4575_v7 = vld [vmem:[#allocation5_spill] sm:$0xff]  ;;  %v1175_v2 = vld [vmem:[#allocation2 + $0xd0] sm:$0x1] }
 0x10a   :  { %v686_v14 = vadd.f32 %v685_v59, %v4574_v6  ;;  %v1138_v13 = vadd.f32 %v1133_v49, %v1122_v0  ;;  %v1043_v1 = vrot.slane %v1036_v53, 3  ;;  %v1160_v12 = vadd.f32 %v1158_v61, %v1156_v25  ;;  %v1256_v59 = vld [vmem:[#allocation2 + $0x8] sm:$0xfc] }
 0x10b   :  { %v1016_v50 = vadd.f32 %v3468_v18, %v1000_v32  ;;  %v1127_v8 = vmul.f32 %v3394_v44, %v1058_v38  ;;  %v3588_v20 = vmul.f32 %v4572_v26, %v3306_v41  ;;  %v1195_v63 = vmul.f32 %v1171_v51, %v4575_v7  ;;  %v4576_v18 = vld [vmem:[#allocation20_spill] sm:$0xff]  ;;  %v4577_v41 = vld [vmem:[#allocation7_spill] sm:$0xff]  ;;  %v662_v38 = vpop.f32.mrf.mxu1 }
 0x10c   :  { %v660_v62 = vadd.f32 %v659_v24, %v634_v48  ;;  %v712_v34 = vadd.f32 %v711_v36, %v686_v14  ;;  %v1514_v40 = vadd.f32 %v3561_v52, %v1138_v13  ;;  %v3594_v53 = vmul.f32 %v4575_v7, %v3471_v29  ;;  %v4578_v24 = vld [vmem:[#allocation9_spill] sm:$0xff]  ;;  %v1260_v32 = vld [vmem:[#allocation2 + $0xd0] sm:$0x3] }
 0x10d   :  { %v1032_v3 = vadd.f32 %v1028_v33, %v1016_v50  ;;  %v1210_v25 = vmul.f32 %v1172_v10, %v4576_v18  ;;  %v3599_v61 = vmul.f32 %v4576_v18, %v3489_v58  ;;  %v1044_v33 = vsel %vm975_vm3, %v1041_v11, %v1043_v1  ;;  %v4579_v50 = vld [vmem:[#allocation14_spill] sm:$0xff]  ;;  %v4580_v1 = vld [vmem:[#allocation29_spill] sm:$0xff] }
 0x10e   :  { %724 = vst [vmem:[#allocation2 + $0xc0] sm:$0xff] %v660_v62  ;;  %v1162_v0 = vmul.f32 %v4577_v41, %v660_v62  ;;  %v1166_v49 = vmul.f32 %v4578_v24, %v712_v34  ;;  %1558 = vmatmul.f32.vlgmr.msra.gmra.mxu1 %v1514_v40  ;;  %v4441_v51 = vrot.slane %v3570_v37, 3  ;;  %v1134_v48 = vrot.slane %v1127_v8, 4  ;;  %v688_v11 = vpop.f32.mrf.mxu2 }
 0x10f   :  { %725 = vst [vmem:[#allocation2 + $0x10] sm:$0xff] %v712_v34  ;;  %v1048_v10 = vadd.f32 %v1044_v33, %v1032_v3  ;;  %v3608_v14 = vmul.f32 %v1175_v2, %v4564_v39  ;;  %v1201_v13 = vrot.slane %v1195_v63, 1  ;;  %v3612_v62 = vmul.f32 %v1256_v59, %v4579_v50 }
 0x110   :  { %v1164_v40 = vadd.f32 %v1162_v0, %v1160_v12  ;;  %v4446_v17 = vrot.slane %v3588_v20, 4  ;;  %v636_v23 = vpop.f32.mrf.mxu3  ;;  %v4443_v34 = vrot.slane %v3594_v53, 1  ;;  %v1216_v3 = vrot.slane %v1210_v25, 1  ;;  %v714_v12 = vpop.f32.mrf.mxu0 }
 0x111   :  { %v1075_v43 = vadd.f32 %v4580_v1, %v1048_v10  ;;  %v4442_v8 = vrot.slane %v3599_v61, 1  ;;  %v3619_v39 = vmul.f32 %v1260_v32, %v2991_v21  ;;  %v637_v63 = vadd.f32 %v636_v23, %v4573_v16 }
 0x112   :  { %v1168_v2 = vadd.f32 %v1166_v49, %v1164_v40  ;;  %v689_v59 = vadd.f32 %v688_v11, %v4574_v6  ;;  %v1135_v33 = vsel %vm1066_vm4, %v1132_v47, %v1134_v48  ;;  %v1189_v10 = vrot.slane %v3608_v14, 1 }
 0x113   :  { %v1091_v0 = vadd.f32 %v3408_v42, %v1075_v43  ;;  %v3631_v25 = vsel %vm975_vm3, %v1356_v28, %v4441_v51  ;;  %v1286_v21 = vrot.slane %v3612_v62, 2  ;;  %v3634_v49 = vadd.f32 %v662_v38, %v637_v63  ;;  %v1257_v28 = vld [vmem:[#allocation2 + $0x78] sm:$0xfc] }
 0x114   :  { %v3636_v23 = vadd.f32 %v714_v12, %v689_v59  ;;  %v1193_v32 = vadd.f32 %v3566_v19, %v1168_v2  ;;  %v1203_v47 = vsel %vm793_vm1, %v1201_v13, %v4443_v34  ;;  %v1218_v43 = vsel %vm793_vm1, %v1216_v3, %v4442_v8  ;;  %v4581_v62 = vld [vmem:[#allocation8_spill] sm:$0xff]  ;;  %v4582_v59 = vld [vmem:[#allocation21_spill] sm:$0xff] }
 0x115   :  { %v1173_v42 = vld [vmem:[#allocation2 + $0xc0] sm:$0xfe]  ;;  %v1107_v54 = vadd.f32 %v3543_v15, %v1091_v0  ;;  %v3648_v38 = vmul.f32 %v4579_v50, %v3471_v29  ;;  %v1163_v48 = vmul.f32 %v4577_v41, %v3634_v49  ;;  %v3658_v11 = vmul.f32 %v4581_v62, %v3634_v49  ;;  %v665_v41 = vpop.f32.mrf.mxu1  ;;  %v1176_v0 = vld [vmem:[#allocation2 + $0x98] sm:$0x1] }
 0x116   :  { %v1167_v19 = vmul.f32 %v4578_v24, %v3636_v23  ;;  %v1174_v15 = vld [vmem:[#allocation2 + $0x10] sm:$0xfe]  ;;  %v1208_v14 = vadd.f32 %v1203_v47, %v1193_v32  ;;  %v1225_v40 = vmul.f32 %v1173_v42, %v4581_v62  ;;  %v3663_v3 = vmul.f32 %v3219_v45, %v3636_v23 }
 0x117   :  { %v1123_v13 = vadd.f32 %v3552_v4, %v1107_v54  ;;  %v1240_v1 = vmul.f32 %v1174_v15, %v3219_v45  ;;  %v1165_v2 = vadd.f32 %v1163_v48, %v3511_v60  ;;  %v1295_v12 = vmul.f32 %v1257_v28, %v4582_v59  ;;  %v691_v4 = vpop.f32.mrf.mxu2  ;;  %v1258_v60 = vld [vmem:[#allocation2 + $0xc0] sm:$0xfc] }
 0x118   :  { %v1223_v24 = vadd.f32 %v1218_v43, %v1208_v14  ;;  %v1231_v63 = vrot.slane %v1225_v40, 1  ;;  %v639_v32 = vpop.f32.mrf.mxu3  ;;  %v1232_v54 = vrot.slane %v3658_v11, 1  ;;  %v1247_v15 = vrot.slane %v3663_v3, 1  ;;  %v717_v34 = vpop.f32.mrf.mxu0 }
 0x119   :  { %v1139_v42 = vadd.f32 %v1135_v33, %v1123_v13  ;;  %v1246_v47 = vrot.slane %v1240_v1, 1  ;;  %v640_v51 = vadd.f32 %v639_v32, %v4573_v16  ;;  %v692_v8 = vadd.f32 %v691_v4, %v4574_v6  ;;  %v1341_v6 = vld [vmem:[#allocation2 + $0x8] sm:$0xf8]  ;;  %v1259_v1 = vld [vmem:[#allocation2 + $0x10] sm:$0xfc] }
 0x11a   :  { %v1169_v36 = vadd.f32 %v1167_v19, %v1165_v2  ;;  %v4445_v43 = vrot.slane %v3648_v38, 2  ;;  %v1233_v33 = vsel %vm793_vm1, %v1231_v63, %v1232_v54  ;;  %v3681_v16 = vmul.f32 %v4582_v59, %v3489_v58  ;;  %v1177_v32 = vld [vmem:[#allocation2 + $0xc8] sm:$0x1] }
 0x11b   :  { %v1515_v28 = vadd.f32 %v3561_v52, %v1139_v42  ;;  %v1248_v48 = vsel %vm793_vm1, %v1246_v47, %v1247_v15  ;;  %v666_v14 = vadd.f32 %v665_v41, %v640_v51  ;;  %v718_v19 = vadd.f32 %v717_v34, %v692_v8  ;;  %v1342_v51 = vld [vmem:[#allocation2 + $0x78] sm:$0xf8]  ;;  %v4584_v8 = vld [vmem:[#allocation6_spill] sm:$0xff] }
 0x11c   :  { %v1197_v40 = vmul.f32 %v1176_v0, %v4575_v7  ;;  %v1238_v13 = vadd.f32 %v1233_v33, %v1223_v24  ;;  %v1274_v2 = vrot.slane %v3619_v39, 2  ;;  %v4583_v63 = vrot.slane %v3509_v35, 1  ;;  %v4585_v33 = vld [vmem:[#allocation22_spill] sm:$0xff] }
 0x11d   :  { %1561 = vmatmul.f32.gmra.mxu1 %v1515_v28  ;;  %v1310_v42 = vmul.f32 %v1258_v60, %v3059_v55  ;;  %v3691_v47 = vmul.f32 %v3059_v55, %v3634_v49  ;;  %734 = vst [vmem:[#allocation2 + $0xe0] sm:$0xf] %v666_v14  ;;  %v1301_v7 = vrot.slane %v1295_v12, 2  ;;  %v1365_v41 = vmul.f32 %v1341_v6, %v4584_v8 }
 0x11e   :  { %v1190_v4 = vsel %vm793_vm1, %v4583_v63, %v1189_v10  ;;  %v1253_v34 = vadd.f32 %v1248_v48, %v1238_v13  ;;  %v3696_v39 = vmul.f32 %v4584_v8, %v3471_v29  ;;  %735 = vst [vmem:[#allocation2 + $0x20] sm:$0xf] %v718_v19  ;;  %v1288_v35 = vsel %vm884_vm2, %v1286_v21, %v4445_v43  ;;  %v4589_v43 = vld [vmem:[#allocation19_spill] sm:$0xff] }
 0x11f   :  { %v4444_v10 = vrot.slane %v3681_v16, 2  ;;  %v1325_v24 = vmul.f32 %v1259_v1, %v3257_v46  ;;  %v3705_v0 = vmul.f32 %v3257_v46, %v3636_v23  ;;  %v1204_v12 = vrot.slane %v1197_v40, 1 }
 0x120   :  { %v1212_v60 = vmul.f32 %v1177_v32, %v4576_v18  ;;  %v1278_v28 = vadd.f32 %v3576_v5, %v1253_v34  ;;  %v1380_v48 = vmul.f32 %v1342_v51, %v4585_v33  ;;  %v1194_v6 = vadd.f32 %v1190_v4, %v1169_v36  ;;  %v1426_v5 = vld [vmem:[#allocation2 + $0x8] sm:$0xf0] }
 0x121   :  { %v1316_v14 = vrot.slane %v1310_v42, 2  ;;  %v1317_v19 = vrot.slane %v3691_v47, 2  ;;  %v3713_v21 = vmul.f32 %v4585_v33, %v3489_v58  ;;  %v4586_v13 = vrot.slane %v3515_v9, 2 }
 0x122   :  { %v1293_v40 = vadd.f32 %v1288_v35, %v1278_v28  ;;  %v1371_v63 = vrot.slane %v1365_v41, 3  ;;  %v1372_v18 = vrot.slane %v3696_v39, 3  ;;  %v1303_v36 = vsel %vm884_vm2, %v1301_v7, %v4444_v10  ;;  %v1343_v35 = vld [vmem:[#allocation2 + $0xc0] sm:$0xf8] }
 0x123   :  { %v3718_v1 = vsel %vm884_vm2, %v4586_v13, %v1274_v2  ;;  %v1331_v32 = vrot.slane %v1325_v24, 2  ;;  %v1332_v4 = vrot.slane %v3705_v0, 2  ;;  %v4587_v42 = vrot.slane %v3580_v27, 4  ;;  %v1261_v13 = vld [vmem:[#allocation2 + $0x98] sm:$0x3] }
 0x124   :  { %v4588_v2 = vrot.slane %v3594_v53, 1  ;;  %v1219_v34 = vrot.slane %v1212_v60, 1  ;;  %v1308_v41 = vadd.f32 %v1303_v36, %v1293_v40  ;;  %v1386_v28 = vrot.slane %v1380_v48, 3  ;;  %v1178_v7 = vld [vmem:[#allocation2 + $0xe0] sm:$0x1] }
 0x125   :  { %v3730_v9 = vsel %vm1066_vm4, %v4587_v42, %v4446_v17  ;;  %v1318_v10 = vsel %vm884_vm2, %v1316_v14, %v1317_v19  ;;  %v1387_v27 = vrot.slane %v3713_v21, 3  ;;  %v3740_v42 = vmul.f32 %v1426_v5, %v4589_v43  ;;  %v1179_v17 = vld [vmem:[#allocation2 + $0x20] sm:$0x1]  ;;  %v1344_v60 = vld [vmem:[#allocation2 + $0x10] sm:$0xf8] }
 0x126   :  { %v1205_v51 = vsel %vm793_vm1, %v4588_v2, %v1204_v12  ;;  %v1227_v53 = vmul.f32 %v1178_v7, %v4581_v62  ;;  %v1323_v12 = vadd.f32 %v1318_v10, %v1308_v41  ;;  %v1373_v48 = vsel %vm975_vm3, %v1371_v63, %v1372_v18  ;;  %v1262_v10 = vld [vmem:[#allocation2 + $0xc8] sm:$0x3]  ;;  %v1263_v7 = vld [vmem:[#allocation2 + $0xe0] sm:$0x3] }
 0x127   :  { %v1209_v24 = vadd.f32 %v1205_v51, %v1194_v6  ;;  %v3748_v6 = vmul.f32 %v4589_v43, %v3471_v29  ;;  %v1242_v14 = vmul.f32 %v1179_v17, %v3219_v45  ;;  %v1333_v40 = vsel %vm884_vm2, %v1331_v32, %v1332_v4  ;;  %v1427_v45 = vld [vmem:[#allocation2 + $0x78] sm:$0xf0]  ;;  %v1603_v21 = vld [vmem:[%s4358_s8 + $0xe0] sm:$0xff] }
 0x128   :  { %v1395_v5 = vmul.f32 %v1343_v35, %v3083_v30  ;;  %v3757_v62 = vmul.f32 %v3083_v30, %v3634_v49  ;;  %v1282_v36 = vmul.f32 %v1261_v13, %v4579_v50  ;;  %v4590_v63 = vrot.slane %v3599_v61, 1 }
 0x129   :  { %v1234_v2 = vrot.slane %v1227_v53, 1  ;;  %v1338_v51 = vadd.f32 %v1333_v40, %v1323_v12  ;;  %v1249_v41 = vrot.slane %v1242_v14, 1  ;;  %v1410_v32 = vmul.f32 %v1344_v60, %v3261_v22  ;;  %v1264_v14 = vld [vmem:[#allocation2 + $0x20] sm:$0x3] }
 0x12a   :  { %v1220_v29 = vsel %vm793_vm1, %v4590_v63, %v1219_v34  ;;  %v3766_v35 = vmul.f32 %v3261_v22, %v3636_v23  ;;  %v1388_v34 = vsel %vm975_vm3, %v1386_v28, %v1387_v27  ;;  %v1297_v13 = vmul.f32 %v1262_v10, %v4582_v59  ;;  %v1345_v63 = vld [vmem:[#allocation2 + $0xd0] sm:$0x7]  ;;  %v1346_v10 = vld [vmem:[#allocation2 + $0x98] sm:$0x7] }
 0x12b   :  { %v1224_v17 = vadd.f32 %v1220_v29, %v1209_v24  ;;  %v1235_v50 = vsel %vm793_vm1, %v1232_v54, %v1234_v2  ;;  %v1363_v61 = vadd.f32 %v3631_v25, %v1338_v51  ;;  %v1401_v53 = vrot.slane %v1395_v5, 3  ;;  %v1428_v51 = vld [vmem:[#allocation2 + $0xc0] sm:$0xf0] }
 0x12c   :  { %v1402_v12 = vrot.slane %v3757_v62, 3  ;;  %v3778_v60 = vmul.f32 %v1427_v45, %v3190_v56  ;;  %v1289_v40 = vrot.slane %v1282_v36, 2  ;;  %v1250_v11 = vsel %vm793_vm1, %v1247_v15, %v1249_v41  ;;  %v1429_v45 = vld [vmem:[#allocation2 + $0x10] sm:$0xf0]  ;;  %v1347_v41 = vld [vmem:[#allocation2 + $0xc8] sm:$0x7] }
 0x12d   :  { %v1239_v24 = vadd.f32 %v1235_v50, %v1224_v17  ;;  %v1378_v25 = vadd.f32 %v1373_v48, %v1363_v61  ;;  %v1312_v54 = vmul.f32 %v1263_v7, %v3059_v55  ;;  %v1416_v29 = vrot.slane %v1410_v32, 3  ;;  %v1635_v32 = vld [vmem:[%s4358_s8 + $0x1e0] sm:$0xff]  ;;  %v1605_v62 = vld [vmem:[%s4358_s8 + $0xf0] sm:$0xff] }
 0x12e   :  { %v1417_v59 = vrot.slane %v3766_v35, 3  ;;  %v1456_v5 = vrot.slane %v3740_v42, 4  ;;  %v1457_v36 = vrot.slane %v3748_v6, 4  ;;  %v1304_v17 = vrot.slane %v1297_v13, 2  ;;  %1649 = vmatpush.msra.mxu3 %v1635_v32  ;;  %v1638_v13 = vld [vmem:[%s4358_s8 + $0x1f8] sm:$0xff]  ;;  %v1623_v32 = vld [vmem:[%s4358_s8 + $0x180] sm:$0xff] }
 0x12f   :  { %v1254_v28 = vadd.f32 %v1250_v11, %v1239_v24  ;;  %v1393_v2 = vadd.f32 %v1388_v34, %v1378_v25  ;;  %v3788_v3 = vmul.f32 %v1264_v14, %v3257_v46  ;;  %v1403_v55 = vsel %vm975_vm3, %v1401_v53, %v1402_v12  ;;  %v1636_v46 = vld [vmem:[%s4358_s8 + $0x1e8] sm:$0xff]  ;;  %v1631_v24 = vld [vmem:[%s4358_s8 + $0x1c0] sm:$0xff]  ;;  %v1633_v11 = vld [vmem:[%s4358_s8 + $0x1d0] sm:$0xff]  ;;  %1736 = vmatpush.msrb.mxu1 %v1638_v13 }
 0x130   :  { %v3796_v48 = vmul.f32 %v3190_v56, %v3489_v58  ;;  %v1471_v42 = vrot.slane %v3778_v60, 4  ;;  %v4591_v50 = vrot.slane %v3648_v38, 2  ;;  %v1319_v61 = vrot.slane %v1312_v54, 2  ;;  %1678 = vmatpush.msrb.mxu0 %v1636_v46  ;;  %v1632_v38 = vld [vmem:[%s4358_s8 + $0x1c8] sm:$0xff]  ;;  %v1634_v25 = vld [vmem:[%s4358_s8 + $0x1d8] sm:$0xff]  ;;  %v1627_v54 = vld [vmem:[%s4358_s8 + $0x1a0] sm:$0xff]  ;;  %1650 = vmatpush.msra.mxu3 %v1631_v24 }
 0x131   :  { %v1279_v15 = vadd.f32 %v3718_v1, %v1254_v28  ;;  %v1637_v1 = vld [vmem:[%s4358_s8 + $0x1f0] sm:$0xff]  ;;  %v1408_v7 = vadd.f32 %v1403_v55, %v1393_v2  ;;  %v3812_v34 = vmul.f32 %v1345_v63, %v3002_v31  ;;  %v1418_v53 = vsel %vm975_vm3, %v1416_v29, %v1417_v59  ;;  %1737 = vmatpush.msrb.mxu1 %v1634_v25  ;;  %v1615_v25 = vld [vmem:[%s4358_s8 + $0x140] sm:$0xff] }
 0x132   :  { %v1290_v58 = vsel %vm884_vm2, %v4591_v50, %v1289_v40  ;;  %v3827_v31 = vmul.f32 %v1428_v51, %v3203_v57  ;;  %v3831_v14 = vmul.f32 %v3203_v57, %v3634_v49  ;;  %1707 = vmatpush.msrb.mxu2 %v1637_v1  ;;  %v4592_v28 = vrot.slane %v3681_v16, 2  ;;  %v1628_v51 = vld [vmem:[%s4358_s8 + $0x1a8] sm:$0xff]  ;;  %1679 = vmatpush.msrb.mxu0 %v1632_v38  ;;  %v1625_v50 = vld [vmem:[%s4358_s8 + $0x190] sm:$0xff] }
 0x133   :  { %v1294_v40 = vadd.f32 %v1290_v58, %v1279_v15  ;;  %v1423_v63 = vadd.f32 %v1418_v53, %v1408_v7  ;;  %v1334_v29 = vrot.slane %v3788_v3, 2  ;;  %v3847_v2 = vmul.f32 %v1346_v10, %v4584_v8  ;;  %v1629_v15 = vld [vmem:[%s4358_s8 + $0x1b0] sm:$0xff]  ;;  %v1348_v10 = vld [vmem:[#allocation2 + $0xe0] sm:$0x7]  ;;  %v1630_v3 = vld [vmem:[%s4358_s8 + $0x1b8] sm:$0xff]  ;;  %1651 = vmatpush.msra.mxu3 %v1627_v54 }
 0x134   :  { %v1305_v49 = vsel %vm884_vm2, %v4592_v28, %v1304_v17  ;;  %v1472_v55 = vrot.slane %v3796_v48, 4  ;;  %v3857_v16 = vmul.f32 %v1429_v45, %v3394_v44  ;;  %v3861_v17 = vmul.f32 %v3394_v44, %v3636_v23  ;;  %1708 = vmatpush.msrb.mxu2 %v1633_v11  ;;  %v1624_v7 = vld [vmem:[%s4358_s8 + $0x188] sm:$0xff]  ;;  %1680 = vmatpush.msrb.mxu0 %v1628_v51  ;;  %v1626_v58 = vld [vmem:[%s4358_s8 + $0x198] sm:$0xff]  ;;  %v1621_v53 = vld [vmem:[%s4358_s8 + $0x170] sm:$0xff] }
 0x135   :  { %v1309_v8 = vadd.f32 %v1305_v49, %v1294_v40  ;;  %v1448_v46 = vadd.f32 %v3730_v9, %v1423_v63  ;;  %v1320_v45 = vsel %vm884_vm2, %v1317_v19, %v1319_v61  ;;  %v1359_v23 = vrot.slane %v3812_v34, 3  ;;  %v1619_v61 = vld [vmem:[%s4358_s8 + $0x160] sm:$0xff]  ;;  %1738 = vmatpush.msrb.mxu1 %v1630_v3  ;;  %1652 = vmatpush.msra.mxu3 %v1623_v32  ;;  %v1620_v38 = vld [vmem:[%s4358_s8 + $0x168] sm:$0xff]  ;;  %v1430_v40 = vld [vmem:[#allocation2 + $0xd0] sm:$0xf] }
 0x136   :  { %v3875_v1 = vmul.f32 %v1347_v41, %v4585_v33  ;;  %v1458_v47 = vsel %vm1066_vm4, %v1456_v5, %v1457_v36  ;;  %v1486_v19 = vrot.slane %v3827_v31, 4  ;;  %v1487_v9 = vrot.slane %v3831_v14, 4  ;;  %v1349_v41 = vld [vmem:[#allocation2 + $0x20] sm:$0x7]  ;;  %1709 = vmatpush.msrb.mxu2 %v1629_v15  ;;  %1681 = vmatpush.msrb.mxu0 %v1624_v7  ;;  %v1622_v11 = vld [vmem:[%s4358_s8 + $0x178] sm:$0xff]  ;;  %v1616_v49 = vld [vmem:[%s4358_s8 + $0x148] sm:$0xff] }
 0x137   :  { %v1324_v33 = vadd.f32 %v1320_v45, %v1309_v8  ;;  %v1463_v34 = vadd.f32 %v1458_v47, %v1448_v46  ;;  %v1335_v5 = vsel %vm884_vm2, %v1332_v4, %v1334_v29  ;;  %v1374_v13 = vrot.slane %v3847_v2, 3  ;;  %1739 = vmatpush.msrb.mxu1 %v1626_v58  ;;  %1653 = vmatpush.msra.mxu3 %v1619_v61  ;;  %v1617_v29 = vld [vmem:[%s4358_s8 + $0x150] sm:$0xff]  ;;  %v1431_v51 = vld [vmem:[#allocation2 + $0x98] sm:$0xf]  ;;  %v1611_v15 = vld [vmem:[%s4358_s8 + $0x120] sm:$0xff] }
 0x138   :  { %v1397_v24 = vmul.f32 %v1348_v10, %v3083_v30  ;;  %v1473_v0 = vsel %vm1066_vm4, %v1471_v42, %v1472_v55  ;;  %v1501_v4 = vrot.slane %v3857_v16, 4  ;;  %v1502_v30 = vrot.slane %v3861_v17, 4  ;;  %1710 = vmatpush.msrb.mxu2 %v1625_v50  ;;  %1682 = vmatpush.msrb.mxu0 %v1620_v38  ;;  %v1612_v32 = vld [vmem:[%s4358_s8 + $0x128] sm:$0xff]  ;;  %v1613_v46 = vld [vmem:[%s4358_s8 + $0x130] sm:$0xff]  ;;  %v1433_v58 = vld [vmem:[#allocation2 + $0xe0] sm:$0xf] }
 0x139   :  { %v1339_v31 = vadd.f32 %v1335_v5, %v1324_v33  ;;  %v1478_v54 = vadd.f32 %v1473_v0, %v1463_v34  ;;  %v4593_v60 = vrot.slane %v3570_v37, 3  ;;  %v1389_v63 = vrot.slane %v3875_v1, 3  ;;  %1740 = vmatpush.msrb.mxu1 %v1622_v11  ;;  %1654 = vmatpush.msra.mxu3 %v1615_v25  ;;  %v1609_v33 = vld [vmem:[%s4358_s8 + $0x110] sm:$0xff]  ;;  %v1610_v5 = vld [vmem:[%s4358_s8 + $0x118] sm:$0xff]  ;;  %v1434_v38 = vld [vmem:[#allocation2 + $0x20] sm:$0xf] }
 0x13a   :  { %v1412_v28 = vmul.f32 %v1349_v41, %v3261_v22  ;;  %v1488_v37 = vsel %vm1066_vm4, %v1486_v19, %v1487_v9  ;;  %1711 = vmatpush.msrb.mxu2 %v1621_v53  ;;  %v1618_v22 = vld [vmem:[%s4358_s8 + $0x158] sm:$0xff]  ;;  %v1375_v8 = vsel %vm975_vm3, %v1372_v18, %v1374_v13  ;;  %v1404_v10 = vrot.slane %v1397_v24, 3  ;;  %1683 = vmatpush.msrb.mxu0 %v1616_v49  ;;  %v1607_v18 = vld [vmem:[%s4358_s8 + $0x100] sm:$0xff]  ;;  %v1608_v19 = vld [vmem:[%s4358_s8 + $0x108] sm:$0xff] }
 0x13b   :  { %v1360_v42 = vsel %vm975_vm3, %v4593_v60, %v1359_v23  ;;  %v1493_v16 = vadd.f32 %v1488_v37, %v1478_v54  ;;  %v1437_v3 = vmul.f32 %v1430_v40, %v4572_v26  ;;  %v1503_v45 = vsel %vm1066_vm4, %v1501_v4, %v1502_v30  ;;  %v1432_v23 = vld [vmem:[#allocation2 + $0xc8] sm:$0xf]  ;;  %v1614_v26 = vld [vmem:[%s4358_s8 + $0x138] sm:$0xff]  ;;  %1741 = vmatpush.msrb.mxu1 %v1618_v22  ;;  %v1601_v35 = vld [vmem:[%s4358_s8 + $0xd0] sm:$0xff] }
 0x13c   :  { %v1364_v2 = vadd.f32 %v1360_v42, %v1339_v31  ;;  %1712 = vmatpush.msrb.mxu2 %v1617_v29  ;;  %v1390_v7 = vsel %vm975_vm3, %v1387_v27, %v1389_v63  ;;  %v1419_v50 = vrot.slane %v1412_v28, 3  ;;  %v1452_v47 = vmul.f32 %v1431_v51, %v4589_v43  ;;  %1655 = vmatpush.msra.mxu3 %v1611_v15  ;;  %v1604_v13 = vld [vmem:[%s4358_s8 + $0xe8] sm:$0xff]  ;;  %v1606_v4 = vld [vmem:[%s4358_s8 + $0xf8] sm:$0xff]  ;;  %v1593_v6 = vld [vmem:[%s4358_s8 + $0x90] sm:$0xff] }
 0x13d   :  { %v1508_v1 = vadd.f32 %v1503_v45, %v1493_v16  ;;  %1684 = vmatpush.msrb.mxu0 %v1612_v32  ;;  %v1405_v27 = vsel %vm975_vm3, %v1402_v12, %v1404_v10  ;;  %v1444_v61 = vrot.slane %v1437_v3, 4  ;;  %v1467_v34 = vmul.f32 %v1432_v23, %v3190_v56  ;;  %1742 = vmatpush.msrb.mxu1 %v1614_v26  ;;  %v1599_v56 = vld [vmem:[%s4358_s8 + $0xc0] sm:$0xff]  ;;  %v1600_v31 = vld [vmem:[%s4358_s8 + $0xc8] sm:$0xff]  ;;  %v1602_v60 = vld [vmem:[%s4358_s8 + $0xd8] sm:$0xff] }
 0x13e   :  { %v1379_v39 = vadd.f32 %v1375_v8, %v1364_v2  ;;  %1713 = vmatpush.msrb.mxu2 %v1613_v46  ;;  %1656 = vmatpush.msra.mxu3 %v1607_v18  ;;  %v1420_v12 = vsel %vm975_vm3, %v1417_v59, %v1419_v50  ;;  %v1459_v53 = vrot.slane %v1452_v47, 4  ;;  %v1482_v0 = vmul.f32 %v1433_v58, %v3203_v57  ;;  %v1595_v57 = vld [vmem:[%s4358_s8 + $0xa0] sm:$0xff]  ;;  %v1596_v42 = vld [vmem:[%s4358_s8 + $0xa8] sm:$0xff]  ;;  %v1598_v29 = vld [vmem:[%s4358_s8 + $0xb8] sm:$0xff] }
 0x13f   :  { %v1516_v43 = vadd.f32 %v3561_v52, %v1508_v1  ;;  %1685 = vmatpush.msrb.mxu0 %v1608_v19  ;;  %1743 = vmatpush.msrb.mxu1 %v1610_v5  ;;  %v4594_v59 = vrot.slane %v3588_v20, 4  ;;  %v1474_v25 = vrot.slane %v1467_v34, 4  ;;  %v1497_v54 = vmul.f32 %v1434_v38, %v3394_v44  ;;  %v1597_v20 = vld [vmem:[%s4358_s8 + $0xb0] sm:$0xff]  ;;  %v1591_v44 = vld [vmem:[%s4358_s8 + $0x80] sm:$0xff]  ;;  %v1592_v37 = vld [vmem:[%s4358_s8 + $0x88] sm:$0xff] }
 0x140   :  { %v1394_v41 = vadd.f32 %v1390_v7, %v1379_v39  ;;  %1714 = vmatpush.msrb.mxu2 %v1609_v33  ;;  %1657 = vmatpush.msra.mxu3 %v1603_v21  ;;  %v1460_v28 = vsel %vm1066_vm4, %v1457_v36, %v1459_v53  ;;  %v1489_v49 = vrot.slane %v1482_v0, 4  ;;  %v1587_v36 = vld [vmem:[%s4358_s8 + $0x60] sm:$0xff]  ;;  %v1594_v15 = vld [vmem:[%s4358_s8 + $0x98] sm:$0xff]  ;;  %v1588_v16 = vld [vmem:[%s4358_s8 + $0x68] sm:$0xff] }
 0x141   :  { %1564 = vmatmul.f32.gmra.mxu1 %v1516_v43  ;;  %1686 = vmatpush.msrb.mxu0 %v1604_v13  ;;  %v1445_v11 = vsel %vm1066_vm4, %v4594_v59, %v1444_v61  ;;  %v1475_v51 = vsel %vm1066_vm4, %v1472_v55, %v1474_v25  ;;  %v1504_v22 = vrot.slane %v1497_v54, 4  ;;  %v1589_v48 = vld [vmem:[%s4358_s8 + $0x70] sm:$0xff]  ;;  %v1590_v10 = vld [vmem:[%s4358_s8 + $0x78] sm:$0xff]  ;;  %v1584_v45 = vld [vmem:[%s4358_s8 + $0x48] sm:$0xff] }
 0x142   :  { %v1409_v24 = vadd.f32 %v1405_v27, %v1394_v41  ;;  %1715 = vmatpush.msrb.mxu2 %v1605_v62  ;;  %1658 = vmatpush.msra.mxu3 %v1599_v56  ;;  %v1490_v55 = vsel %vm1066_vm4, %v1487_v9, %v1489_v49  ;;  %v1583_v9 = vld [vmem:[%s4358_s8 + $0x40] sm:$0xff]  ;;  %v1585_v17 = vld [vmem:[%s4358_s8 + $0x50] sm:$0xff]  ;;  %v1580_v39 = vld [vmem:[%s4358_s8 + $0x28] sm:$0xff] }
 0x143   :  { %1744 = vmatpush.msrb.mxu1 %v1606_v4  ;;  %1687 = vmatpush.msrb.mxu0 %v1600_v31  ;;  %v1505_v32 = vsel %vm1066_vm4, %v1502_v30, %v1504_v22  ;;  %v1586_v30 = vld [vmem:[%s4358_s8 + $0x58] sm:$0xff]  ;;  %v1581_v23 = vld [vmem:[%s4358_s8 + $0x30] sm:$0xff]  ;;  %v1575_v18 = vld [vmem:[%s4358_s8] sm:$0xff] }
 0x144   :  { %v1424_v40 = vadd.f32 %v1420_v12, %v1409_v24  ;;  %1716 = vmatpush.msrb.mxu2 %v1601_v35  ;;  %1659 = vmatpush.msra.mxu3 %v1595_v57  ;;  %v1582_v26 = vld [vmem:[%s4358_s8 + $0x38] sm:$0xff]  ;;  %v1576_v1 = vld [vmem:[%s4358_s8 + $0x8] sm:$0xff]  ;;  %v1577_v7 = vld [vmem:[%s4358_s8 + $0x10] sm:$0xff] }
 0x145   :  { %1745 = vmatpush.msrb.mxu1 %v1602_v60  ;;  %1688 = vmatpush.msrb.mxu0 %v1596_v42  ;;  %v1578_v50 = vld [vmem:[%s4358_s8 + $0x18] sm:$0xff]  ;;  %v4095_v47 = vld [vmem:[%s4357_s7] ss:$0 sm:$0xff]  ;;  %v1519_v21 = vld [vmem:[%s4359_s1 + $0x8] sm:$0xff] }
 0x146   :  { %v1449_v63 = vadd.f32 %v1445_v11, %v1424_v40  ;;  %1717 = vmatpush.msrb.mxu2 %v1597_v20  ;;  %1660 = vmatpush.msra.mxu3 %v1591_v44  ;;  %v1518_v19 = vld [vmem:[%s4359_s1] sm:$0xff]  ;;  %v1812_v34 = vld [vmem:[%s4360_s10 + $0xf8] sm:$0xff]  ;;  %v1811_v13 = vld [vmem:[%s4360_s10 + $0xf0] sm:$0xff] }
 0x147   :  { %1746 = vmatpush.msrb.mxu1 %v1598_v29  ;;  %1689 = vmatpush.msrb.mxu0 %v1592_v37  ;;  %v1844_v5 = vld [vmem:[%s4360_s10 + $0x1f8] sm:$0xff]  ;;  %v1843_v24 = vld [vmem:[%s4360_s10 + $0x1f0] sm:$0xff]  ;;  %v1810_v38 = vld [vmem:[%s4360_s10 + $0xe8] sm:$0xff] }
 0x148   :  { %v1464_v2 = vadd.f32 %v1460_v28, %v1449_v63  ;;  %1718 = vmatpush.msrb.mxu2 %v1593_v6  ;;  %1661 = vmatpush.msra.mxu3 %v1587_v36  ;;  %v1842_v62 = vld [vmem:[%s4360_s10 + $0x1e8] sm:$0xff]  ;;  %v1796_v56 = vld [vmem:[%s4360_s10 + $0x78] sm:$0xff]  ;;  %v1795_v53 = vld [vmem:[%s4360_s10 + $0x70] sm:$0xff] }
 0x149   :  { %1747 = vmatpush.msrb.mxu1 %v1594_v15  ;;  %1690 = vmatpush.msrb.mxu0 %v1588_v16  ;;  %v1828_v12 = vld [vmem:[%s4360_s10 + $0x178] sm:$0xff]  ;;  %v1809_v0 = vld [vmem:[%s4360_s10 + $0xe0] sm:$0xff]  ;;  %v1827_v31 = vld [vmem:[%s4360_s10 + $0x170] sm:$0xff] }
 0x14a   :  { %v1479_v8 = vadd.f32 %v1475_v51, %v1464_v2  ;;  %1719 = vmatpush.msrb.mxu2 %v1589_v48  ;;  %1662 = vmatpush.msra.mxu3 %v1583_v9  ;;  %v1841_v4 = vld [vmem:[%s4360_s10 + $0x1e0] sm:$0xff]  ;;  %v1794_v40 = vld [vmem:[%s4360_s10 + $0x68] sm:$0xff]  ;;  %v1808_v57 = vld [vmem:[%s4360_s10 + $0xd8] sm:$0xff] }
 0x14b   :  { %1748 = vmatpush.msrb.mxu1 %v1590_v10  ;;  %1691 = vmatpush.msrb.mxu0 %v1584_v45  ;;  %v1826_v35 = vld [vmem:[%s4360_s10 + $0x168] sm:$0xff]  ;;  %v1840_v59 = vld [vmem:[%s4360_s10 + $0x1d8] sm:$0xff]  ;;  %v1793_v11 = vld [vmem:[%s4360_s10 + $0x60] sm:$0xff] }
 0x14c   :  { %v1494_v3 = vadd.f32 %v1490_v55, %v1479_v8  ;;  %1720 = vmatpush.msrb.mxu2 %v1585_v17  ;;  %v1825_v25 = vld [vmem:[%s4360_s10 + $0x160] sm:$0xff]  ;;  %v1807_v54 = vld [vmem:[%s4360_s10 + $0xd0] sm:$0xff]  ;;  %v1792_v42 = vld [vmem:[%s4360_s10 + $0x58] sm:$0xff] }
 0x14d   :  { %1749 = vmatpush.msrb.mxu1 %v1586_v30  ;;  %1692 = vmatpush.msrb.mxu0 %v1580_v39  ;;  %v1839_v60 = vld [vmem:[%s4360_s10 + $0x1d0] sm:$0xff]  ;;  %v1824_v63 = vld [vmem:[%s4360_s10 + $0x158] sm:$0xff]  ;;  %v1806_v20 = vld [vmem:[%s4360_s10 + $0xc8] sm:$0xff] }
 0x14e   :  { %v1509_v46 = vadd.f32 %v1505_v32, %v1494_v3  ;;  %1721 = vmatpush.msrb.mxu2 %v1581_v23  ;;  %v1838_v44 = vld [vmem:[%s4360_s10 + $0x1c8] sm:$0xff]  ;;  %v1520_v28 = vld [vmem:[%s4359_s1 + $0x10] sm:$0xff]  ;;  %v1805_v6 = vld [vmem:[%s4360_s10 + $0xc0] sm:$0xff] }
 0x14f   :  { %1750 = vmatpush.msrb.mxu1 %v1582_v26  ;;  %1693 = vmatpush.msrb.mxu0 %v1576_v1  ;;  %v1791_v29 = vld [vmem:[%s4360_s10 + $0x50] sm:$0xff]  ;;  %v1837_v36 = vld [vmem:[%s4360_s10 + $0x1c0] sm:$0xff]  ;;  %v1804_v22 = vld [vmem:[%s4360_s10 + $0xb8] sm:$0xff] }
 0x150   :  { %v1517_v14 = vadd.f32 %v3561_v52, %v1509_v46  ;;  %v1579_v52 = vld [vmem:[%s4358_s8 + $0x20] sm:$0xff]  ;;  %1722 = vmatpush.msrb.mxu2 %v1577_v7  ;;  %v1823_v37 = vld [vmem:[%s4360_s10 + $0x150] sm:$0xff]  ;;  %v1836_v15 = vld [vmem:[%s4360_s10 + $0x1b8] sm:$0xff] }
 0x151   :  { %1663 = vmatpush.msra.mxu3 %v1579_v52  ;;  %1751 = vmatpush.msrb.mxu1 %v1578_v50  ;;  %v1790_v16 = vld [vmem:[%s4360_s10 + $0x48] sm:$0xff]  ;;  %v1803_v48 = vld [vmem:[%s4360_s10 + $0xb0] sm:$0xff]  ;;  %v1789_v10 = vld [vmem:[%s4360_s10 + $0x40] sm:$0xff] }
 0x152   :  { %1567 = vmatmul.f32.gmra.mxu1 %v1517_v14  ;;  %1878 = vmatpush.msra.mxu0 %v1812_v34  ;;  %v1822_v8 = vld [vmem:[%s4360_s10 + $0x148] sm:$0xff]  ;;  %v1835_v55 = vld [vmem:[%s4360_s10 + $0x1b0] sm:$0xff]  ;;  %v1821_v3 = vld [vmem:[%s4360_s10 + $0x140] sm:$0xff] }
 0x153   :  { %1664 = vmatpush.msra.mxu3 %v1575_v18  ;;  %1936 = vmatpush.msra.mxu1 %v1844_v5  ;;  %v1802_v32 = vld [vmem:[%s4360_s10 + $0xa8] sm:$0xff]  ;;  %v1788_v14 = vld [vmem:[%s4360_s10 + $0x38] sm:$0xff]  ;;  %v1801_v45 = vld [vmem:[%s4360_s10 + $0xa0] sm:$0xff] }
 0x154   :  { %1879 = vmatpush.msra.mxu0 %v1811_v13  ;;  %1907 = vmatpush.msra.mxu2 %v1828_v12  ;;  %v1834_v46 = vld [vmem:[%s4360_s10 + $0x1a8] sm:$0xff]  ;;  %v1820_v9 = vld [vmem:[%s4360_s10 + $0x138] sm:$0xff]  ;;  %v1833_v17 = vld [vmem:[%s4360_s10 + $0x1a0] sm:$0xff] }
 0x155   :  { %1937 = vmatpush.msra.mxu1 %v1843_v24  ;;  %1849 = vmatpush.msrb.mxu3 %v1796_v56  ;;  %v1787_v30 = vld [vmem:[%s4360_s10 + $0x30] sm:$0xff]  ;;  %v1800_v39 = vld [vmem:[%s4360_s10 + $0x98] sm:$0xff]  ;;  %v1786_v50 = vld [vmem:[%s4360_s10 + $0x28] sm:$0xff] }
 0x156   :  { %1880 = vmatpush.msra.mxu0 %v1810_v38  ;;  %1908 = vmatpush.msra.mxu2 %v1827_v31  ;;  %v1819_v52 = vld [vmem:[%s4360_s10 + $0x130] sm:$0xff]  ;;  %v1832_v23 = vld [vmem:[%s4360_s10 + $0x198] sm:$0xff]  ;;  %v1797_v5 = vld [vmem:[%s4360_s10 + $0x80] sm:$0xff] }
 0x157   :  { %1938 = vmatpush.msra.mxu1 %v1842_v62  ;;  %1850 = vmatpush.msrb.mxu3 %v1795_v53  ;;  %v1521_v26 = vld [vmem:[%s4359_s1 + $0x18] sm:$0xff]  ;;  %v1829_v24 = vld [vmem:[%s4360_s10 + $0x180] sm:$0xff]  ;;  %v1783_v38 = vld [vmem:[%s4360_s10 + $0x10] sm:$0xff] }
 0x158   :  { %1881 = vmatpush.msra.mxu0 %v1809_v0  ;;  %1909 = vmatpush.msra.mxu2 %v1826_v35  ;;  %v1784_v34 = vld [vmem:[%s4360_s10 + $0x18] sm:$0xff]  ;;  %v1815_v62 = vld [vmem:[%s4360_s10 + $0x110] sm:$0xff]  ;;  %v1782_v56 = vld [vmem:[%s4360_s10 + $0x8] sm:$0xff] }
 0x159   :  { %1939 = vmatpush.msra.mxu1 %v1841_v4  ;;  %1851 = vmatpush.msrb.mxu3 %v1794_v40  ;;  %v1816_v13 = vld [vmem:[%s4360_s10 + $0x118] sm:$0xff]  ;;  %v1814_v12 = vld [vmem:[%s4360_s10 + $0x108] sm:$0xff]  ;;  %v1781_v53 = vld [vmem:[%s4360_s10] sm:$0xff] }
 0x15a   :  { %1882 = vmatpush.msra.mxu0 %v1808_v57  ;;  %1910 = vmatpush.msra.mxu2 %v1825_v25  ;;  %v1813_v0 = vld [vmem:[%s4360_s10 + $0x100] sm:$0xff] }
 0x15b   :  { %1940 = vmatpush.msra.mxu1 %v1840_v59  ;;  %1852 = vmatpush.msrb.mxu3 %v1793_v11  ;;  %v1639_v4 = vld [vmem:[%s4361_s9] sm:$0xf] }
 0x15c   :  { %1883 = vmatpush.msra.mxu0 %v1807_v54  ;;  %1911 = vmatpush.msra.mxu2 %v1824_v63  ;;  %v1642_v31 = vperm.slane %v1639_v4, 1  ;;  %v1644_v40 = vperm.slane %v1639_v4, 3  ;;  %v1641_v54 = vperm.slane %v1639_v4, 0 }
 0x15d   :  { %1941 = vmatpush.msra.mxu1 %v1839_v60  ;;  %1853 = vmatpush.msrb.mxu3 %v1792_v42  ;;  %v1643_v42 = vperm.slane %v1639_v4, 2 }
 0x15e   :  { %1884 = vmatpush.msra.mxu0 %v1806_v20  ;;  %1912 = vmatpush.msra.mxu2 %v1823_v37 }
 0x15f   :  { %1942 = vmatpush.msra.mxu1 %v1838_v44  ;;  %1854 = vmatpush.msrb.mxu3 %v1791_v29 }
 0x160   :  { %1885 = vmatpush.msra.mxu0 %v1805_v6  ;;  %1913 = vmatpush.msra.mxu2 %v1822_v8 }
 0x161   :  { %1943 = vmatpush.msra.mxu1 %v1837_v36  ;;  %1855 = vmatpush.msrb.mxu3 %v1790_v16 }
 0x162   :  { %1886 = vmatpush.msra.mxu0 %v1804_v22  ;;  %1914 = vmatpush.msra.mxu2 %v1821_v3 }
 0x163   :  { %1944 = vmatpush.msra.mxu1 %v1836_v15  ;;  %1856 = vmatpush.msrb.mxu3 %v1789_v10 }
 0x164   :  { %1887 = vmatpush.msra.mxu0 %v1803_v48  ;;  %1915 = vmatpush.msra.mxu2 %v1820_v9 }
 0x165   :  { %1945 = vmatpush.msra.mxu1 %v1835_v55  ;;  %1857 = vmatpush.msrb.mxu3 %v1788_v14 }
 0x166   :  { %1888 = vmatpush.msra.mxu0 %v1802_v32  ;;  %1916 = vmatpush.msra.mxu2 %v1819_v52 }
 0x167   :  { %1946 = vmatpush.msra.mxu1 %v1834_v46  ;;  %1858 = vmatpush.msrb.mxu3 %v1787_v30 }
 0x168   :  { %1889 = vmatpush.msra.mxu0 %v1801_v45 }
 0x169   :  { %1947 = vmatpush.msra.mxu1 %v1833_v17  ;;  %1859 = vmatpush.msrb.mxu3 %v1786_v50 }
 0x16a   :  { %1890 = vmatpush.msra.mxu0 %v1800_v39 }
 0x16b   :  { %1948 = vmatpush.msra.mxu1 %v1832_v23 }
 0x18b   :  { %v1559_v33 = vpop.f32.mrf.mxu1 }
 0x18c   :  { %v1560_v41 = vadd.f32 %v4095_v47, %v1559_v33  ;;  %v1831_v33 = vld [vmem:[%s4360_s10 + $0x190] sm:$0xff] }
 0x18d   :  { %1949 = vmatpush.msra.mxu1 %v1831_v33 }
 0x18e   :  { %v4101_v58 = vadd.f32 %v1560_v41, %v1518_v19  ;;  %v1799_v19 = vld [vmem:[%s4360_s10 + $0x90] sm:$0xff]  ;;  %v1785_v41 = vld [vmem:[%s4360_s10 + $0x20] sm:$0xff] }
 0x18f   :  { %1891 = vmatpush.msra.mxu0 %v1799_v19  ;;  %1860 = vmatpush.msrb.mxu3 %v1785_v41 }
 0x190   :  { %1665 = vmatmul.f32.vlgmr.msra.gmra.mxu3 %v4101_v58  ;;  %1694 = vmatmul.f32.vlgmr.msrb.gmra.mxu0 %v4101_v58 }
 0x191   :  { %1723 = vmatmul.f32.vlgmr.msrb.gmra.mxu2 %v4101_v58  ;;  %1752 = vmatmul.f32.vlgmr.msrb.gmra.mxu1 %v4101_v58 }
 0x192   :  { %1861 = vmatpush.msrb.mxu3 %v1784_v34 }
 0x194   :  { %1862 = vmatpush.msrb.mxu3 %v1783_v38 }
 0x196   :  { %1863 = vmatpush.msrb.mxu3 %v1782_v56 }
 0x198   :  { %1864 = vmatpush.msrb.mxu3 %v1781_v53 }
 0x19a   :  { %v1562_v43 = vpop.f32.mrf.mxu1 }
 0x19b   :  { %v1563_v27 = vadd.f32 %v4095_v47, %v1562_v43  ;;  %v1817_v43 = vld [vmem:[%s4360_s10 + $0x120] sm:$0xff] }
 0x19d   :  { %v4111_v61 = vadd.f32 %v1563_v27, %v1519_v21  ;;  %v1798_v21 = vld [vmem:[%s4360_s10 + $0x88] sm:$0xff] }
 0x19e   :  { %v1830_v27 = vld [vmem:[%s4360_s10 + $0x188] sm:$0xff]  ;;  %1892 = vmatpush.msra.mxu0 %v1798_v21 }
 0x19f   :  { %1668 = vmatmul.f32.gmra.mxu3 %v4111_v61  ;;  %1697 = vmatmul.f32.gmra.mxu0 %v4111_v61 }
 0x1a0   :  { %1726 = vmatmul.f32.gmra.mxu2 %v4111_v61  ;;  %1755 = vmatmul.f32.gmra.mxu1 %v4111_v61 }
 0x1a1   :  { %1950 = vmatpush.msra.mxu1 %v1830_v27  ;;  %1893 = vmatpush.msra.mxu0 %v1797_v5 }
 0x1a3   :  { %1951 = vmatpush.msra.mxu1 %v1829_v24  ;;  %v2015_v24 = vld [vmem:[%s4362_s11] ss:$0 sm:$0xff] }
 0x1be   :  { %v1565_v49 = vpop.f32.mrf.mxu1 }
 0x1bf   :  { %v1566_v2 = vadd.f32 %v4095_v47, %v1565_v49 }
 0x1c1   :  { %v4205_v51 = vadd.f32 %v1566_v2, %v1520_v28 }
 0x1c3   :  { %1671 = vmatmul.f32.gmra.mxu3 %v4205_v51  ;;  %1700 = vmatmul.f32.gmra.mxu0 %v4205_v51 }
 0x1c4   :  { %1729 = vmatmul.f32.gmra.mxu2 %v4205_v51  ;;  %1758 = vmatmul.f32.gmra.mxu1 %v4205_v51 }
 0x1cf   :  { %v1568_v18 = vpop.f32.mrf.mxu1 }
 0x1d0   :  { %v1569_v1 = vadd.f32 %v4095_v47, %v1568_v18  ;;  %v1818_v47 = vld [vmem:[%s4360_s10 + $0x128] sm:$0xff] }
 0x1d1   :  { %1917 = vmatpush.msra.mxu2 %v1818_v47 }
 0x1d2   :  { %v4269_v7 = vadd.f32 %v1569_v1, %v1521_v26 }
 0x1d3   :  { %1918 = vmatpush.msra.mxu2 %v1817_v43 }
 0x1d4   :  { %1674 = vmatmul.f32.gmra.mxu3 %v4269_v7  ;;  %1703 = vmatmul.f32.gmra.mxu0 %v4269_v7 }
 0x1d5   :  { %1732 = vmatmul.f32.gmra.mxu2 %v4269_v7  ;;  %1761 = vmatmul.f32.gmra.mxu1 %v4269_v7 }
 0x1d6   :  { %1919 = vmatpush.msra.mxu2 %v1816_v13 }
 0x1d8   :  { %1920 = vmatpush.msra.mxu2 %v1815_v62 }
 0x1da   :  { %1921 = vmatpush.msra.mxu2 %v1814_v12 }
 0x1dc   :  { %1922 = vmatpush.msra.mxu2 %v1813_v0 }
 0x20d   :  { %v1695_v35 = vpop.f32.mrf.mxu0 }
 0x20e   :  { %v1696_v57 = vadd.f32 %v1695_v35, %v1642_v31  ;;  %v1753_v59 = vpop.f32.mrf.mxu1 }
 0x20f   :  { %v1754_v11 = vadd.f32 %v1753_v59, %v1644_v40 }
 0x210   :  { %v1766_v25 = vmax.f32 %v1696_v57, 0.0 }
 0x211   :  { %v1768_v60 = vmax.f32 %v1754_v11, 0.0 }
 0x212   :  { %1894 = vmatmul.f32.vlgmr.msra.gmra.mxu0 %v1766_v25 }
 0x213   :  { %1952 = vmatmul.f32.vlgmr.msra.gmra.mxu1 %v1768_v60  ;;  %v1666_v63 = vpop.f32.mrf.mxu3 }
 0x214   :  { %v1667_v20 = vadd.f32 %v1666_v63, %v1641_v54  ;;  %v1724_v44 = vpop.f32.mrf.mxu2 }
 0x215   :  { %v1725_v28 = vadd.f32 %v1724_v44, %v1643_v42 }
 0x216   :  { %v1765_v49 = vmax.f32 %v1667_v20, 0.0 }
 0x217   :  { %v1767_v29 = vmax.f32 %v1725_v28, 0.0 }
 0x218   :  { %1865 = vmatmul.f32.vlgmr.msrb.gmra.mxu3 %v1765_v49 }
 0x219   :  { %1923 = vmatmul.f32.vlgmr.msra.gmra.mxu2 %v1767_v29 }
 0x21c   :  { %v1698_v37 = vpop.f32.mrf.mxu0 }
 0x21d   :  { %v1699_v2 = vadd.f32 %v1698_v37, %v1642_v31  ;;  %v1756_v6 = vpop.f32.mrf.mxu1 }
 0x21e   :  { %v1757_v36 = vadd.f32 %v1756_v6, %v1644_v40 }
 0x21f   :  { %v1770_v22 = vmax.f32 %v1699_v2, 0.0 }
 0x220   :  { %v1772_v15 = vmax.f32 %v1757_v36, 0.0 }
 0x221   :  { %1897 = vmatmul.f32.gmra.mxu0 %v1770_v22 }
 0x222   :  { %1955 = vmatmul.f32.gmra.mxu1 %v1772_v15  ;;  %v1669_v16 = vpop.f32.mrf.mxu3 }
 0x223   :  { %v1670_v8 = vadd.f32 %v1669_v16, %v1641_v54  ;;  %v1727_v48 = vpop.f32.mrf.mxu2 }
 0x224   :  { %v1728_v55 = vadd.f32 %v1727_v48, %v1643_v42 }
 0x225   :  { %v1769_v10 = vmax.f32 %v1670_v8, 0.0 }
 0x226   :  { %v1771_v3 = vmax.f32 %v1728_v55, 0.0 }
 0x227   :  { %1868 = vmatmul.f32.gmra.mxu3 %v1769_v10 }
 0x228   :  { %1926 = vmatmul.f32.gmra.mxu2 %v1771_v3 }
 0x240   :  { %v1701_v32 = vpop.f32.mrf.mxu0 }
 0x241   :  { %v1702_v46 = vadd.f32 %v1701_v32, %v1642_v31  ;;  %v1759_v14 = vpop.f32.mrf.mxu1 }
 0x242   :  { %v1760_v9 = vadd.f32 %v1759_v14, %v1644_v40 }
 0x243   :  { %v1774_v45 = vmax.f32 %v1702_v46, 0.0 }
 0x244   :  { %v1776_v17 = vmax.f32 %v1760_v9, 0.0 }
 0x245   :  { %1900 = vmatmul.f32.gmra.mxu0 %v1774_v45 }
 0x246   :  { %1958 = vmatmul.f32.gmra.mxu1 %v1776_v17  ;;  %v1672_v30 = vpop.f32.mrf.mxu3 }
 0x247   :  { %v1673_v52 = vadd.f32 %v1672_v30, %v1641_v54  ;;  %v1730_v39 = vpop.f32.mrf.mxu2 }
 0x248   :  { %v1731_v23 = vadd.f32 %v1730_v39, %v1643_v42 }
 0x249   :  { %v1773_v26 = vmax.f32 %v1673_v52, 0.0 }
 0x24a   :  { %v1775_v18 = vmax.f32 %v1731_v23, 0.0 }
 0x24b   :  { %1871 = vmatmul.f32.gmra.mxu3 %v1773_v26 }
 0x24c   :  { %1929 = vmatmul.f32.gmra.mxu2 %v1775_v18 }
 0x251   :  { %v1704_v1 = vpop.f32.mrf.mxu0 }
 0x252   :  { %v1705_v50 = vadd.f32 %v1704_v1, %v1642_v31  ;;  %v1762_v19 = vpop.f32.mrf.mxu1 }
 0x253   :  { %v1763_v47 = vadd.f32 %v1762_v19, %v1644_v40 }
 0x254   :  { %v1778_v33 = vmax.f32 %v1705_v50, 0.0 }
 0x255   :  { %v1780_v41 = vmax.f32 %v1763_v47, 0.0 }
 0x256   :  { %1903 = vmatmul.f32.gmra.mxu0 %v1778_v33 }
 0x257   :  { %1961 = vmatmul.f32.gmra.mxu1 %v1780_v41  ;;  %v1675_v21 = vpop.f32.mrf.mxu3 }
 0x258   :  { %v1676_v43 = vadd.f32 %v1675_v21, %v1641_v54  ;;  %v1733_v27 = vpop.f32.mrf.mxu2 }
 0x259   :  { %v1734_v34 = vadd.f32 %v1733_v27, %v1643_v42 }
 0x25a   :  { %v1777_v5 = vmax.f32 %v1676_v43, 0.0 }
 0x25b   :  { %v1779_v13 = vmax.f32 %v1734_v34, 0.0 }
 0x25c   :  { %1874 = vmatmul.f32.gmra.mxu3 %v1777_v5 }
 0x25d   :  { %1932 = vmatmul.f32.gmra.mxu2 %v1779_v13 }
 0x28f   :  { %v1895_v56 = vpop.f32.mrf.mxu0 }
 0x290   :  { %v1953_v4 = vpop.f32.mrf.mxu1 }
 0x29b   :  { %v1866_v38 = vpop.f32.mrf.mxu3 }
 0x29c   :  { %v1867_v62 = vadd.f32 %v2015_v24, %v1866_v38  ;;  %v1924_v53 = vpop.f32.mrf.mxu2 }
 0x29e   :  { %v1896_v12 = vadd.f32 %v1895_v56, %v1867_v62  ;;  %v1898_v59 = vpop.f32.mrf.mxu0 }
 0x29f   :  { %v1956_v60 = vpop.f32.mrf.mxu1 }
 0x2a0   :  { %v1925_v0 = vadd.f32 %v1924_v53, %v1896_v12 }
 0x2a2   :  { %v1954_v31 = vadd.f32 %v1953_v4, %v1925_v0 }
 0x2a4   :  { %v1965_v40 = vadd.f32 %v1954_v31, %v4101_v58 }
 0x2a6   :  { %1969 = vst [vmem:[%s4363_s12] sm:$0xff] %v1965_v40 }
 0x2aa   :  { %v1869_v35 = vpop.f32.mrf.mxu3 }
 0x2ab   :  { %v1870_v57 = vadd.f32 %v2015_v24, %v1869_v35  ;;  %v1927_v25 = vpop.f32.mrf.mxu2 }
 0x2ad   :  { %v1899_v11 = vadd.f32 %v1898_v59, %v1870_v57 }
 0x2af   :  { %v1928_v54 = vadd.f32 %v1927_v25, %v1899_v11 }
 0x2b1   :  { %v1957_v42 = vadd.f32 %v1956_v60, %v1928_v54 }
 0x2b3   :  { %v1966_v63 = vadd.f32 %v1957_v42, %v4111_v61 }
 0x2b5   :  { %1970 = vst [vmem:[%s4363_s12 + $0x8] sm:$0xff] %v1966_v63 }
 0x2c2   :  { %v1901_v44 = vpop.f32.mrf.mxu0 }
 0x2c3   :  { %v1959_v37 = vpop.f32.mrf.mxu1 }
 0x2ce   :  { %v1872_v20 = vpop.f32.mrf.mxu3 }
 0x2cf   :  { %v1873_v58 = vadd.f32 %v2015_v24, %v1872_v20  ;;  %v1930_v49 = vpop.f32.mrf.mxu2 }
 0x2d1   :  { %v1902_v28 = vadd.f32 %v1901_v44, %v1873_v58 }
 0x2d3   :  { %v1931_v29 = vadd.f32 %v1930_v49, %v1902_v28  ;;  %v1904_v22 = vpop.f32.mrf.mxu0 }
 0x2d4   :  { %v1962_v48 = vpop.f32.mrf.mxu1 }
 0x2d5   :  { %v1960_v2 = vadd.f32 %v1959_v37, %v1931_v29 }
 0x2d7   :  { %v1967_v6 = vadd.f32 %v1960_v2, %v4205_v51 }
 0x2d9   :  { %1971 = vst [vmem:[%s4363_s12 + $0x10] sm:$0xff] %v1967_v6 }
 0x2df   :  { %v1875_v36 = vpop.f32.mrf.mxu3 }
 0x2e0   :  { %v1876_v61 = vadd.f32 %v2015_v24, %v1875_v36  ;;  %v1933_v16 = vpop.f32.mrf.mxu2 }
 0x2e2   :  { %v1905_v15 = vadd.f32 %v1904_v22, %v1876_v61 }
 0x2e4   :  { %v1934_v8 = vadd.f32 %v1933_v16, %v1905_v15 }
 0x2e6   :  { %v1963_v55 = vadd.f32 %v1962_v48, %v1934_v8 }
 0x2e8   :  { %v1968_v10 = vadd.f32 %v1963_v55, %v4269_v7 }
 0x2ea   :  { %1972 = vst [vmem:[%s4363_s12 + $0x18] sm:$0xff] %v1968_v10 }

</bundles_post_ra>
